<compile_context>
chip_gen: v5e
topology: v5e:2x2
jax: 0.10.0
libtpu: 0.0.40
codegen_flags: <defaults>
</compile_context>

<pallas_src>
import functools
import math

import jax
import jax.numpy as jnp
from jax import lax
from jax.experimental import pallas as pl
from jax.experimental.pallas import tpu as pltpu


# ----------------------------- in-kernel helpers -----------------------------

def _mxu(a, b):
    """bf16-input MXU matmul with f32 accumulation."""
    return jnp.dot(a.astype(jnp.bfloat16), b.astype(jnp.bfloat16),
                   preferred_element_type=jnp.float32)


def _ln(x, g, b, eps=1e-5):
    """LayerNorm over the last axis, one-pass stats.  x:(M,D) f32, g/b:(1,D)."""
    mu = jnp.mean(x, axis=-1, keepdims=True)
    ms = jnp.mean(x * x, axis=-1, keepdims=True)     # independent of mu -> no serial dep
    var = ms - mu * mu
    return (x - mu) * lax.rsqrt(var + eps) * g + b


def _gelu(y):
    # TODO(synk): PyTorch default nn.GELU uses the erf form; this is the tanh approximation.
    return 0.5 * y * (1.0 + jnp.tanh(0.7978845608028654 * (y + 0.044715 * y * y * y)))


def _mha(x_q, x_kv, wq_ref, bq_ref, wk_ref, bk_ref, wv_ref, bv_ref,
         wo_ref, bo_ref, num_heads, mask_add):
    """Multi-head attention with FUSED projections, fully in-VMEM.

    x_q:(Sq,D) x_kv:(Sk,D); wq/wk/wv/wo refs:(D,D); bq/bk/bv/bo refs:(1,D);
    mask_add: additive mask broadcastable to (Sq,Sk), or None.
    Projections produce all heads at once; per-head score/PV is a short static unroll;
    heads are lane-concatenated and hit a single output-projection matmul.
    """
    D = x_q.shape[-1]
    d_head = D // num_heads
    scale = 1.0 / math.sqrt(d_head)

    # 3 fused projection matmuls (all heads), bf16 MXU feed, f32 accumulate.
    q = _mxu(x_q, wq_ref[...]) + bq_ref[...]          # (Sq, D)
    k = _mxu(x_kv, wk_ref[...]) + bk_ref[...]         # (Sk, D)
    v = _mxu(x_kv, wv_ref[...]) + bv_ref[...]         # (Sk, D)

    heads = []
    for hd in range(num_heads):                       # static unroll (H small)
        lo = hd * d_head
        q_h = q[:, lo:lo + d_head].astype(jnp.bfloat16)
        k_h = k[:, lo:lo + d_head].astype(jnp.bfloat16)
        v_h = v[:, lo:lo + d_head].astype(jnp.bfloat16)
        # scores = q_h @ k_h^T (contract last dims, bf16 in / f32 out)
        s = lax.dot_general(q_h, k_h, (((1,), (1,)), ((), ())),
                            preferred_element_type=jnp.float32) * scale
        if mask_add is not None:
            s = s + mask_add                          # mask + softmax strictly f32
        s = s - jnp.max(s, axis=-1, keepdims=True)
        p = jnp.exp(s)
        p = p * pl.reciprocal(jnp.sum(p, axis=-1, keepdims=True), approx=True)
        heads.append(jnp.dot(p.astype(jnp.bfloat16), v_h,
                             preferred_element_type=jnp.float32))
    o = jnp.concatenate(heads, axis=-1)               # (Sq, D) lane-concat of heads
    # single fused output projection: concat(o_h) @ Wo + bo
    return _mxu(o, wo_ref[...]) + bo_ref[...]


# ------------------------------ fused kernel ---------------------------------

def _fused_kernel(
        # per-batch inputs
        xpad_ref, h0_ref, padadd_ref,
        # encoder (grid-invariant)
        adj_ref, ekmask_ref, patch_w_ref,
        eln1g_ref, eln1b_ref,
        ewq_ref, ebq_ref, ewk_ref, ebk_ref, ewv_ref, ebv_ref, ewo_ref, ebo_ref,
        eln2g_ref, eln2b_ref,
        ew1_ref, eb1_ref, ew2_ref, eb2_ref,
        elnfg_ref, elnfb_ref,
        # decoder (grid-invariant)
        dln1g_ref, dln1b_ref,
        swq_ref, sbq_ref, swk_ref, sbk_ref, swv_ref, sbv_ref, swo_ref, sbo_ref,
        dln2g_ref, dln2b_ref,
        cwq_ref, cbq_ref, cwk_ref, cbk_ref, cwv_ref, cbv_ref, cwo_ref, cbo_ref,
        dln3g_ref, dln3b_ref,
        dw1_ref, db1_ref, dw2_ref, db2_ref,
        dlnfg_ref, dlnfb_ref,
        outw_ref, outb_ref,
        # output
        o_ref, *, num_heads):
    """One grid step == one batch element of the full encoder + decoder + vocab proj."""
    # ------------------------------ encoder ------------------------------
    x = xpad_ref[0]                                    # (S_pad, patch_dim); row0=CLS slot, tail=pad
    ekm = ekmask_ref[...]                              # (1, S_pad) additive key mask for pad rows
    # patch embedding; adj = [cls+pos0 ; patch_b+pos_i ; 0...] so row 0 becomes the CLS token
    enc = _mxu(x, patch_w_ref[...]) + adj_ref[...]     # (S_pad, D)

    # pre-LN self-attention block (residual fused; pad rows masked as keys)
    hn = _ln(enc, eln1g_ref[...], eln1b_ref[...])
    enc = enc + _mha(hn, hn, ewq_ref, ebq_ref, ewk_ref, ebk_ref, ewv_ref, ebv_ref,
                     ewo_ref, ebo_ref, num_heads, ekm)

    # pre-LN MLP block (residual fused)
    hn = _ln(enc, eln2g_ref[...], eln2b_ref[...])
    ff = _gelu(_mxu(hn, ew1_ref[...]) + eb1_ref[...])
    enc = enc + _mxu(ff, ew2_ref[...]) + eb2_ref[...]

    enc = _ln(enc, elnfg_ref[...], elnfb_ref[...])     # last_hidden_state, stays in VMEM

    # ------------------------------ decoder ------------------------------
    h = h0_ref[0]                                      # (T, D) tok-emb + pos-emb
    T = h.shape[0]

    # causal + key-padding additive mask generated in-kernel (no HBM mask tensor)
    row = lax.broadcasted_iota(jnp.int32, (T, T), 0)
    col = lax.broadcasted_iota(jnp.int32, (T, T), 1)
    causal = (col > row).astype(jnp.float32) * (-1e9) + padadd_ref[0]   # (T,T)+(1,T)

    # masked causal self-attention
    hn = _ln(h, dln1g_ref[...], dln1b_ref[...])
    h = h + _mha(hn, hn, swq_ref, sbq_ref, swk_ref, sbk_ref, swv_ref, sbv_ref,
                 swo_ref, sbo_ref, num_heads, causal)

    # cross-attention to the (VMEM-resident) encoder output; pad rows key-masked
    hn = _ln(h, dln2g_ref[...], dln2b_ref[...])
    h = h + _mha(hn, enc, cwq_ref, cbq_ref, cwk_ref, cbk_ref, cwv_ref, cbv_ref,
                 cwo_ref, cbo_ref, num_heads, ekm)

    # MLP block
    hn = _ln(h, dln3g_ref[...], dln3b_ref[...])
    ff = _gelu(_mxu(hn, dw1_ref[...]) + db1_ref[...])
    h = h + _mxu(ff, dw2_ref[...]) + db2_ref[...]

    # final LN + vocab projection (vocab pre-padded to a lane-dense multiple of 128)
    h = _ln(h, dlnfg_ref[...], dlnfb_ref[...])
    o_ref[0] = _mxu(h, outw_ref[...]) + outb_ref[...]


# ------------------------------ spec helpers ----------------------------------

def _batched_spec(a):
    """Per-batch block: leading axis indexed by the grid, rest full."""
    nd = a.ndim

    def imap(b):
        return (b,) + (0,) * (nd - 1)

    return pl.BlockSpec((1,) + tuple(a.shape[1:]), imap)


def _shared_spec(a):
    """Shared (weight) block: full array, same block every grid step -> fetched once."""
    zeros = (0,) * a.ndim

    def imap(b):
        return zeros

    return pl.BlockSpec(tuple(a.shape), imap)


# ----------------------------- forward pass --------------------------------------

def vision_encoder_decoder_forward(params, input_image, target_seq, padding_mask,
                                   patch, num_heads, vocab):
    """Mirrors VisionEncoderDecoder.forward: encoder(**input_image).last_hidden_state
    stays in VMEM; decoder(target_seq, encoder_output, padding_mask.bool()) -> logits."""
    enc_p, dec_p = params["encoder"], params["decoder"]
    pixel_values = input_image["pixel_values"]             # NCHW
    B, C, H, W = pixel_values.shape
    nh, nw = H // patch, W // patch
    N = nh * nw
    S = N + 1
    S_pad = ((S + 7) // 8) * 8                              # pad odd seq len to sublane multiple
    PD, D = enc_p["patch_w"].shape
    T = target_seq.shape[1]
    Vpad = dec_p["out_w"].shape[1]

    # ---------------- XLA glue (tiny, off the kernel) ----------------
    # patch extraction (flatten order = (ph, pw, C)); row 0 reserved for CLS, tail zero-padded
    x = pixel_values.reshape(B, C, nh, patch, nw, patch)
    x = x.transpose(0, 2, 4, 3, 5, 1).reshape(B, N, PD)
    xpad = jnp.zeros((B, S_pad, PD), jnp.float32).at[:, 1:S, :].set(x)

    # adj row 0 = cls + pos[0]; rows 1..N = patch_bias + pos[i]; pad rows zero
    adj_real = jnp.concatenate(
        [enc_p["cls"], jnp.broadcast_to(enc_p["patch_b"][None, :], (N, D))],
        axis=0) + enc_p["pos_emb"]                                              # (S, D)
    adj = jnp.zeros((S_pad, D), jnp.float32).at[:S, :].set(adj_real)            # (S_pad, D)

    # additive key mask for the padded encoder rows (enc self-attn + cross-attn)
    ekmask = jnp.where(jnp.arange(S_pad) < S, 0.0, -1e9).astype(jnp.float32).reshape(1, S_pad)

    # token + positional embedding (gather stays as XLA glue); independent of encoder output
    h0 = jnp.take(dec_p["tok_emb"], target_seq, axis=0) + dec_p["pos_emb"][None, :T, :]
    # tiny additive key-padding vector (True/1 == pad); full mask built in-kernel from iota
    pad_add = jnp.where(padding_mask.astype(bool), -1e9, 0.0).astype(jnp.float32).reshape(B, 1, T)

    ea, em = enc_p["attn"], enc_p["mlp"]
    sa, ca, dm = dec_p["self_attn"], dec_p["cross_attn"], dec_p["mlp"]

    args = [
        # per-batch
        xpad, h0, pad_add,
        # encoder shared
        adj, ekmask, enc_p["patch_w"],
        enc_p["ln1_g"], enc_p["ln1_b"],
        ea["wq"], ea["bq"], ea["wk"], ea["bk"], ea["wv"], ea["bv"], ea["wo"], ea["bo"],
        enc_p["ln2_g"], enc_p["ln2_b"],
        em["w1"], em["b1"], em["w2"], em["b2"],
        enc_p["lnf_g"], enc_p["lnf_b"],
        # decoder shared
        dec_p["ln1_g"], dec_p["ln1_b"],
        sa["wq"], sa["bq"], sa["wk"], sa["bk"], sa["wv"], sa["bv"], sa["wo"], sa["bo"],
        dec_p["ln2_g"], dec_p["ln2_b"],
        ca["wq"], ca["bq"], ca["wk"], ca["bk"], ca["wv"], ca["bv"], ca["wo"], ca["bo"],
        dec_p["ln3_g"], dec_p["ln3_b"],
        dm["w1"], dm["b1"], dm["w2"], dm["b2"],
        dec_p["lnf_g"], dec_p["lnf_b"],
        dec_p["out_w"], dec_p["out_b"],
    ]
    in_specs = [_batched_spec(v) for v in args[:3]] + [_shared_spec(v) for v in args[3:]]

    kernel = functools.partial(_fused_kernel, num_heads=num_heads)
    logits_pad = pl.pallas_call(
        kernel,
        out_shape=jax.ShapeDtypeStruct((B, T, Vpad), jnp.float32),
        grid=(B,),
        in_specs=in_specs,
        out_specs=pl.BlockSpec((1, T, Vpad), lambda b: (b, 0, 0)),
        compiler_params=pltpu.CompilerParams(
            dimension_semantics=("parallel",),          # batch shards across v7x's 2 TCs
            vmem_limit_bytes=32 * 1024 * 1024,
        ),
    )(*args)
    return logits_pad[:, :, :vocab]


# ----------------------------- parameter init -----------------------------------

def _attn_params(key, D, H):
    assert D % H == 0
    ks = jax.random.split(key, 4)
    s = 0.02
    # fused layouts: (D, H*Dh) projections, (H*Dh, D) output projection
    return dict(
        wq=s * jax.random.normal(ks[0], (D, D), jnp.float32), bq=jnp.zeros((1, D), jnp.float32),
        wk=s * jax.random.normal(ks[1], (D, D), jnp.float32), bk=jnp.zeros((1, D), jnp.float32),
        wv=s * jax.random.normal(ks[2], (D, D), jnp.float32), bv=jnp.zeros((1, D), jnp.float32),
        wo=s * jax.random.normal(ks[3], (D, D), jnp.float32), bo=jnp.zeros((1, D), jnp.float32),
    )


def _mlp_params(key, D, F):
    k1, k2 = jax.random.split(key)
    s = 0.02
    return dict(
        w1=s * jax.random.normal(k1, (D, F), jnp.float32), b1=jnp.zeros((1, F), jnp.float32),
        w2=s * jax.random.normal(k2, (F, D), jnp.float32), b2=jnp.zeros((1, D), jnp.float32),
    )


def init_params(key, *, C, patch, D, F, num_patches, vocab, max_T, num_heads):
    ke, kd = jax.random.split(key)
    kes = jax.random.split(ke, 5)
    kds = jax.random.split(kd, 6)
    s = 0.02
    ones = jnp.ones((1, D), jnp.float32)
    zeros = jnp.zeros((1, D), jnp.float32)
    vpad = ((vocab + 127) // 128) * 128
    encoder = dict(
        patch_w=s * jax.random.normal(kes[0], (patch * patch * C, D), jnp.float32),
        patch_b=jnp.zeros((D,), jnp.float32),
        cls=s * jax.random.normal(kes[1], (1, D), jnp.float32),
        pos_emb=s * jax.random.normal(kes[2], (num_patches + 1, D), jnp.float32),
        attn=_attn_params(kes[3], D, num_heads),
        mlp=_mlp_params(kes[4], D, F),
        ln1_g=ones, ln1_b=zeros, ln2_g=ones, ln2_b=zeros, lnf_g=ones, lnf_b=zeros,
    )
    decoder = dict(
        tok_emb=s * jax.random.normal(kds[0], (vocab, D), jnp.float32),
        pos_emb=s * jax.random.normal(kds[1], (max_T, D), jnp.float32),
        self_attn=_attn_params(kds[2], D, num_heads),
        cross_attn=_attn_params(kds[3], D, num_heads),
        mlp=_mlp_params(kds[4], D, F),
        # vocab projection pre-padded ONCE to a lane-dense multiple of 128
        out_w=jnp.zeros((D, vpad), jnp.float32).at[:, :vocab].set(
            s * jax.random.normal(kds[5], (D, vocab), jnp.float32)),
        out_b=jnp.zeros((1, vpad), jnp.float32),
        ln1_g=ones, ln1_b=zeros, ln2_g=ones, ln2_b=zeros,
        ln3_g=ones, ln3_b=zeros, lnf_g=ones, lnf_b=zeros,
    )
    return dict(encoder=encoder, decoder=decoder)


# ---------------------------------- main -----------------------------------------

if __name__ == "__main__":
    B, C, H, W = 2, 4, 16, 16
    PATCH = 4
    D = 32
    NUM_HEADS = 4
    MLP_DIM = 64
    VOCAB = 50
    T = 8
    NUM_PATCHES = (H // PATCH) * (W // PATCH)

    root = jax.random.PRNGKey(0)
    kp, kimg, kseq = jax.random.split(root, 3)

    params = init_params(kp, C=C, patch=PATCH, D=D, F=MLP_DIM,
                         num_patches=NUM_PATCHES, vocab=VOCAB, max_T=T,
                         num_heads=NUM_HEADS)

    pixel_values = jax.random.normal(kimg, (B, C, H, W), jnp.float32)       # NCHW
    input_image = {"pixel_values": pixel_values}
    target_seq = jax.random.randint(kseq, (B, T), 0, VOCAB, jnp.int32)
    # last two positions of each sequence are padding (1 == pad)
    padding_mask = jnp.zeros((B, T), jnp.int32).at[:, T - 2:].set(1)

    fwd = jax.jit(functools.partial(vision_encoder_decoder_forward,
                                    patch=PATCH, num_heads=NUM_HEADS, vocab=VOCAB))
    logits = fwd(params, input_image, target_seq, padding_mask)
    jax.block_until_ready(logits)

    assert logits.shape == (B, T, VOCAB), logits.shape
    assert jnp.all(jnp.isfinite(logits))
    print("KERNEL_OK")
</pallas_src>

<mosaic_0001>
module attributes {stable_mosaic.version = 11 : i64} {
  func.func @_fused_kernel(%arg0: i32, %arg1: memref<1x24x64xf32, #tpu.memory_space<vmem>>, %arg2: memref<1x8x32xf32, #tpu.memory_space<vmem>>, %arg3: memref<1x1x8xf32, #tpu.memory_space<vmem>>, %arg4: memref<24x32xf32, #tpu.memory_space<vmem>>, %arg5: memref<1x24xf32, #tpu.memory_space<vmem>>, %arg6: memref<64x32xf32, #tpu.memory_space<vmem>>, %arg7: memref<1x32xf32, #tpu.memory_space<vmem>>, %arg8: memref<1x32xf32, #tpu.memory_space<vmem>>, %arg9: memref<32x32xf32, #tpu.memory_space<vmem>>, %arg10: memref<1x32xf32, #tpu.memory_space<vmem>>, %arg11: memref<32x32xf32, #tpu.memory_space<vmem>>, %arg12: memref<1x32xf32, #tpu.memory_space<vmem>>, %arg13: memref<32x32xf32, #tpu.memory_space<vmem>>, %arg14: memref<1x32xf32, #tpu.memory_space<vmem>>, %arg15: memref<32x32xf32, #tpu.memory_space<vmem>>, %arg16: memref<1x32xf32, #tpu.memory_space<vmem>>, %arg17: memref<1x32xf32, #tpu.memory_space<vmem>>, %arg18: memref<1x32xf32, #tpu.memory_space<vmem>>, %arg19: memref<32x64xf32, #tpu.memory_space<vmem>>, %arg20: memref<1x64xf32, #tpu.memory_space<vmem>>, %arg21: memref<64x32xf32, #tpu.memory_space<vmem>>, %arg22: memref<1x32xf32, #tpu.memory_space<vmem>>, %arg23: memref<1x32xf32, #tpu.memory_space<vmem>>, %arg24: memref<1x32xf32, #tpu.memory_space<vmem>>, %arg25: memref<1x32xf32, #tpu.memory_space<vmem>>, %arg26: memref<1x32xf32, #tpu.memory_space<vmem>>, %arg27: memref<32x32xf32, #tpu.memory_space<vmem>>, %arg28: memref<1x32xf32, #tpu.memory_space<vmem>>, %arg29: memref<32x32xf32, #tpu.memory_space<vmem>>, %arg30: memref<1x32xf32, #tpu.memory_space<vmem>>, %arg31: memref<32x32xf32, #tpu.memory_space<vmem>>, %arg32: memref<1x32xf32, #tpu.memory_space<vmem>>, %arg33: memref<32x32xf32, #tpu.memory_space<vmem>>, %arg34: memref<1x32xf32, #tpu.memory_space<vmem>>, %arg35: memref<1x32xf32, #tpu.memory_space<vmem>>, %arg36: memref<1x32xf32, #tpu.memory_space<vmem>>, %arg37: memref<32x32xf32, #tpu.memory_space<vmem>>, %arg38: memref<1x32xf32, #tpu.memory_space<vmem>>, %arg39: memref<32x32xf32, #tpu.memory_space<vmem>>, %arg40: memref<1x32xf32, #tpu.memory_space<vmem>>, %arg41: memref<32x32xf32, #tpu.memory_space<vmem>>, %arg42: memref<1x32xf32, #tpu.memory_space<vmem>>, %arg43: memref<32x32xf32, #tpu.memory_space<vmem>>, %arg44: memref<1x32xf32, #tpu.memory_space<vmem>>, %arg45: memref<1x32xf32, #tpu.memory_space<vmem>>, %arg46: memref<1x32xf32, #tpu.memory_space<vmem>>, %arg47: memref<32x64xf32, #tpu.memory_space<vmem>>, %arg48: memref<1x64xf32, #tpu.memory_space<vmem>>, %arg49: memref<64x32xf32, #tpu.memory_space<vmem>>, %arg50: memref<1x32xf32, #tpu.memory_space<vmem>>, %arg51: memref<1x32xf32, #tpu.memory_space<vmem>>, %arg52: memref<1x32xf32, #tpu.memory_space<vmem>>, %arg53: memref<32x128xf32, #tpu.memory_space<vmem>>, %arg54: memref<1x128xf32, #tpu.memory_space<vmem>>, %arg55: memref<1x8x128xf32, #tpu.memory_space<vmem>>) attributes {dimension_semantics = [#tpu.dimension_semantics<parallel>], iteration_bounds = array<i64: 2>, scalar_prefetch = 0 : i64, scratch_operands = 0 : i64, tpu.core_type = #tpu.core_type<tc>, window_params = [{transform_indices = @transform_0, window_bounds = array<i64: 1, 24, 64>}, {transform_indices = @transform_1, window_bounds = array<i64: 1, 8, 32>}, {transform_indices = @transform_2, window_bounds = array<i64: 1, 1, 8>}, {pipeline_mode = #tpu.pipeline_mode<synchronous>, transform_indices = @transform_3, window_bounds = array<i64: 24, 32>}, {pipeline_mode = #tpu.pipeline_mode<synchronous>, transform_indices = @transform_4, window_bounds = array<i64: 1, 24>}, {pipeline_mode = #tpu.pipeline_mode<synchronous>, transform_indices = @transform_5, window_bounds = array<i64: 64, 32>}, {pipeline_mode = #tpu.pipeline_mode<synchronous>, transform_indices = @transform_6, window_bounds = array<i64: 1, 32>}, {pipeline_mode = #tpu.pipeline_mode<synchronous>, transform_indices = @transform_7, window_bounds = array<i64: 1, 32>}, {pipeline_mode = #tpu.pipeline_mode<synchronous>, transform_indices = @transform_8, window_bounds = array<i64: 32, 32>}, {pipeline_mode = #tpu.pipeline_mode<synchronous>, transform_indices = @transform_9, window_bounds = array<i64: 1, 32>}, {pipeline_mode = #tpu.pipeline_mode<synchronous>, transform_indices = @transform_10, window_bounds = array<i64: 32, 32>}, {pipeline_mode = #tpu.pipeline_mode<synchronous>, transform_indices = @transform_11, window_bounds = array<i64: 1, 32>}, {pipeline_mode = #tpu.pipeline_mode<synchronous>, transform_indices = @transform_12, window_bounds = array<i64: 32, 32>}, {pipeline_mode = #tpu.pipeline_mode<synchronous>, transform_indices = @transform_13, window_bounds = array<i64: 1, 32>}, {pipeline_mode = #tpu.pipeline_mode<synchronous>, transform_indices = @transform_14, window_bounds = array<i64: 32, 32>}, {pipeline_mode = #tpu.pipeline_mode<synchronous>, transform_indices = @transform_15, window_bounds = array<i64: 1, 32>}, {pipeline_mode = #tpu.pipeline_mode<synchronous>, transform_indices = @transform_16, window_bounds = array<i64: 1, 32>}, {pipeline_mode = #tpu.pipeline_mode<synchronous>, transform_indices = @transform_17, window_bounds = array<i64: 1, 32>}, {pipeline_mode = #tpu.pipeline_mode<synchronous>, transform_indices = @transform_18, window_bounds = array<i64: 32, 64>}, {pipeline_mode = #tpu.pipeline_mode<synchronous>, transform_indices = @transform_19, window_bounds = array<i64: 1, 64>}, {pipeline_mode = #tpu.pipeline_mode<synchronous>, transform_indices = @transform_20, window_bounds = array<i64: 64, 32>}, {pipeline_mode = #tpu.pipeline_mode<synchronous>, transform_indices = @transform_21, window_bounds = array<i64: 1, 32>}, {pipeline_mode = #tpu.pipeline_mode<synchronous>, transform_indices = @transform_22, window_bounds = array<i64: 1, 32>}, {pipeline_mode = #tpu.pipeline_mode<synchronous>, transform_indices = @transform_23, window_bounds = array<i64: 1, 32>}, {pipeline_mode = #tpu.pipeline_mode<synchronous>, transform_indices = @transform_24, window_bounds = array<i64: 1, 32>}, {pipeline_mode = #tpu.pipeline_mode<synchronous>, transform_indices = @transform_25, window_bounds = array<i64: 1, 32>}, {pipeline_mode = #tpu.pipeline_mode<synchronous>, transform_indices = @transform_26, window_bounds = array<i64: 32, 32>}, {pipeline_mode = #tpu.pipeline_mode<synchronous>, transform_indices = @transform_27, window_bounds = array<i64: 1, 32>}, {pipeline_mode = #tpu.pipeline_mode<synchronous>, transform_indices = @transform_28, window_bounds = array<i64: 32, 32>}, {pipeline_mode = #tpu.pipeline_mode<synchronous>, transform_indices = @transform_29, window_bounds = array<i64: 1, 32>}, {pipeline_mode = #tpu.pipeline_mode<synchronous>, transform_indices = @transform_30, window_bounds = array<i64: 32, 32>}, {pipeline_mode = #tpu.pipeline_mode<synchronous>, transform_indices = @transform_31, window_bounds = array<i64: 1, 32>}, {pipeline_mode = #tpu.pipeline_mode<synchronous>, transform_indices = @transform_32, window_bounds = array<i64: 32, 32>}, {pipeline_mode = #tpu.pipeline_mode<synchronous>, transform_indices = @transform_33, window_bounds = array<i64: 1, 32>}, {pipeline_mode = #tpu.pipeline_mode<synchronous>, transform_indices = @transform_34, window_bounds = array<i64: 1, 32>}, {pipeline_mode = #tpu.pipeline_mode<synchronous>, transform_indices = @transform_35, window_bounds = array<i64: 1, 32>}, {pipeline_mode = #tpu.pipeline_mode<synchronous>, transform_indices = @transform_36, window_bounds = array<i64: 32, 32>}, {pipeline_mode = #tpu.pipeline_mode<synchronous>, transform_indices = @transform_37, window_bounds = array<i64: 1, 32>}, {pipeline_mode = #tpu.pipeline_mode<synchronous>, transform_indices = @transform_38, window_bounds = array<i64: 32, 32>}, {pipeline_mode = #tpu.pipeline_mode<synchronous>, transform_indices = @transform_39, window_bounds = array<i64: 1, 32>}, {pipeline_mode = #tpu.pipeline_mode<synchronous>, transform_indices = @transform_40, window_bounds = array<i64: 32, 32>}, {pipeline_mode = #tpu.pipeline_mode<synchronous>, transform_indices = @transform_41, window_bounds = array<i64: 1, 32>}, {pipeline_mode = #tpu.pipeline_mode<synchronous>, transform_indices = @transform_42, window_bounds = array<i64: 32, 32>}, {pipeline_mode = #tpu.pipeline_mode<synchronous>, transform_indices = @transform_43, window_bounds = array<i64: 1, 32>}, {pipeline_mode = #tpu.pipeline_mode<synchronous>, transform_indices = @transform_44, window_bounds = array<i64: 1, 32>}, {pipeline_mode = #tpu.pipeline_mode<synchronous>, transform_indices = @transform_45, window_bounds = array<i64: 1, 32>}, {pipeline_mode = #tpu.pipeline_mode<synchronous>, transform_indices = @transform_46, window_bounds = array<i64: 32, 64>}, {pipeline_mode = #tpu.pipeline_mode<synchronous>, transform_indices = @transform_47, window_bounds = array<i64: 1, 64>}, {pipeline_mode = #tpu.pipeline_mode<synchronous>, transform_indices = @transform_48, window_bounds = array<i64: 64, 32>}, {pipeline_mode = #tpu.pipeline_mode<synchronous>, transform_indices = @transform_49, window_bounds = array<i64: 1, 32>}, {pipeline_mode = #tpu.pipeline_mode<synchronous>, transform_indices = @transform_50, window_bounds = array<i64: 1, 32>}, {pipeline_mode = #tpu.pipeline_mode<synchronous>, transform_indices = @transform_51, window_bounds = array<i64: 1, 32>}, {pipeline_mode = #tpu.pipeline_mode<synchronous>, transform_indices = @transform_52, window_bounds = array<i64: 32, 128>}, {pipeline_mode = #tpu.pipeline_mode<synchronous>, transform_indices = @transform_53, window_bounds = array<i64: 1, 128>}, {transform_indices = @transform_54, window_bounds = array<i64: 1, 8, 128>}]} {
    %c0 = arith.constant 0 : index
    %c0_0 = arith.constant 0 : index
    %c0_1 = arith.constant 0 : index
    %0 = vector.load %arg1[%c0, %c0_0, %c0_1] : memref<1x24x64xf32, #tpu.memory_space<vmem>>, vector<1x24x64xf32>
    %1 = vector.shape_cast %0 : vector<1x24x64xf32> to vector<24x64xf32>
    %c0_2 = arith.constant 0 : index
    %c0_3 = arith.constant 0 : index
    %2 = vector.load %arg5[%c0_2, %c0_3] : memref<1x24xf32, #tpu.memory_space<vmem>>, vector<1x24xf32>
    %c0_4 = arith.constant 0 : index
    %c0_5 = arith.constant 0 : index
    %3 = vector.load %arg6[%c0_4, %c0_5] : memref<64x32xf32, #tpu.memory_space<vmem>>, vector<64x32xf32>
    %4 = arith.truncf %1 : vector<24x64xf32> to vector<24x64xbf16>
    %5 = arith.truncf %3 : vector<64x32xf32> to vector<64x32xbf16>
    %cst = arith.constant dense<0.000000e+00> : vector<24x32xf32>
    %6 = tpu.matmul %4, %5, %cst {dimension_numbers = #tpu.dot_dimension_numbers<[1], [0], [0], [1], [0, 0, 1, 1], [], []>} : vector<24x64xbf16>, vector<64x32xbf16>, vector<24x32xf32> -> vector<24x32xf32>
    %c0_6 = arith.constant 0 : index
    %c0_7 = arith.constant 0 : index
    %7 = vector.load %arg4[%c0_6, %c0_7] : memref<24x32xf32, #tpu.memory_space<vmem>>, vector<24x32xf32>
    %8 = arith.addf %6, %7 : vector<24x32xf32>
    %c0_8 = arith.constant 0 : index
    %c0_9 = arith.constant 0 : index
    %9 = vector.load %arg7[%c0_8, %c0_9] : memref<1x32xf32, #tpu.memory_space<vmem>>, vector<1x32xf32>
    %c0_10 = arith.constant 0 : index
    %c0_11 = arith.constant 0 : index
    %10 = vector.load %arg8[%c0_10, %c0_11] : memref<1x32xf32, #tpu.memory_space<vmem>>, vector<1x32xf32>
    %cst_12 = arith.constant dense<0.000000e+00> : vector<24xf32>
    %11 = vector.multi_reduction <add>, %8, %cst_12 [1] : vector<24x32xf32> to vector<24xf32>
    %12 = vector.shape_cast %11 : vector<24xf32> to vector<24x1xf32>
    %cst_13 = arith.constant 3.200000e+01 : f32
    %13 = vector.broadcast %cst_13 : f32 to vector<24x1xf32>
    %14 = arith.divf %12, %13 : vector<24x1xf32>
    %15 = arith.mulf %8, %8 : vector<24x32xf32>
    %cst_14 = arith.constant dense<0.000000e+00> : vector<24xf32>
    %16 = vector.multi_reduction <add>, %15, %cst_14 [1] : vector<24x32xf32> to vector<24xf32>
    %17 = vector.shape_cast %16 : vector<24xf32> to vector<24x1xf32>
    %cst_15 = arith.constant 3.200000e+01 : f32
    %18 = vector.broadcast %cst_15 : f32 to vector<24x1xf32>
    %19 = arith.divf %17, %18 : vector<24x1xf32>
    %20 = arith.mulf %14, %14 : vector<24x1xf32>
    %21 = arith.subf %19, %20 : vector<24x1xf32>
    %22 = vector.broadcast %14 : vector<24x1xf32> to vector<24x32xf32>
    %23 = arith.subf %8, %22 : vector<24x32xf32>
    %cst_16 = arith.constant 9.99999974E-6 : f32
    %24 = vector.broadcast %cst_16 : f32 to vector<24x1xf32>
    %25 = arith.addf %21, %24 : vector<24x1xf32>
    %26 = math.rsqrt %25 : vector<24x1xf32>
    %27 = vector.broadcast %26 : vector<24x1xf32> to vector<24x32xf32>
    %28 = arith.mulf %23, %27 : vector<24x32xf32>
    %29 = vector.broadcast %9 : vector<1x32xf32> to vector<24x32xf32>
    %30 = arith.mulf %28, %29 : vector<24x32xf32>
    %31 = vector.broadcast %10 : vector<1x32xf32> to vector<24x32xf32>
    %32 = arith.addf %30, %31 : vector<24x32xf32>
    %c0_17 = arith.constant 0 : index
    %c0_18 = arith.constant 0 : index
    %33 = vector.load %arg9[%c0_17, %c0_18] : memref<32x32xf32, #tpu.memory_space<vmem>>, vector<32x32xf32>
    %34 = arith.truncf %32 : vector<24x32xf32> to vector<24x32xbf16>
    %35 = arith.truncf %33 : vector<32x32xf32> to vector<32x32xbf16>
    %cst_19 = arith.constant dense<0.000000e+00> : vector<24x32xf32>
    %36 = tpu.matmul %34, %35, %cst_19 {dimension_numbers = #tpu.dot_dimension_numbers<[1], [0], [0], [1], [0, 0, 1, 1], [], []>} : vector<24x32xbf16>, vector<32x32xbf16>, vector<24x32xf32> -> vector<24x32xf32>
    %c0_20 = arith.constant 0 : index
    %c0_21 = arith.constant 0 : index
    %37 = vector.load %arg10[%c0_20, %c0_21] : memref<1x32xf32, #tpu.memory_space<vmem>>, vector<1x32xf32>
    %38 = vector.broadcast %37 : vector<1x32xf32> to vector<24x32xf32>
    %39 = arith.addf %36, %38 : vector<24x32xf32>
    %c0_22 = arith.constant 0 : index
    %c0_23 = arith.constant 0 : index
    %40 = vector.load %arg11[%c0_22, %c0_23] : memref<32x32xf32, #tpu.memory_space<vmem>>, vector<32x32xf32>
    %41 = arith.truncf %32 : vector<24x32xf32> to vector<24x32xbf16>
    %42 = arith.truncf %40 : vector<32x32xf32> to vector<32x32xbf16>
    %cst_24 = arith.constant dense<0.000000e+00> : vector<24x32xf32>
    %43 = tpu.matmul %41, %42, %cst_24 {dimension_numbers = #tpu.dot_dimension_numbers<[1], [0], [0], [1], [0, 0, 1, 1], [], []>} : vector<24x32xbf16>, vector<32x32xbf16>, vector<24x32xf32> -> vector<24x32xf32>
    %c0_25 = arith.constant 0 : index
    %c0_26 = arith.constant 0 : index
    %44 = vector.load %arg12[%c0_25, %c0_26] : memref<1x32xf32, #tpu.memory_space<vmem>>, vector<1x32xf32>
    %45 = vector.broadcast %44 : vector<1x32xf32> to vector<24x32xf32>
    %46 = arith.addf %43, %45 : vector<24x32xf32>
    %c0_27 = arith.constant 0 : index
    %c0_28 = arith.constant 0 : index
    %47 = vector.load %arg13[%c0_27, %c0_28] : memref<32x32xf32, #tpu.memory_space<vmem>>, vector<32x32xf32>
    %48 = arith.truncf %32 : vector<24x32xf32> to vector<24x32xbf16>
    %49 = arith.truncf %47 : vector<32x32xf32> to vector<32x32xbf16>
    %cst_29 = arith.constant dense<0.000000e+00> : vector<24x32xf32>
    %50 = tpu.matmul %48, %49, %cst_29 {dimension_numbers = #tpu.dot_dimension_numbers<[1], [0], [0], [1], [0, 0, 1, 1], [], []>} : vector<24x32xbf16>, vector<32x32xbf16>, vector<24x32xf32> -> vector<24x32xf32>
    %c0_30 = arith.constant 0 : index
    %c0_31 = arith.constant 0 : index
    %51 = vector.load %arg14[%c0_30, %c0_31] : memref<1x32xf32, #tpu.memory_space<vmem>>, vector<1x32xf32>
    %52 = vector.broadcast %51 : vector<1x32xf32> to vector<24x32xf32>
    %53 = arith.addf %50, %52 : vector<24x32xf32>
    %54 = vector.extract_strided_slice %39 {offsets = [0, 0], sizes = [24, 8], strides = [1, 1]} : vector<24x32xf32> to vector<24x8xf32>
    %55 = arith.truncf %54 : vector<24x8xf32> to vector<24x8xbf16>
    %56 = vector.extract_strided_slice %46 {offsets = [0, 0], sizes = [24, 8], strides = [1, 1]} : vector<24x32xf32> to vector<24x8xf32>
    %57 = arith.truncf %56 : vector<24x8xf32> to vector<24x8xbf16>
    %58 = vector.extract_strided_slice %53 {offsets = [0, 0], sizes = [24, 8], strides = [1, 1]} : vector<24x32xf32> to vector<24x8xf32>
    %59 = arith.truncf %58 : vector<24x8xf32> to vector<24x8xbf16>
    %cst_32 = arith.constant dense<0.000000e+00> : vector<24x24xf32>
    %60 = tpu.matmul %55, %57, %cst_32 {dimension_numbers = #tpu.dot_dimension_numbers<[1], [1], [0], [0], [0, 0, 1, 0], [], []>} : vector<24x8xbf16>, vector<24x8xbf16>, vector<24x24xf32> -> vector<24x24xf32>
    %cst_33 = arith.constant 0.353553385 : f32
    %61 = vector.broadcast %cst_33 : f32 to vector<24x24xf32>
    %62 = arith.mulf %60, %61 : vector<24x24xf32>
    %63 = vector.broadcast %2 : vector<1x24xf32> to vector<24x24xf32>
    %64 = arith.addf %62, %63 : vector<24x24xf32>
    %cst_34 = arith.constant dense<0xFF800000> : vector<24xf32>
    %65 = vector.multi_reduction <maximumf>, %64, %cst_34 [1] : vector<24x24xf32> to vector<24xf32>
    %66 = vector.shape_cast %65 : vector<24xf32> to vector<24x1xf32>
    %67 = vector.broadcast %66 : vector<24x1xf32> to vector<24x24xf32>
    %68 = arith.subf %64, %67 : vector<24x24xf32>
    %69 = math.exp %68 : vector<24x24xf32>
    %cst_35 = arith.constant dense<0.000000e+00> : vector<24xf32>
    %70 = vector.multi_reduction <add>, %69, %cst_35 [1] : vector<24x24xf32> to vector<24xf32>
    %71 = vector.shape_cast %70 : vector<24xf32> to vector<24x1xf32>
    %72 = tpu.reciprocal %71 {approx = true} : vector<24x1xf32> -> vector<24x1xf32>
    %73 = vector.broadcast %72 : vector<24x1xf32> to vector<24x24xf32>
    %74 = arith.mulf %69, %73 : vector<24x24xf32>
    %75 = arith.truncf %74 : vector<24x24xf32> to vector<24x24xbf16>
    %cst_36 = arith.constant dense<0.000000e+00> : vector<24x8xf32>
    %76 = tpu.matmul %75, %59, %cst_36 {dimension_numbers = #tpu.dot_dimension_numbers<[1], [0], [0], [1], [0, 0, 1, 1], [], []>} : vector<24x24xbf16>, vector<24x8xbf16>, vector<24x8xf32> -> vector<24x8xf32>
    %77 = vector.extract_strided_slice %39 {offsets = [0, 8], sizes = [24, 8], strides = [1, 1]} : vector<24x32xf32> to vector<24x8xf32>
    %78 = arith.truncf %77 : vector<24x8xf32> to vector<24x8xbf16>
    %79 = vector.extract_strided_slice %46 {offsets = [0, 8], sizes = [24, 8], strides = [1, 1]} : vector<24x32xf32> to vector<24x8xf32>
    %80 = arith.truncf %79 : vector<24x8xf32> to vector<24x8xbf16>
    %81 = vector.extract_strided_slice %53 {offsets = [0, 8], sizes = [24, 8], strides = [1, 1]} : vector<24x32xf32> to vector<24x8xf32>
    %82 = arith.truncf %81 : vector<24x8xf32> to vector<24x8xbf16>
    %cst_37 = arith.constant dense<0.000000e+00> : vector<24x24xf32>
    %83 = tpu.matmul %78, %80, %cst_37 {dimension_numbers = #tpu.dot_dimension_numbers<[1], [1], [0], [0], [0, 0, 1, 0], [], []>} : vector<24x8xbf16>, vector<24x8xbf16>, vector<24x24xf32> -> vector<24x24xf32>
    %cst_38 = arith.constant 0.353553385 : f32
    %84 = vector.broadcast %cst_38 : f32 to vector<24x24xf32>
    %85 = arith.mulf %83, %84 : vector<24x24xf32>
    %86 = vector.broadcast %2 : vector<1x24xf32> to vector<24x24xf32>
    %87 = arith.addf %85, %86 : vector<24x24xf32>
    %cst_39 = arith.constant dense<0xFF800000> : vector<24xf32>
    %88 = vector.multi_reduction <maximumf>, %87, %cst_39 [1] : vector<24x24xf32> to vector<24xf32>
    %89 = vector.shape_cast %88 : vector<24xf32> to vector<24x1xf32>
    %90 = vector.broadcast %89 : vector<24x1xf32> to vector<24x24xf32>
    %91 = arith.subf %87, %90 : vector<24x24xf32>
    %92 = math.exp %91 : vector<24x24xf32>
    %cst_40 = arith.constant dense<0.000000e+00> : vector<24xf32>
    %93 = vector.multi_reduction <add>, %92, %cst_40 [1] : vector<24x24xf32> to vector<24xf32>
    %94 = vector.shape_cast %93 : vector<24xf32> to vector<24x1xf32>
    %95 = tpu.reciprocal %94 {approx = true} : vector<24x1xf32> -> vector<24x1xf32>
    %96 = vector.broadcast %95 : vector<24x1xf32> to vector<24x24xf32>
    %97 = arith.mulf %92, %96 : vector<24x24xf32>
    %98 = arith.truncf %97 : vector<24x24xf32> to vector<24x24xbf16>
    %cst_41 = arith.constant dense<0.000000e+00> : vector<24x8xf32>
    %99 = tpu.matmul %98, %82, %cst_41 {dimension_numbers = #tpu.dot_dimension_numbers<[1], [0], [0], [1], [0, 0, 1, 1], [], []>} : vector<24x24xbf16>, vector<24x8xbf16>, vector<24x8xf32> -> vector<24x8xf32>
    %100 = vector.extract_strided_slice %39 {offsets = [0, 16], sizes = [24, 8], strides = [1, 1]} : vector<24x32xf32> to vector<24x8xf32>
    %101 = arith.truncf %100 : vector<24x8xf32> to vector<24x8xbf16>
    %102 = vector.extract_strided_slice %46 {offsets = [0, 16], sizes = [24, 8], strides = [1, 1]} : vector<24x32xf32> to vector<24x8xf32>
    %103 = arith.truncf %102 : vector<24x8xf32> to vector<24x8xbf16>
    %104 = vector.extract_strided_slice %53 {offsets = [0, 16], sizes = [24, 8], strides = [1, 1]} : vector<24x32xf32> to vector<24x8xf32>
    %105 = arith.truncf %104 : vector<24x8xf32> to vector<24x8xbf16>
    %cst_42 = arith.constant dense<0.000000e+00> : vector<24x24xf32>
    %106 = tpu.matmul %101, %103, %cst_42 {dimension_numbers = #tpu.dot_dimension_numbers<[1], [1], [0], [0], [0, 0, 1, 0], [], []>} : vector<24x8xbf16>, vector<24x8xbf16>, vector<24x24xf32> -> vector<24x24xf32>
    %cst_43 = arith.constant 0.353553385 : f32
    %107 = vector.broadcast %cst_43 : f32 to vector<24x24xf32>
    %108 = arith.mulf %106, %107 : vector<24x24xf32>
    %109 = vector.broadcast %2 : vector<1x24xf32> to vector<24x24xf32>
    %110 = arith.addf %108, %109 : vector<24x24xf32>
    %cst_44 = arith.constant dense<0xFF800000> : vector<24xf32>
    %111 = vector.multi_reduction <maximumf>, %110, %cst_44 [1] : vector<24x24xf32> to vector<24xf32>
    %112 = vector.shape_cast %111 : vector<24xf32> to vector<24x1xf32>
    %113 = vector.broadcast %112 : vector<24x1xf32> to vector<24x24xf32>
    %114 = arith.subf %110, %113 : vector<24x24xf32>
    %115 = math.exp %114 : vector<24x24xf32>
    %cst_45 = arith.constant dense<0.000000e+00> : vector<24xf32>
    %116 = vector.multi_reduction <add>, %115, %cst_45 [1] : vector<24x24xf32> to vector<24xf32>
    %117 = vector.shape_cast %116 : vector<24xf32> to vector<24x1xf32>
    %118 = tpu.reciprocal %117 {approx = true} : vector<24x1xf32> -> vector<24x1xf32>
    %119 = vector.broadcast %118 : vector<24x1xf32> to vector<24x24xf32>
    %120 = arith.mulf %115, %119 : vector<24x24xf32>
    %121 = arith.truncf %120 : vector<24x24xf32> to vector<24x24xbf16>
    %cst_46 = arith.constant dense<0.000000e+00> : vector<24x8xf32>
    %122 = tpu.matmul %121, %105, %cst_46 {dimension_numbers = #tpu.dot_dimension_numbers<[1], [0], [0], [1], [0, 0, 1, 1], [], []>} : vector<24x24xbf16>, vector<24x8xbf16>, vector<24x8xf32> -> vector<24x8xf32>
    %123 = vector.extract_strided_slice %39 {offsets = [0, 24], sizes = [24, 8], strides = [1, 1]} : vector<24x32xf32> to vector<24x8xf32>
    %124 = arith.truncf %123 : vector<24x8xf32> to vector<24x8xbf16>
    %125 = vector.extract_strided_slice %46 {offsets = [0, 24], sizes = [24, 8], strides = [1, 1]} : vector<24x32xf32> to vector<24x8xf32>
    %126 = arith.truncf %125 : vector<24x8xf32> to vector<24x8xbf16>
    %127 = vector.extract_strided_slice %53 {offsets = [0, 24], sizes = [24, 8], strides = [1, 1]} : vector<24x32xf32> to vector<24x8xf32>
    %128 = arith.truncf %127 : vector<24x8xf32> to vector<24x8xbf16>
    %cst_47 = arith.constant dense<0.000000e+00> : vector<24x24xf32>
    %129 = tpu.matmul %124, %126, %cst_47 {dimension_numbers = #tpu.dot_dimension_numbers<[1], [1], [0], [0], [0, 0, 1, 0], [], []>} : vector<24x8xbf16>, vector<24x8xbf16>, vector<24x24xf32> -> vector<24x24xf32>
    %cst_48 = arith.constant 0.353553385 : f32
    %130 = vector.broadcast %cst_48 : f32 to vector<24x24xf32>
    %131 = arith.mulf %129, %130 : vector<24x24xf32>
    %132 = vector.broadcast %2 : vector<1x24xf32> to vector<24x24xf32>
    %133 = arith.addf %131, %132 : vector<24x24xf32>
    %cst_49 = arith.constant dense<0xFF800000> : vector<24xf32>
    %134 = vector.multi_reduction <maximumf>, %133, %cst_49 [1] : vector<24x24xf32> to vector<24xf32>
    %135 = vector.shape_cast %134 : vector<24xf32> to vector<24x1xf32>
    %136 = vector.broadcast %135 : vector<24x1xf32> to vector<24x24xf32>
    %137 = arith.subf %133, %136 : vector<24x24xf32>
    %138 = math.exp %137 : vector<24x24xf32>
    %cst_50 = arith.constant dense<0.000000e+00> : vector<24xf32>
    %139 = vector.multi_reduction <add>, %138, %cst_50 [1] : vector<24x24xf32> to vector<24xf32>
    %140 = vector.shape_cast %139 : vector<24xf32> to vector<24x1xf32>
    %141 = tpu.reciprocal %140 {approx = true} : vector<24x1xf32> -> vector<24x1xf32>
    %142 = vector.broadcast %141 : vector<24x1xf32> to vector<24x24xf32>
    %143 = arith.mulf %138, %142 : vector<24x24xf32>
    %144 = arith.truncf %143 : vector<24x24xf32> to vector<24x24xbf16>
    %cst_51 = arith.constant dense<0.000000e+00> : vector<24x8xf32>
    %145 = tpu.matmul %144, %128, %cst_51 {dimension_numbers = #tpu.dot_dimension_numbers<[1], [0], [0], [1], [0, 0, 1, 1], [], []>} : vector<24x24xbf16>, vector<24x8xbf16>, vector<24x8xf32> -> vector<24x8xf32>
    %146 = tpu.concatenate %76, %99, %122, %145 in 1 : vector<24x8xf32>, vector<24x8xf32>, vector<24x8xf32>, vector<24x8xf32> -> vector<24x32xf32>
    %c0_52 = arith.constant 0 : index
    %c0_53 = arith.constant 0 : index
    %147 = vector.load %arg15[%c0_52, %c0_53] : memref<32x32xf32, #tpu.memory_space<vmem>>, vector<32x32xf32>
    %148 = arith.truncf %146 : vector<24x32xf32> to vector<24x32xbf16>
    %149 = arith.truncf %147 : vector<32x32xf32> to vector<32x32xbf16>
    %cst_54 = arith.constant dense<0.000000e+00> : vector<24x32xf32>
    %150 = tpu.matmul %148, %149, %cst_54 {dimension_numbers = #tpu.dot_dimension_numbers<[1], [0], [0], [1], [0, 0, 1, 1], [], []>} : vector<24x32xbf16>, vector<32x32xbf16>, vector<24x32xf32> -> vector<24x32xf32>
    %c0_55 = arith.constant 0 : index
    %c0_56 = arith.constant 0 : index
    %151 = vector.load %arg16[%c0_55, %c0_56] : memref<1x32xf32, #tpu.memory_space<vmem>>, vector<1x32xf32>
    %152 = vector.broadcast %151 : vector<1x32xf32> to vector<24x32xf32>
    %153 = arith.addf %150, %152 : vector<24x32xf32>
    %154 = arith.addf %8, %153 : vector<24x32xf32>
    %c0_57 = arith.constant 0 : index
    %c0_58 = arith.constant 0 : index
    %155 = vector.load %arg17[%c0_57, %c0_58] : memref<1x32xf32, #tpu.memory_space<vmem>>, vector<1x32xf32>
    %c0_59 = arith.constant 0 : index
    %c0_60 = arith.constant 0 : index
    %156 = vector.load %arg18[%c0_59, %c0_60] : memref<1x32xf32, #tpu.memory_space<vmem>>, vector<1x32xf32>
    %cst_61 = arith.constant dense<0.000000e+00> : vector<24xf32>
    %157 = vector.multi_reduction <add>, %154, %cst_61 [1] : vector<24x32xf32> to vector<24xf32>
    %158 = vector.shape_cast %157 : vector<24xf32> to vector<24x1xf32>
    %cst_62 = arith.constant 3.200000e+01 : f32
    %159 = vector.broadcast %cst_62 : f32 to vector<24x1xf32>
    %160 = arith.divf %158, %159 : vector<24x1xf32>
    %161 = arith.mulf %154, %154 : vector<24x32xf32>
    %cst_63 = arith.constant dense<0.000000e+00> : vector<24xf32>
    %162 = vector.multi_reduction <add>, %161, %cst_63 [1] : vector<24x32xf32> to vector<24xf32>
    %163 = vector.shape_cast %162 : vector<24xf32> to vector<24x1xf32>
    %cst_64 = arith.constant 3.200000e+01 : f32
    %164 = vector.broadcast %cst_64 : f32 to vector<24x1xf32>
    %165 = arith.divf %163, %164 : vector<24x1xf32>
    %166 = arith.mulf %160, %160 : vector<24x1xf32>
    %167 = arith.subf %165, %166 : vector<24x1xf32>
    %168 = vector.broadcast %160 : vector<24x1xf32> to vector<24x32xf32>
    %169 = arith.subf %154, %168 : vector<24x32xf32>
    %cst_65 = arith.constant 9.99999974E-6 : f32
    %170 = vector.broadcast %cst_65 : f32 to vector<24x1xf32>
    %171 = arith.addf %167, %170 : vector<24x1xf32>
    %172 = math.rsqrt %171 : vector<24x1xf32>
    %173 = vector.broadcast %172 : vector<24x1xf32> to vector<24x32xf32>
    %174 = arith.mulf %169, %173 : vector<24x32xf32>
    %175 = vector.broadcast %155 : vector<1x32xf32> to vector<24x32xf32>
    %176 = arith.mulf %174, %175 : vector<24x32xf32>
    %177 = vector.broadcast %156 : vector<1x32xf32> to vector<24x32xf32>
    %178 = arith.addf %176, %177 : vector<24x32xf32>
    %c0_66 = arith.constant 0 : index
    %c0_67 = arith.constant 0 : index
    %179 = vector.load %arg19[%c0_66, %c0_67] : memref<32x64xf32, #tpu.memory_space<vmem>>, vector<32x64xf32>
    %180 = arith.truncf %178 : vector<24x32xf32> to vector<24x32xbf16>
    %181 = arith.truncf %179 : vector<32x64xf32> to vector<32x64xbf16>
    %cst_68 = arith.constant dense<0.000000e+00> : vector<24x64xf32>
    %182 = tpu.matmul %180, %181, %cst_68 {dimension_numbers = #tpu.dot_dimension_numbers<[1], [0], [0], [1], [0, 0, 1, 1], [], []>} : vector<24x32xbf16>, vector<32x64xbf16>, vector<24x64xf32> -> vector<24x64xf32>
    %c0_69 = arith.constant 0 : index
    %c0_70 = arith.constant 0 : index
    %183 = vector.load %arg20[%c0_69, %c0_70] : memref<1x64xf32, #tpu.memory_space<vmem>>, vector<1x64xf32>
    %184 = vector.broadcast %183 : vector<1x64xf32> to vector<24x64xf32>
    %185 = arith.addf %182, %184 : vector<24x64xf32>
    %cst_71 = arith.constant 5.000000e-01 : f32
    %186 = vector.broadcast %cst_71 : f32 to vector<24x64xf32>
    %187 = arith.mulf %186, %185 : vector<24x64xf32>
    %cst_72 = arith.constant 4.471500e-02 : f32
    %188 = vector.broadcast %cst_72 : f32 to vector<24x64xf32>
    %189 = arith.mulf %188, %185 : vector<24x64xf32>
    %190 = arith.mulf %189, %185 : vector<24x64xf32>
    %191 = arith.mulf %190, %185 : vector<24x64xf32>
    %192 = arith.addf %185, %191 : vector<24x64xf32>
    %cst_73 = arith.constant 0.797884583 : f32
    %193 = vector.broadcast %cst_73 : f32 to vector<24x64xf32>
    %194 = arith.mulf %193, %192 : vector<24x64xf32>
    %195 = math.tanh %194 : vector<24x64xf32>
    %cst_74 = arith.constant 1.000000e+00 : f32
    %196 = vector.broadcast %cst_74 : f32 to vector<24x64xf32>
    %197 = arith.addf %196, %195 : vector<24x64xf32>
    %198 = arith.mulf %187, %197 : vector<24x64xf32>
    %c0_75 = arith.constant 0 : index
    %c0_76 = arith.constant 0 : index
    %199 = vector.load %arg21[%c0_75, %c0_76] : memref<64x32xf32, #tpu.memory_space<vmem>>, vector<64x32xf32>
    %200 = arith.truncf %198 : vector<24x64xf32> to vector<24x64xbf16>
    %201 = arith.truncf %199 : vector<64x32xf32> to vector<64x32xbf16>
    %cst_77 = arith.constant dense<0.000000e+00> : vector<24x32xf32>
    %202 = tpu.matmul %200, %201, %cst_77 {dimension_numbers = #tpu.dot_dimension_numbers<[1], [0], [0], [1], [0, 0, 1, 1], [], []>} : vector<24x64xbf16>, vector<64x32xbf16>, vector<24x32xf32> -> vector<24x32xf32>
    %203 = arith.addf %154, %202 : vector<24x32xf32>
    %c0_78 = arith.constant 0 : index
    %c0_79 = arith.constant 0 : index
    %204 = vector.load %arg22[%c0_78, %c0_79] : memref<1x32xf32, #tpu.memory_space<vmem>>, vector<1x32xf32>
    %205 = vector.broadcast %204 : vector<1x32xf32> to vector<24x32xf32>
    %206 = arith.addf %203, %205 : vector<24x32xf32>
    %c0_80 = arith.constant 0 : index
    %c0_81 = arith.constant 0 : index
    %207 = vector.load %arg23[%c0_80, %c0_81] : memref<1x32xf32, #tpu.memory_space<vmem>>, vector<1x32xf32>
    %c0_82 = arith.constant 0 : index
    %c0_83 = arith.constant 0 : index
    %208 = vector.load %arg24[%c0_82, %c0_83] : memref<1x32xf32, #tpu.memory_space<vmem>>, vector<1x32xf32>
    %cst_84 = arith.constant dense<0.000000e+00> : vector<24xf32>
    %209 = vector.multi_reduction <add>, %206, %cst_84 [1] : vector<24x32xf32> to vector<24xf32>
    %210 = vector.shape_cast %209 : vector<24xf32> to vector<24x1xf32>
    %cst_85 = arith.constant 3.200000e+01 : f32
    %211 = vector.broadcast %cst_85 : f32 to vector<24x1xf32>
    %212 = arith.divf %210, %211 : vector<24x1xf32>
    %213 = arith.mulf %206, %206 : vector<24x32xf32>
    %cst_86 = arith.constant dense<0.000000e+00> : vector<24xf32>
    %214 = vector.multi_reduction <add>, %213, %cst_86 [1] : vector<24x32xf32> to vector<24xf32>
    %215 = vector.shape_cast %214 : vector<24xf32> to vector<24x1xf32>
    %cst_87 = arith.constant 3.200000e+01 : f32
    %216 = vector.broadcast %cst_87 : f32 to vector<24x1xf32>
    %217 = arith.divf %215, %216 : vector<24x1xf32>
    %218 = arith.mulf %212, %212 : vector<24x1xf32>
    %219 = arith.subf %217, %218 : vector<24x1xf32>
    %220 = vector.broadcast %212 : vector<24x1xf32> to vector<24x32xf32>
    %221 = arith.subf %206, %220 : vector<24x32xf32>
    %cst_88 = arith.constant 9.99999974E-6 : f32
    %222 = vector.broadcast %cst_88 : f32 to vector<24x1xf32>
    %223 = arith.addf %219, %222 : vector<24x1xf32>
    %224 = math.rsqrt %223 : vector<24x1xf32>
    %225 = vector.broadcast %224 : vector<24x1xf32> to vector<24x32xf32>
    %226 = arith.mulf %221, %225 : vector<24x32xf32>
    %227 = vector.broadcast %207 : vector<1x32xf32> to vector<24x32xf32>
    %228 = arith.mulf %226, %227 : vector<24x32xf32>
    %229 = vector.broadcast %208 : vector<1x32xf32> to vector<24x32xf32>
    %230 = arith.addf %228, %229 : vector<24x32xf32>
    %c0_89 = arith.constant 0 : index
    %c0_90 = arith.constant 0 : index
    %c0_91 = arith.constant 0 : index
    %231 = vector.load %arg2[%c0_89, %c0_90, %c0_91] : memref<1x8x32xf32, #tpu.memory_space<vmem>>, vector<1x8x32xf32>
    %232 = vector.shape_cast %231 : vector<1x8x32xf32> to vector<8x32xf32>
    %233 = tpu.iota {dimensions = array<i32: 0>} : vector<8x8xi32>
    %234 = tpu.iota {dimensions = array<i32: 1>} : vector<8x8xi32>
    %235 = arith.cmpi sgt, %234, %233 : vector<8x8xi32>
    %236 = arith.extui %235 : vector<8x8xi1> to vector<8x8xi32>
    %237 = arith.sitofp %236 : vector<8x8xi32> to vector<8x8xf32>
    %cst_92 = arith.constant -1.000000e+09 : f32
    %238 = vector.broadcast %cst_92 : f32 to vector<8x8xf32>
    %239 = arith.mulf %237, %238 : vector<8x8xf32>
    %c0_93 = arith.constant 0 : index
    %c0_94 = arith.constant 0 : index
    %c0_95 = arith.constant 0 : index
    %240 = vector.load %arg3[%c0_93, %c0_94, %c0_95] : memref<1x1x8xf32, #tpu.memory_space<vmem>>, vector<1x1x8xf32>
    %241 = vector.shape_cast %240 : vector<1x1x8xf32> to vector<1x8xf32>
    %242 = vector.broadcast %241 : vector<1x8xf32> to vector<8x8xf32>
    %243 = arith.addf %239, %242 : vector<8x8xf32>
    %c0_96 = arith.constant 0 : index
    %c0_97 = arith.constant 0 : index
    %244 = vector.load %arg25[%c0_96, %c0_97] : memref<1x32xf32, #tpu.memory_space<vmem>>, vector<1x32xf32>
    %c0_98 = arith.constant 0 : index
    %c0_99 = arith.constant 0 : index
    %245 = vector.load %arg26[%c0_98, %c0_99] : memref<1x32xf32, #tpu.memory_space<vmem>>, vector<1x32xf32>
    %cst_100 = arith.constant dense<0.000000e+00> : vector<8xf32>
    %246 = vector.multi_reduction <add>, %232, %cst_100 [1] : vector<8x32xf32> to vector<8xf32>
    %247 = vector.shape_cast %246 : vector<8xf32> to vector<8x1xf32>
    %cst_101 = arith.constant 3.200000e+01 : f32
    %248 = vector.broadcast %cst_101 : f32 to vector<8x1xf32>
    %249 = arith.divf %247, %248 : vector<8x1xf32>
    %250 = arith.mulf %232, %232 : vector<8x32xf32>
    %cst_102 = arith.constant dense<0.000000e+00> : vector<8xf32>
    %251 = vector.multi_reduction <add>, %250, %cst_102 [1] : vector<8x32xf32> to vector<8xf32>
    %252 = vector.shape_cast %251 : vector<8xf32> to vector<8x1xf32>
    %cst_103 = arith.constant 3.200000e+01 : f32
    %253 = vector.broadcast %cst_103 : f32 to vector<8x1xf32>
    %254 = arith.divf %252, %253 : vector<8x1xf32>
    %255 = arith.mulf %249, %249 : vector<8x1xf32>
    %256 = arith.subf %254, %255 : vector<8x1xf32>
    %257 = vector.broadcast %249 : vector<8x1xf32> to vector<8x32xf32>
    %258 = arith.subf %232, %257 : vector<8x32xf32>
    %cst_104 = arith.constant 9.99999974E-6 : f32
    %259 = vector.broadcast %cst_104 : f32 to vector<8x1xf32>
    %260 = arith.addf %256, %259 : vector<8x1xf32>
    %261 = math.rsqrt %260 : vector<8x1xf32>
    %262 = vector.broadcast %261 : vector<8x1xf32> to vector<8x32xf32>
    %263 = arith.mulf %258, %262 : vector<8x32xf32>
    %264 = vector.broadcast %244 : vector<1x32xf32> to vector<8x32xf32>
    %265 = arith.mulf %263, %264 : vector<8x32xf32>
    %266 = vector.broadcast %245 : vector<1x32xf32> to vector<8x32xf32>
    %267 = arith.addf %265, %266 : vector<8x32xf32>
    %c0_105 = arith.constant 0 : index
    %c0_106 = arith.constant 0 : index
    %268 = vector.load %arg27[%c0_105, %c0_106] : memref<32x32xf32, #tpu.memory_space<vmem>>, vector<32x32xf32>
    %269 = arith.truncf %267 : vector<8x32xf32> to vector<8x32xbf16>
    %270 = arith.truncf %268 : vector<32x32xf32> to vector<32x32xbf16>
    %cst_107 = arith.constant dense<0.000000e+00> : vector<8x32xf32>
    %271 = tpu.matmul %269, %270, %cst_107 {dimension_numbers = #tpu.dot_dimension_numbers<[1], [0], [0], [1], [0, 0, 1, 1], [], []>} : vector<8x32xbf16>, vector<32x32xbf16>, vector<8x32xf32> -> vector<8x32xf32>
    %c0_108 = arith.constant 0 : index
    %c0_109 = arith.constant 0 : index
    %272 = vector.load %arg28[%c0_108, %c0_109] : memref<1x32xf32, #tpu.memory_space<vmem>>, vector<1x32xf32>
    %273 = vector.broadcast %272 : vector<1x32xf32> to vector<8x32xf32>
    %274 = arith.addf %271, %273 : vector<8x32xf32>
    %c0_110 = arith.constant 0 : index
    %c0_111 = arith.constant 0 : index
    %275 = vector.load %arg29[%c0_110, %c0_111] : memref<32x32xf32, #tpu.memory_space<vmem>>, vector<32x32xf32>
    %276 = arith.truncf %267 : vector<8x32xf32> to vector<8x32xbf16>
    %277 = arith.truncf %275 : vector<32x32xf32> to vector<32x32xbf16>
    %cst_112 = arith.constant dense<0.000000e+00> : vector<8x32xf32>
    %278 = tpu.matmul %276, %277, %cst_112 {dimension_numbers = #tpu.dot_dimension_numbers<[1], [0], [0], [1], [0, 0, 1, 1], [], []>} : vector<8x32xbf16>, vector<32x32xbf16>, vector<8x32xf32> -> vector<8x32xf32>
    %c0_113 = arith.constant 0 : index
    %c0_114 = arith.constant 0 : index
    %279 = vector.load %arg30[%c0_113, %c0_114] : memref<1x32xf32, #tpu.memory_space<vmem>>, vector<1x32xf32>
    %280 = vector.broadcast %279 : vector<1x32xf32> to vector<8x32xf32>
    %281 = arith.addf %278, %280 : vector<8x32xf32>
    %c0_115 = arith.constant 0 : index
    %c0_116 = arith.constant 0 : index
    %282 = vector.load %arg31[%c0_115, %c0_116] : memref<32x32xf32, #tpu.memory_space<vmem>>, vector<32x32xf32>
    %283 = arith.truncf %267 : vector<8x32xf32> to vector<8x32xbf16>
    %284 = arith.truncf %282 : vector<32x32xf32> to vector<32x32xbf16>
    %cst_117 = arith.constant dense<0.000000e+00> : vector<8x32xf32>
    %285 = tpu.matmul %283, %284, %cst_117 {dimension_numbers = #tpu.dot_dimension_numbers<[1], [0], [0], [1], [0, 0, 1, 1], [], []>} : vector<8x32xbf16>, vector<32x32xbf16>, vector<8x32xf32> -> vector<8x32xf32>
    %c0_118 = arith.constant 0 : index
    %c0_119 = arith.constant 0 : index
    %286 = vector.load %arg32[%c0_118, %c0_119] : memref<1x32xf32, #tpu.memory_space<vmem>>, vector<1x32xf32>
    %287 = vector.broadcast %286 : vector<1x32xf32> to vector<8x32xf32>
    %288 = arith.addf %285, %287 : vector<8x32xf32>
    %289 = vector.extract_strided_slice %274 {offsets = [0, 0], sizes = [8, 8], strides = [1, 1]} : vector<8x32xf32> to vector<8x8xf32>
    %290 = arith.truncf %289 : vector<8x8xf32> to vector<8x8xbf16>
    %291 = vector.extract_strided_slice %281 {offsets = [0, 0], sizes = [8, 8], strides = [1, 1]} : vector<8x32xf32> to vector<8x8xf32>
    %292 = arith.truncf %291 : vector<8x8xf32> to vector<8x8xbf16>
    %293 = vector.extract_strided_slice %288 {offsets = [0, 0], sizes = [8, 8], strides = [1, 1]} : vector<8x32xf32> to vector<8x8xf32>
    %294 = arith.truncf %293 : vector<8x8xf32> to vector<8x8xbf16>
    %cst_120 = arith.constant dense<0.000000e+00> : vector<8x8xf32>
    %295 = tpu.matmul %290, %292, %cst_120 {dimension_numbers = #tpu.dot_dimension_numbers<[1], [1], [0], [0], [0, 0, 1, 0], [], []>} : vector<8x8xbf16>, vector<8x8xbf16>, vector<8x8xf32> -> vector<8x8xf32>
    %cst_121 = arith.constant 0.353553385 : f32
    %296 = vector.broadcast %cst_121 : f32 to vector<8x8xf32>
    %297 = arith.mulf %295, %296 : vector<8x8xf32>
    %298 = arith.addf %297, %243 : vector<8x8xf32>
    %cst_122 = arith.constant dense<0xFF800000> : vector<8xf32>
    %299 = vector.multi_reduction <maximumf>, %298, %cst_122 [1] : vector<8x8xf32> to vector<8xf32>
    %300 = vector.shape_cast %299 : vector<8xf32> to vector<8x1xf32>
    %301 = vector.broadcast %300 : vector<8x1xf32> to vector<8x8xf32>
    %302 = arith.subf %298, %301 : vector<8x8xf32>
    %303 = math.exp %302 : vector<8x8xf32>
    %cst_123 = arith.constant dense<0.000000e+00> : vector<8xf32>
    %304 = vector.multi_reduction <add>, %303, %cst_123 [1] : vector<8x8xf32> to vector<8xf32>
    %305 = vector.shape_cast %304 : vector<8xf32> to vector<8x1xf32>
    %306 = tpu.reciprocal %305 {approx = true} : vector<8x1xf32> -> vector<8x1xf32>
    %307 = vector.broadcast %306 : vector<8x1xf32> to vector<8x8xf32>
    %308 = arith.mulf %303, %307 : vector<8x8xf32>
    %309 = arith.truncf %308 : vector<8x8xf32> to vector<8x8xbf16>
    %cst_124 = arith.constant dense<0.000000e+00> : vector<8x8xf32>
    %310 = tpu.matmul %309, %294, %cst_124 {dimension_numbers = #tpu.dot_dimension_numbers<[1], [0], [0], [1], [0, 0, 1, 1], [], []>} : vector<8x8xbf16>, vector<8x8xbf16>, vector<8x8xf32> -> vector<8x8xf32>
    %311 = vector.extract_strided_slice %274 {offsets = [0, 8], sizes = [8, 8], strides = [1, 1]} : vector<8x32xf32> to vector<8x8xf32>
    %312 = arith.truncf %311 : vector<8x8xf32> to vector<8x8xbf16>
    %313 = vector.extract_strided_slice %281 {offsets = [0, 8], sizes = [8, 8], strides = [1, 1]} : vector<8x32xf32> to vector<8x8xf32>
    %314 = arith.truncf %313 : vector<8x8xf32> to vector<8x8xbf16>
    %315 = vector.extract_strided_slice %288 {offsets = [0, 8], sizes = [8, 8], strides = [1, 1]} : vector<8x32xf32> to vector<8x8xf32>
    %316 = arith.truncf %315 : vector<8x8xf32> to vector<8x8xbf16>
    %cst_125 = arith.constant dense<0.000000e+00> : vector<8x8xf32>
    %317 = tpu.matmul %312, %314, %cst_125 {dimension_numbers = #tpu.dot_dimension_numbers<[1], [1], [0], [0], [0, 0, 1, 0], [], []>} : vector<8x8xbf16>, vector<8x8xbf16>, vector<8x8xf32> -> vector<8x8xf32>
    %cst_126 = arith.constant 0.353553385 : f32
    %318 = vector.broadcast %cst_126 : f32 to vector<8x8xf32>
    %319 = arith.mulf %317, %318 : vector<8x8xf32>
    %320 = arith.addf %319, %243 : vector<8x8xf32>
    %cst_127 = arith.constant dense<0xFF800000> : vector<8xf32>
    %321 = vector.multi_reduction <maximumf>, %320, %cst_127 [1] : vector<8x8xf32> to vector<8xf32>
    %322 = vector.shape_cast %321 : vector<8xf32> to vector<8x1xf32>
    %323 = vector.broadcast %322 : vector<8x1xf32> to vector<8x8xf32>
    %324 = arith.subf %320, %323 : vector<8x8xf32>
    %325 = math.exp %324 : vector<8x8xf32>
    %cst_128 = arith.constant dense<0.000000e+00> : vector<8xf32>
    %326 = vector.multi_reduction <add>, %325, %cst_128 [1] : vector<8x8xf32> to vector<8xf32>
    %327 = vector.shape_cast %326 : vector<8xf32> to vector<8x1xf32>
    %328 = tpu.reciprocal %327 {approx = true} : vector<8x1xf32> -> vector<8x1xf32>
    %329 = vector.broadcast %328 : vector<8x1xf32> to vector<8x8xf32>
    %330 = arith.mulf %325, %329 : vector<8x8xf32>
    %331 = arith.truncf %330 : vector<8x8xf32> to vector<8x8xbf16>
    %cst_129 = arith.constant dense<0.000000e+00> : vector<8x8xf32>
    %332 = tpu.matmul %331, %316, %cst_129 {dimension_numbers = #tpu.dot_dimension_numbers<[1], [0], [0], [1], [0, 0, 1, 1], [], []>} : vector<8x8xbf16>, vector<8x8xbf16>, vector<8x8xf32> -> vector<8x8xf32>
    %333 = vector.extract_strided_slice %274 {offsets = [0, 16], sizes = [8, 8], strides = [1, 1]} : vector<8x32xf32> to vector<8x8xf32>
    %334 = arith.truncf %333 : vector<8x8xf32> to vector<8x8xbf16>
    %335 = vector.extract_strided_slice %281 {offsets = [0, 16], sizes = [8, 8], strides = [1, 1]} : vector<8x32xf32> to vector<8x8xf32>
    %336 = arith.truncf %335 : vector<8x8xf32> to vector<8x8xbf16>
    %337 = vector.extract_strided_slice %288 {offsets = [0, 16], sizes = [8, 8], strides = [1, 1]} : vector<8x32xf32> to vector<8x8xf32>
    %338 = arith.truncf %337 : vector<8x8xf32> to vector<8x8xbf16>
    %cst_130 = arith.constant dense<0.000000e+00> : vector<8x8xf32>
    %339 = tpu.matmul %334, %336, %cst_130 {dimension_numbers = #tpu.dot_dimension_numbers<[1], [1], [0], [0], [0, 0, 1, 0], [], []>} : vector<8x8xbf16>, vector<8x8xbf16>, vector<8x8xf32> -> vector<8x8xf32>
    %cst_131 = arith.constant 0.353553385 : f32
    %340 = vector.broadcast %cst_131 : f32 to vector<8x8xf32>
    %341 = arith.mulf %339, %340 : vector<8x8xf32>
    %342 = arith.addf %341, %243 : vector<8x8xf32>
    %cst_132 = arith.constant dense<0xFF800000> : vector<8xf32>
    %343 = vector.multi_reduction <maximumf>, %342, %cst_132 [1] : vector<8x8xf32> to vector<8xf32>
    %344 = vector.shape_cast %343 : vector<8xf32> to vector<8x1xf32>
    %345 = vector.broadcast %344 : vector<8x1xf32> to vector<8x8xf32>
    %346 = arith.subf %342, %345 : vector<8x8xf32>
    %347 = math.exp %346 : vector<8x8xf32>
    %cst_133 = arith.constant dense<0.000000e+00> : vector<8xf32>
    %348 = vector.multi_reduction <add>, %347, %cst_133 [1] : vector<8x8xf32> to vector<8xf32>
    %349 = vector.shape_cast %348 : vector<8xf32> to vector<8x1xf32>
    %350 = tpu.reciprocal %349 {approx = true} : vector<8x1xf32> -> vector<8x1xf32>
    %351 = vector.broadcast %350 : vector<8x1xf32> to vector<8x8xf32>
    %352 = arith.mulf %347, %351 : vector<8x8xf32>
    %353 = arith.truncf %352 : vector<8x8xf32> to vector<8x8xbf16>
    %cst_134 = arith.constant dense<0.000000e+00> : vector<8x8xf32>
    %354 = tpu.matmul %353, %338, %cst_134 {dimension_numbers = #tpu.dot_dimension_numbers<[1], [0], [0], [1], [0, 0, 1, 1], [], []>} : vector<8x8xbf16>, vector<8x8xbf16>, vector<8x8xf32> -> vector<8x8xf32>
    %355 = vector.extract_strided_slice %274 {offsets = [0, 24], sizes = [8, 8], strides = [1, 1]} : vector<8x32xf32> to vector<8x8xf32>
    %356 = arith.truncf %355 : vector<8x8xf32> to vector<8x8xbf16>
    %357 = vector.extract_strided_slice %281 {offsets = [0, 24], sizes = [8, 8], strides = [1, 1]} : vector<8x32xf32> to vector<8x8xf32>
    %358 = arith.truncf %357 : vector<8x8xf32> to vector<8x8xbf16>
    %359 = vector.extract_strided_slice %288 {offsets = [0, 24], sizes = [8, 8], strides = [1, 1]} : vector<8x32xf32> to vector<8x8xf32>
    %360 = arith.truncf %359 : vector<8x8xf32> to vector<8x8xbf16>
    %cst_135 = arith.constant dense<0.000000e+00> : vector<8x8xf32>
    %361 = tpu.matmul %356, %358, %cst_135 {dimension_numbers = #tpu.dot_dimension_numbers<[1], [1], [0], [0], [0, 0, 1, 0], [], []>} : vector<8x8xbf16>, vector<8x8xbf16>, vector<8x8xf32> -> vector<8x8xf32>
    %cst_136 = arith.constant 0.353553385 : f32
    %362 = vector.broadcast %cst_136 : f32 to vector<8x8xf32>
    %363 = arith.mulf %361, %362 : vector<8x8xf32>
    %364 = arith.addf %363, %243 : vector<8x8xf32>
    %cst_137 = arith.constant dense<0xFF800000> : vector<8xf32>
    %365 = vector.multi_reduction <maximumf>, %364, %cst_137 [1] : vector<8x8xf32> to vector<8xf32>
    %366 = vector.shape_cast %365 : vector<8xf32> to vector<8x1xf32>
    %367 = vector.broadcast %366 : vector<8x1xf32> to vector<8x8xf32>
    %368 = arith.subf %364, %367 : vector<8x8xf32>
    %369 = math.exp %368 : vector<8x8xf32>
    %cst_138 = arith.constant dense<0.000000e+00> : vector<8xf32>
    %370 = vector.multi_reduction <add>, %369, %cst_138 [1] : vector<8x8xf32> to vector<8xf32>
    %371 = vector.shape_cast %370 : vector<8xf32> to vector<8x1xf32>
    %372 = tpu.reciprocal %371 {approx = true} : vector<8x1xf32> -> vector<8x1xf32>
    %373 = vector.broadcast %372 : vector<8x1xf32> to vector<8x8xf32>
    %374 = arith.mulf %369, %373 : vector<8x8xf32>
    %375 = arith.truncf %374 : vector<8x8xf32> to vector<8x8xbf16>
    %cst_139 = arith.constant dense<0.000000e+00> : vector<8x8xf32>
    %376 = tpu.matmul %375, %360, %cst_139 {dimension_numbers = #tpu.dot_dimension_numbers<[1], [0], [0], [1], [0, 0, 1, 1], [], []>} : vector<8x8xbf16>, vector<8x8xbf16>, vector<8x8xf32> -> vector<8x8xf32>
    %377 = tpu.concatenate %310, %332, %354, %376 in 1 : vector<8x8xf32>, vector<8x8xf32>, vector<8x8xf32>, vector<8x8xf32> -> vector<8x32xf32>
    %c0_140 = arith.constant 0 : index
    %c0_141 = arith.constant 0 : index
    %378 = vector.load %arg33[%c0_140, %c0_141] : memref<32x32xf32, #tpu.memory_space<vmem>>, vector<32x32xf32>
    %379 = arith.truncf %377 : vector<8x32xf32> to vector<8x32xbf16>
    %380 = arith.truncf %378 : vector<32x32xf32> to vector<32x32xbf16>
    %cst_142 = arith.constant dense<0.000000e+00> : vector<8x32xf32>
    %381 = tpu.matmul %379, %380, %cst_142 {dimension_numbers = #tpu.dot_dimension_numbers<[1], [0], [0], [1], [0, 0, 1, 1], [], []>} : vector<8x32xbf16>, vector<32x32xbf16>, vector<8x32xf32> -> vector<8x32xf32>
    %c0_143 = arith.constant 0 : index
    %c0_144 = arith.constant 0 : index
    %382 = vector.load %arg34[%c0_143, %c0_144] : memref<1x32xf32, #tpu.memory_space<vmem>>, vector<1x32xf32>
    %383 = vector.broadcast %382 : vector<1x32xf32> to vector<8x32xf32>
    %384 = arith.addf %381, %383 : vector<8x32xf32>
    %385 = arith.addf %232, %384 : vector<8x32xf32>
    %c0_145 = arith.constant 0 : index
    %c0_146 = arith.constant 0 : index
    %386 = vector.load %arg35[%c0_145, %c0_146] : memref<1x32xf32, #tpu.memory_space<vmem>>, vector<1x32xf32>
    %c0_147 = arith.constant 0 : index
    %c0_148 = arith.constant 0 : index
    %387 = vector.load %arg36[%c0_147, %c0_148] : memref<1x32xf32, #tpu.memory_space<vmem>>, vector<1x32xf32>
    %cst_149 = arith.constant dense<0.000000e+00> : vector<8xf32>
    %388 = vector.multi_reduction <add>, %385, %cst_149 [1] : vector<8x32xf32> to vector<8xf32>
    %389 = vector.shape_cast %388 : vector<8xf32> to vector<8x1xf32>
    %cst_150 = arith.constant 3.200000e+01 : f32
    %390 = vector.broadcast %cst_150 : f32 to vector<8x1xf32>
    %391 = arith.divf %389, %390 : vector<8x1xf32>
    %392 = arith.mulf %385, %385 : vector<8x32xf32>
    %cst_151 = arith.constant dense<0.000000e+00> : vector<8xf32>
    %393 = vector.multi_reduction <add>, %392, %cst_151 [1] : vector<8x32xf32> to vector<8xf32>
    %394 = vector.shape_cast %393 : vector<8xf32> to vector<8x1xf32>
    %cst_152 = arith.constant 3.200000e+01 : f32
    %395 = vector.broadcast %cst_152 : f32 to vector<8x1xf32>
    %396 = arith.divf %394, %395 : vector<8x1xf32>
    %397 = arith.mulf %391, %391 : vector<8x1xf32>
    %398 = arith.subf %396, %397 : vector<8x1xf32>
    %399 = vector.broadcast %391 : vector<8x1xf32> to vector<8x32xf32>
    %400 = arith.subf %385, %399 : vector<8x32xf32>
    %cst_153 = arith.constant 9.99999974E-6 : f32
    %401 = vector.broadcast %cst_153 : f32 to vector<8x1xf32>
    %402 = arith.addf %398, %401 : vector<8x1xf32>
    %403 = math.rsqrt %402 : vector<8x1xf32>
    %404 = vector.broadcast %403 : vector<8x1xf32> to vector<8x32xf32>
    %405 = arith.mulf %400, %404 : vector<8x32xf32>
    %406 = vector.broadcast %386 : vector<1x32xf32> to vector<8x32xf32>
    %407 = arith.mulf %405, %406 : vector<8x32xf32>
    %408 = vector.broadcast %387 : vector<1x32xf32> to vector<8x32xf32>
    %409 = arith.addf %407, %408 : vector<8x32xf32>
    %c0_154 = arith.constant 0 : index
    %c0_155 = arith.constant 0 : index
    %410 = vector.load %arg37[%c0_154, %c0_155] : memref<32x32xf32, #tpu.memory_space<vmem>>, vector<32x32xf32>
    %411 = arith.truncf %409 : vector<8x32xf32> to vector<8x32xbf16>
    %412 = arith.truncf %410 : vector<32x32xf32> to vector<32x32xbf16>
    %cst_156 = arith.constant dense<0.000000e+00> : vector<8x32xf32>
    %413 = tpu.matmul %411, %412, %cst_156 {dimension_numbers = #tpu.dot_dimension_numbers<[1], [0], [0], [1], [0, 0, 1, 1], [], []>} : vector<8x32xbf16>, vector<32x32xbf16>, vector<8x32xf32> -> vector<8x32xf32>
    %c0_157 = arith.constant 0 : index
    %c0_158 = arith.constant 0 : index
    %414 = vector.load %arg38[%c0_157, %c0_158] : memref<1x32xf32, #tpu.memory_space<vmem>>, vector<1x32xf32>
    %415 = vector.broadcast %414 : vector<1x32xf32> to vector<8x32xf32>
    %416 = arith.addf %413, %415 : vector<8x32xf32>
    %c0_159 = arith.constant 0 : index
    %c0_160 = arith.constant 0 : index
    %417 = vector.load %arg39[%c0_159, %c0_160] : memref<32x32xf32, #tpu.memory_space<vmem>>, vector<32x32xf32>
    %418 = arith.truncf %230 : vector<24x32xf32> to vector<24x32xbf16>
    %419 = arith.truncf %417 : vector<32x32xf32> to vector<32x32xbf16>
    %cst_161 = arith.constant dense<0.000000e+00> : vector<24x32xf32>
    %420 = tpu.matmul %418, %419, %cst_161 {dimension_numbers = #tpu.dot_dimension_numbers<[1], [0], [0], [1], [0, 0, 1, 1], [], []>} : vector<24x32xbf16>, vector<32x32xbf16>, vector<24x32xf32> -> vector<24x32xf32>
    %c0_162 = arith.constant 0 : index
    %c0_163 = arith.constant 0 : index
    %421 = vector.load %arg40[%c0_162, %c0_163] : memref<1x32xf32, #tpu.memory_space<vmem>>, vector<1x32xf32>
    %422 = vector.broadcast %421 : vector<1x32xf32> to vector<24x32xf32>
    %423 = arith.addf %420, %422 : vector<24x32xf32>
    %c0_164 = arith.constant 0 : index
    %c0_165 = arith.constant 0 : index
    %424 = vector.load %arg41[%c0_164, %c0_165] : memref<32x32xf32, #tpu.memory_space<vmem>>, vector<32x32xf32>
    %425 = arith.truncf %230 : vector<24x32xf32> to vector<24x32xbf16>
    %426 = arith.truncf %424 : vector<32x32xf32> to vector<32x32xbf16>
    %cst_166 = arith.constant dense<0.000000e+00> : vector<24x32xf32>
    %427 = tpu.matmul %425, %426, %cst_166 {dimension_numbers = #tpu.dot_dimension_numbers<[1], [0], [0], [1], [0, 0, 1, 1], [], []>} : vector<24x32xbf16>, vector<32x32xbf16>, vector<24x32xf32> -> vector<24x32xf32>
    %c0_167 = arith.constant 0 : index
    %c0_168 = arith.constant 0 : index
    %428 = vector.load %arg42[%c0_167, %c0_168] : memref<1x32xf32, #tpu.memory_space<vmem>>, vector<1x32xf32>
    %429 = vector.broadcast %428 : vector<1x32xf32> to vector<24x32xf32>
    %430 = arith.addf %427, %429 : vector<24x32xf32>
    %431 = vector.extract_strided_slice %416 {offsets = [0, 0], sizes = [8, 8], strides = [1, 1]} : vector<8x32xf32> to vector<8x8xf32>
    %432 = arith.truncf %431 : vector<8x8xf32> to vector<8x8xbf16>
    %433 = vector.extract_strided_slice %423 {offsets = [0, 0], sizes = [24, 8], strides = [1, 1]} : vector<24x32xf32> to vector<24x8xf32>
    %434 = arith.truncf %433 : vector<24x8xf32> to vector<24x8xbf16>
    %435 = vector.extract_strided_slice %430 {offsets = [0, 0], sizes = [24, 8], strides = [1, 1]} : vector<24x32xf32> to vector<24x8xf32>
    %436 = arith.truncf %435 : vector<24x8xf32> to vector<24x8xbf16>
    %cst_169 = arith.constant dense<0.000000e+00> : vector<8x24xf32>
    %437 = tpu.matmul %432, %434, %cst_169 {dimension_numbers = #tpu.dot_dimension_numbers<[1], [1], [0], [0], [0, 0, 1, 0], [], []>} : vector<8x8xbf16>, vector<24x8xbf16>, vector<8x24xf32> -> vector<8x24xf32>
    %cst_170 = arith.constant 0.353553385 : f32
    %438 = vector.broadcast %cst_170 : f32 to vector<8x24xf32>
    %439 = arith.mulf %437, %438 : vector<8x24xf32>
    %440 = vector.broadcast %2 : vector<1x24xf32> to vector<8x24xf32>
    %441 = arith.addf %439, %440 : vector<8x24xf32>
    %cst_171 = arith.constant dense<0xFF800000> : vector<8xf32>
    %442 = vector.multi_reduction <maximumf>, %441, %cst_171 [1] : vector<8x24xf32> to vector<8xf32>
    %443 = vector.shape_cast %442 : vector<8xf32> to vector<8x1xf32>
    %444 = vector.broadcast %443 : vector<8x1xf32> to vector<8x24xf32>
    %445 = arith.subf %441, %444 : vector<8x24xf32>
    %446 = math.exp %445 : vector<8x24xf32>
    %cst_172 = arith.constant dense<0.000000e+00> : vector<8xf32>
    %447 = vector.multi_reduction <add>, %446, %cst_172 [1] : vector<8x24xf32> to vector<8xf32>
    %448 = vector.shape_cast %447 : vector<8xf32> to vector<8x1xf32>
    %449 = tpu.reciprocal %448 {approx = true} : vector<8x1xf32> -> vector<8x1xf32>
    %450 = vector.broadcast %449 : vector<8x1xf32> to vector<8x24xf32>
    %451 = arith.mulf %446, %450 : vector<8x24xf32>
    %452 = arith.truncf %451 : vector<8x24xf32> to vector<8x24xbf16>
    %cst_173 = arith.constant dense<0.000000e+00> : vector<8x8xf32>
    %453 = tpu.matmul %452, %436, %cst_173 {dimension_numbers = #tpu.dot_dimension_numbers<[1], [0], [0], [1], [0, 0, 1, 1], [], []>} : vector<8x24xbf16>, vector<24x8xbf16>, vector<8x8xf32> -> vector<8x8xf32>
    %454 = vector.extract_strided_slice %416 {offsets = [0, 8], sizes = [8, 8], strides = [1, 1]} : vector<8x32xf32> to vector<8x8xf32>
    %455 = arith.truncf %454 : vector<8x8xf32> to vector<8x8xbf16>
    %456 = vector.extract_strided_slice %423 {offsets = [0, 8], sizes = [24, 8], strides = [1, 1]} : vector<24x32xf32> to vector<24x8xf32>
    %457 = arith.truncf %456 : vector<24x8xf32> to vector<24x8xbf16>
    %458 = vector.extract_strided_slice %430 {offsets = [0, 8], sizes = [24, 8], strides = [1, 1]} : vector<24x32xf32> to vector<24x8xf32>
    %459 = arith.truncf %458 : vector<24x8xf32> to vector<24x8xbf16>
    %cst_174 = arith.constant dense<0.000000e+00> : vector<8x24xf32>
    %460 = tpu.matmul %455, %457, %cst_174 {dimension_numbers = #tpu.dot_dimension_numbers<[1], [1], [0], [0], [0, 0, 1, 0], [], []>} : vector<8x8xbf16>, vector<24x8xbf16>, vector<8x24xf32> -> vector<8x24xf32>
    %cst_175 = arith.constant 0.353553385 : f32
    %461 = vector.broadcast %cst_175 : f32 to vector<8x24xf32>
    %462 = arith.mulf %460, %461 : vector<8x24xf32>
    %463 = vector.broadcast %2 : vector<1x24xf32> to vector<8x24xf32>
    %464 = arith.addf %462, %463 : vector<8x24xf32>
    %cst_176 = arith.constant dense<0xFF800000> : vector<8xf32>
    %465 = vector.multi_reduction <maximumf>, %464, %cst_176 [1] : vector<8x24xf32> to vector<8xf32>
    %466 = vector.shape_cast %465 : vector<8xf32> to vector<8x1xf32>
    %467 = vector.broadcast %466 : vector<8x1xf32> to vector<8x24xf32>
    %468 = arith.subf %464, %467 : vector<8x24xf32>
    %469 = math.exp %468 : vector<8x24xf32>
    %cst_177 = arith.constant dense<0.000000e+00> : vector<8xf32>
    %470 = vector.multi_reduction <add>, %469, %cst_177 [1] : vector<8x24xf32> to vector<8xf32>
    %471 = vector.shape_cast %470 : vector<8xf32> to vector<8x1xf32>
    %472 = tpu.reciprocal %471 {approx = true} : vector<8x1xf32> -> vector<8x1xf32>
    %473 = vector.broadcast %472 : vector<8x1xf32> to vector<8x24xf32>
    %474 = arith.mulf %469, %473 : vector<8x24xf32>
    %475 = arith.truncf %474 : vector<8x24xf32> to vector<8x24xbf16>
    %cst_178 = arith.constant dense<0.000000e+00> : vector<8x8xf32>
    %476 = tpu.matmul %475, %459, %cst_178 {dimension_numbers = #tpu.dot_dimension_numbers<[1], [0], [0], [1], [0, 0, 1, 1], [], []>} : vector<8x24xbf16>, vector<24x8xbf16>, vector<8x8xf32> -> vector<8x8xf32>
    %477 = vector.extract_strided_slice %416 {offsets = [0, 16], sizes = [8, 8], strides = [1, 1]} : vector<8x32xf32> to vector<8x8xf32>
    %478 = arith.truncf %477 : vector<8x8xf32> to vector<8x8xbf16>
    %479 = vector.extract_strided_slice %423 {offsets = [0, 16], sizes = [24, 8], strides = [1, 1]} : vector<24x32xf32> to vector<24x8xf32>
    %480 = arith.truncf %479 : vector<24x8xf32> to vector<24x8xbf16>
    %481 = vector.extract_strided_slice %430 {offsets = [0, 16], sizes = [24, 8], strides = [1, 1]} : vector<24x32xf32> to vector<24x8xf32>
    %482 = arith.truncf %481 : vector<24x8xf32> to vector<24x8xbf16>
    %cst_179 = arith.constant dense<0.000000e+00> : vector<8x24xf32>
    %483 = tpu.matmul %478, %480, %cst_179 {dimension_numbers = #tpu.dot_dimension_numbers<[1], [1], [0], [0], [0, 0, 1, 0], [], []>} : vector<8x8xbf16>, vector<24x8xbf16>, vector<8x24xf32> -> vector<8x24xf32>
    %cst_180 = arith.constant 0.353553385 : f32
    %484 = vector.broadcast %cst_180 : f32 to vector<8x24xf32>
    %485 = arith.mulf %483, %484 : vector<8x24xf32>
    %486 = vector.broadcast %2 : vector<1x24xf32> to vector<8x24xf32>
    %487 = arith.addf %485, %486 : vector<8x24xf32>
    %cst_181 = arith.constant dense<0xFF800000> : vector<8xf32>
    %488 = vector.multi_reduction <maximumf>, %487, %cst_181 [1] : vector<8x24xf32> to vector<8xf32>
    %489 = vector.shape_cast %488 : vector<8xf32> to vector<8x1xf32>
    %490 = vector.broadcast %489 : vector<8x1xf32> to vector<8x24xf32>
    %491 = arith.subf %487, %490 : vector<8x24xf32>
    %492 = math.exp %491 : vector<8x24xf32>
    %cst_182 = arith.constant dense<0.000000e+00> : vector<8xf32>
    %493 = vector.multi_reduction <add>, %492, %cst_182 [1] : vector<8x24xf32> to vector<8xf32>
    %494 = vector.shape_cast %493 : vector<8xf32> to vector<8x1xf32>
    %495 = tpu.reciprocal %494 {approx = true} : vector<8x1xf32> -> vector<8x1xf32>
    %496 = vector.broadcast %495 : vector<8x1xf32> to vector<8x24xf32>
    %497 = arith.mulf %492, %496 : vector<8x24xf32>
    %498 = arith.truncf %497 : vector<8x24xf32> to vector<8x24xbf16>
    %cst_183 = arith.constant dense<0.000000e+00> : vector<8x8xf32>
    %499 = tpu.matmul %498, %482, %cst_183 {dimension_numbers = #tpu.dot_dimension_numbers<[1], [0], [0], [1], [0, 0, 1, 1], [], []>} : vector<8x24xbf16>, vector<24x8xbf16>, vector<8x8xf32> -> vector<8x8xf32>
    %500 = vector.extract_strided_slice %416 {offsets = [0, 24], sizes = [8, 8], strides = [1, 1]} : vector<8x32xf32> to vector<8x8xf32>
    %501 = arith.truncf %500 : vector<8x8xf32> to vector<8x8xbf16>
    %502 = vector.extract_strided_slice %423 {offsets = [0, 24], sizes = [24, 8], strides = [1, 1]} : vector<24x32xf32> to vector<24x8xf32>
    %503 = arith.truncf %502 : vector<24x8xf32> to vector<24x8xbf16>
    %504 = vector.extract_strided_slice %430 {offsets = [0, 24], sizes = [24, 8], strides = [1, 1]} : vector<24x32xf32> to vector<24x8xf32>
    %505 = arith.truncf %504 : vector<24x8xf32> to vector<24x8xbf16>
    %cst_184 = arith.constant dense<0.000000e+00> : vector<8x24xf32>
    %506 = tpu.matmul %501, %503, %cst_184 {dimension_numbers = #tpu.dot_dimension_numbers<[1], [1], [0], [0], [0, 0, 1, 0], [], []>} : vector<8x8xbf16>, vector<24x8xbf16>, vector<8x24xf32> -> vector<8x24xf32>
    %cst_185 = arith.constant 0.353553385 : f32
    %507 = vector.broadcast %cst_185 : f32 to vector<8x24xf32>
    %508 = arith.mulf %506, %507 : vector<8x24xf32>
    %509 = vector.broadcast %2 : vector<1x24xf32> to vector<8x24xf32>
    %510 = arith.addf %508, %509 : vector<8x24xf32>
    %cst_186 = arith.constant dense<0xFF800000> : vector<8xf32>
    %511 = vector.multi_reduction <maximumf>, %510, %cst_186 [1] : vector<8x24xf32> to vector<8xf32>
    %512 = vector.shape_cast %511 : vector<8xf32> to vector<8x1xf32>
    %513 = vector.broadcast %512 : vector<8x1xf32> to vector<8x24xf32>
    %514 = arith.subf %510, %513 : vector<8x24xf32>
    %515 = math.exp %514 : vector<8x24xf32>
    %cst_187 = arith.constant dense<0.000000e+00> : vector<8xf32>
    %516 = vector.multi_reduction <add>, %515, %cst_187 [1] : vector<8x24xf32> to vector<8xf32>
    %517 = vector.shape_cast %516 : vector<8xf32> to vector<8x1xf32>
    %518 = tpu.reciprocal %517 {approx = true} : vector<8x1xf32> -> vector<8x1xf32>
    %519 = vector.broadcast %518 : vector<8x1xf32> to vector<8x24xf32>
    %520 = arith.mulf %515, %519 : vector<8x24xf32>
    %521 = arith.truncf %520 : vector<8x24xf32> to vector<8x24xbf16>
    %cst_188 = arith.constant dense<0.000000e+00> : vector<8x8xf32>
    %522 = tpu.matmul %521, %505, %cst_188 {dimension_numbers = #tpu.dot_dimension_numbers<[1], [0], [0], [1], [0, 0, 1, 1], [], []>} : vector<8x24xbf16>, vector<24x8xbf16>, vector<8x8xf32> -> vector<8x8xf32>
    %523 = tpu.concatenate %453, %476, %499, %522 in 1 : vector<8x8xf32>, vector<8x8xf32>, vector<8x8xf32>, vector<8x8xf32> -> vector<8x32xf32>
    %c0_189 = arith.constant 0 : index
    %c0_190 = arith.constant 0 : index
    %524 = vector.load %arg43[%c0_189, %c0_190] : memref<32x32xf32, #tpu.memory_space<vmem>>, vector<32x32xf32>
    %525 = arith.truncf %523 : vector<8x32xf32> to vector<8x32xbf16>
    %526 = arith.truncf %524 : vector<32x32xf32> to vector<32x32xbf16>
    %cst_191 = arith.constant dense<0.000000e+00> : vector<8x32xf32>
    %527 = tpu.matmul %525, %526, %cst_191 {dimension_numbers = #tpu.dot_dimension_numbers<[1], [0], [0], [1], [0, 0, 1, 1], [], []>} : vector<8x32xbf16>, vector<32x32xbf16>, vector<8x32xf32> -> vector<8x32xf32>
    %c0_192 = arith.constant 0 : index
    %c0_193 = arith.constant 0 : index
    %528 = vector.load %arg44[%c0_192, %c0_193] : memref<1x32xf32, #tpu.memory_space<vmem>>, vector<1x32xf32>
    %529 = vector.broadcast %528 : vector<1x32xf32> to vector<8x32xf32>
    %530 = arith.addf %527, %529 : vector<8x32xf32>
    %531 = arith.addf %385, %530 : vector<8x32xf32>
    %c0_194 = arith.constant 0 : index
    %c0_195 = arith.constant 0 : index
    %532 = vector.load %arg45[%c0_194, %c0_195] : memref<1x32xf32, #tpu.memory_space<vmem>>, vector<1x32xf32>
    %c0_196 = arith.constant 0 : index
    %c0_197 = arith.constant 0 : index
    %533 = vector.load %arg46[%c0_196, %c0_197] : memref<1x32xf32, #tpu.memory_space<vmem>>, vector<1x32xf32>
    %cst_198 = arith.constant dense<0.000000e+00> : vector<8xf32>
    %534 = vector.multi_reduction <add>, %531, %cst_198 [1] : vector<8x32xf32> to vector<8xf32>
    %535 = vector.shape_cast %534 : vector<8xf32> to vector<8x1xf32>
    %cst_199 = arith.constant 3.200000e+01 : f32
    %536 = vector.broadcast %cst_199 : f32 to vector<8x1xf32>
    %537 = arith.divf %535, %536 : vector<8x1xf32>
    %538 = arith.mulf %531, %531 : vector<8x32xf32>
    %cst_200 = arith.constant dense<0.000000e+00> : vector<8xf32>
    %539 = vector.multi_reduction <add>, %538, %cst_200 [1] : vector<8x32xf32> to vector<8xf32>
    %540 = vector.shape_cast %539 : vector<8xf32> to vector<8x1xf32>
    %cst_201 = arith.constant 3.200000e+01 : f32
    %541 = vector.broadcast %cst_201 : f32 to vector<8x1xf32>
    %542 = arith.divf %540, %541 : vector<8x1xf32>
    %543 = arith.mulf %537, %537 : vector<8x1xf32>
    %544 = arith.subf %542, %543 : vector<8x1xf32>
    %545 = vector.broadcast %537 : vector<8x1xf32> to vector<8x32xf32>
    %546 = arith.subf %531, %545 : vector<8x32xf32>
    %cst_202 = arith.constant 9.99999974E-6 : f32
    %547 = vector.broadcast %cst_202 : f32 to vector<8x1xf32>
    %548 = arith.addf %544, %547 : vector<8x1xf32>
    %549 = math.rsqrt %548 : vector<8x1xf32>
    %550 = vector.broadcast %549 : vector<8x1xf32> to vector<8x32xf32>
    %551 = arith.mulf %546, %550 : vector<8x32xf32>
    %552 = vector.broadcast %532 : vector<1x32xf32> to vector<8x32xf32>
    %553 = arith.mulf %551, %552 : vector<8x32xf32>
    %554 = vector.broadcast %533 : vector<1x32xf32> to vector<8x32xf32>
    %555 = arith.addf %553, %554 : vector<8x32xf32>
    %c0_203 = arith.constant 0 : index
    %c0_204 = arith.constant 0 : index
    %556 = vector.load %arg47[%c0_203, %c0_204] : memref<32x64xf32, #tpu.memory_space<vmem>>, vector<32x64xf32>
    %557 = arith.truncf %555 : vector<8x32xf32> to vector<8x32xbf16>
    %558 = arith.truncf %556 : vector<32x64xf32> to vector<32x64xbf16>
    %cst_205 = arith.constant dense<0.000000e+00> : vector<8x64xf32>
    %559 = tpu.matmul %557, %558, %cst_205 {dimension_numbers = #tpu.dot_dimension_numbers<[1], [0], [0], [1], [0, 0, 1, 1], [], []>} : vector<8x32xbf16>, vector<32x64xbf16>, vector<8x64xf32> -> vector<8x64xf32>
    %c0_206 = arith.constant 0 : index
    %c0_207 = arith.constant 0 : index
    %560 = vector.load %arg48[%c0_206, %c0_207] : memref<1x64xf32, #tpu.memory_space<vmem>>, vector<1x64xf32>
    %561 = vector.broadcast %560 : vector<1x64xf32> to vector<8x64xf32>
    %562 = arith.addf %559, %561 : vector<8x64xf32>
    %cst_208 = arith.constant 5.000000e-01 : f32
    %563 = vector.broadcast %cst_208 : f32 to vector<8x64xf32>
    %564 = arith.mulf %563, %562 : vector<8x64xf32>
    %cst_209 = arith.constant 4.471500e-02 : f32
    %565 = vector.broadcast %cst_209 : f32 to vector<8x64xf32>
    %566 = arith.mulf %565, %562 : vector<8x64xf32>
    %567 = arith.mulf %566, %562 : vector<8x64xf32>
    %568 = arith.mulf %567, %562 : vector<8x64xf32>
    %569 = arith.addf %562, %568 : vector<8x64xf32>
    %cst_210 = arith.constant 0.797884583 : f32
    %570 = vector.broadcast %cst_210 : f32 to vector<8x64xf32>
    %571 = arith.mulf %570, %569 : vector<8x64xf32>
    %572 = math.tanh %571 : vector<8x64xf32>
    %cst_211 = arith.constant 1.000000e+00 : f32
    %573 = vector.broadcast %cst_211 : f32 to vector<8x64xf32>
    %574 = arith.addf %573, %572 : vector<8x64xf32>
    %575 = arith.mulf %564, %574 : vector<8x64xf32>
    %c0_212 = arith.constant 0 : index
    %c0_213 = arith.constant 0 : index
    %576 = vector.load %arg49[%c0_212, %c0_213] : memref<64x32xf32, #tpu.memory_space<vmem>>, vector<64x32xf32>
    %577 = arith.truncf %575 : vector<8x64xf32> to vector<8x64xbf16>
    %578 = arith.truncf %576 : vector<64x32xf32> to vector<64x32xbf16>
    %cst_214 = arith.constant dense<0.000000e+00> : vector<8x32xf32>
    %579 = tpu.matmul %577, %578, %cst_214 {dimension_numbers = #tpu.dot_dimension_numbers<[1], [0], [0], [1], [0, 0, 1, 1], [], []>} : vector<8x64xbf16>, vector<64x32xbf16>, vector<8x32xf32> -> vector<8x32xf32>
    %580 = arith.addf %531, %579 : vector<8x32xf32>
    %c0_215 = arith.constant 0 : index
    %c0_216 = arith.constant 0 : index
    %581 = vector.load %arg50[%c0_215, %c0_216] : memref<1x32xf32, #tpu.memory_space<vmem>>, vector<1x32xf32>
    %582 = vector.broadcast %581 : vector<1x32xf32> to vector<8x32xf32>
    %583 = arith.addf %580, %582 : vector<8x32xf32>
    %c0_217 = arith.constant 0 : index
    %c0_218 = arith.constant 0 : index
    %584 = vector.load %arg51[%c0_217, %c0_218] : memref<1x32xf32, #tpu.memory_space<vmem>>, vector<1x32xf32>
    %c0_219 = arith.constant 0 : index
    %c0_220 = arith.constant 0 : index
    %585 = vector.load %arg52[%c0_219, %c0_220] : memref<1x32xf32, #tpu.memory_space<vmem>>, vector<1x32xf32>
    %cst_221 = arith.constant dense<0.000000e+00> : vector<8xf32>
    %586 = vector.multi_reduction <add>, %583, %cst_221 [1] : vector<8x32xf32> to vector<8xf32>
    %587 = vector.shape_cast %586 : vector<8xf32> to vector<8x1xf32>
    %cst_222 = arith.constant 3.200000e+01 : f32
    %588 = vector.broadcast %cst_222 : f32 to vector<8x1xf32>
    %589 = arith.divf %587, %588 : vector<8x1xf32>
    %590 = arith.mulf %583, %583 : vector<8x32xf32>
    %cst_223 = arith.constant dense<0.000000e+00> : vector<8xf32>
    %591 = vector.multi_reduction <add>, %590, %cst_223 [1] : vector<8x32xf32> to vector<8xf32>
    %592 = vector.shape_cast %591 : vector<8xf32> to vector<8x1xf32>
    %cst_224 = arith.constant 3.200000e+01 : f32
    %593 = vector.broadcast %cst_224 : f32 to vector<8x1xf32>
    %594 = arith.divf %592, %593 : vector<8x1xf32>
    %595 = arith.mulf %589, %589 : vector<8x1xf32>
    %596 = arith.subf %594, %595 : vector<8x1xf32>
    %597 = vector.broadcast %589 : vector<8x1xf32> to vector<8x32xf32>
    %598 = arith.subf %583, %597 : vector<8x32xf32>
    %cst_225 = arith.constant 9.99999974E-6 : f32
    %599 = vector.broadcast %cst_225 : f32 to vector<8x1xf32>
    %600 = arith.addf %596, %599 : vector<8x1xf32>
    %601 = math.rsqrt %600 : vector<8x1xf32>
    %602 = vector.broadcast %601 : vector<8x1xf32> to vector<8x32xf32>
    %603 = arith.mulf %598, %602 : vector<8x32xf32>
    %604 = vector.broadcast %584 : vector<1x32xf32> to vector<8x32xf32>
    %605 = arith.mulf %603, %604 : vector<8x32xf32>
    %606 = vector.broadcast %585 : vector<1x32xf32> to vector<8x32xf32>
    %607 = arith.addf %605, %606 : vector<8x32xf32>
    %c0_226 = arith.constant 0 : index
    %c0_227 = arith.constant 0 : index
    %608 = vector.load %arg53[%c0_226, %c0_227] : memref<32x128xf32, #tpu.memory_space<vmem>>, vector<32x128xf32>
    %609 = arith.truncf %607 : vector<8x32xf32> to vector<8x32xbf16>
    %610 = arith.truncf %608 : vector<32x128xf32> to vector<32x128xbf16>
    %cst_228 = arith.constant dense<0.000000e+00> : vector<8x128xf32>
    %611 = tpu.matmul %609, %610, %cst_228 {dimension_numbers = #tpu.dot_dimension_numbers<[1], [0], [0], [1], [0, 0, 1, 1], [], []>} : vector<8x32xbf16>, vector<32x128xbf16>, vector<8x128xf32> -> vector<8x128xf32>
    %c0_229 = arith.constant 0 : index
    %c0_230 = arith.constant 0 : index
    %612 = vector.load %arg54[%c0_229, %c0_230] : memref<1x128xf32, #tpu.memory_space<vmem>>, vector<1x128xf32>
    %613 = vector.broadcast %612 : vector<1x128xf32> to vector<8x128xf32>
    %614 = arith.addf %611, %613 : vector<8x128xf32>
    %c0_231 = arith.constant 0 : index
    %c0_232 = arith.constant 0 : index
    %c0_233 = arith.constant 0 : index
    %615 = vector.load %arg55[%c0_231, %c0_232, %c0_233] : memref<1x8x128xf32, #tpu.memory_space<vmem>>, vector<1x8x128xf32>
    %616 = vector.shape_cast %615 : vector<1x8x128xf32> to vector<8x128xf32>
    %617 = vector.shape_cast %614 : vector<8x128xf32> to vector<1x8x128xf32>
    tpu.vector_store %arg55[%c0_231, %c0_232, %c0_233], %617 {strides = array<i32>} : memref<1x8x128xf32, #tpu.memory_space<vmem>>, vector<1x8x128xf32>,
    return
  }
  func.func @transform_0(%arg0: i32) -> (i32, i32, i32) {
    %c0_i32 = arith.constant 0 : i32
    %c0_i32_0 = arith.constant 0 : i32
    %c0_i32_1 = arith.constant 0 : i32
    return %arg0, %c0_i32, %c0_i32_0 : i32, i32, i32
  }
  func.func @transform_1(%arg0: i32) -> (i32, i32, i32) {
    %c0_i32 = arith.constant 0 : i32
    %c0_i32_0 = arith.constant 0 : i32
    %c0_i32_1 = arith.constant 0 : i32
    return %arg0, %c0_i32, %c0_i32_0 : i32, i32, i32
  }
  func.func @transform_2(%arg0: i32) -> (i32, i32, i32) {
    %c0_i32 = arith.constant 0 : i32
    %c0_i32_0 = arith.constant 0 : i32
    %c0_i32_1 = arith.constant 0 : i32
    return %arg0, %c0_i32, %c0_i32_0 : i32, i32, i32
  }
  func.func @transform_3(%arg0: i32) -> (i32, i32) {
    %c0_i32 = arith.constant 0 : i32
    %c0_i32_0 = arith.constant 0 : i32
    %c0_i32_1 = arith.constant 0 : i32
    return %c0_i32, %c0_i32_0 : i32, i32
  }
  func.func @transform_4(%arg0: i32) -> (i32, i32) {
    %c0_i32 = arith.constant 0 : i32
    %c0_i32_0 = arith.constant 0 : i32
    %c0_i32_1 = arith.constant 0 : i32
    return %c0_i32, %c0_i32_0 : i32, i32
  }
  func.func @transform_5(%arg0: i32) -> (i32, i32) {
    %c0_i32 = arith.constant 0 : i32
    %c0_i32_0 = arith.constant 0 : i32
    %c0_i32_1 = arith.constant 0 : i32
    return %c0_i32, %c0_i32_0 : i32, i32
  }
  func.func @transform_6(%arg0: i32) -> (i32, i32) {
    %c0_i32 = arith.constant 0 : i32
    %c0_i32_0 = arith.constant 0 : i32
    %c0_i32_1 = arith.constant 0 : i32
    return %c0_i32, %c0_i32_0 : i32, i32
  }
  func.func @transform_7(%arg0: i32) -> (i32, i32) {
    %c0_i32 = arith.constant 0 : i32
    %c0_i32_0 = arith.constant 0 : i32
    %c0_i32_1 = arith.constant 0 : i32
    return %c0_i32, %c0_i32_0 : i32, i32
  }
  func.func @transform_8(%arg0: i32) -> (i32, i32) {
    %c0_i32 = arith.constant 0 : i32
    %c0_i32_0 = arith.constant 0 : i32
    %c0_i32_1 = arith.constant 0 : i32
    return %c0_i32, %c0_i32_0 : i32, i32
  }
  func.func @transform_9(%arg0: i32) -> (i32, i32) {
    %c0_i32 = arith.constant 0 : i32
    %c0_i32_0 = arith.constant 0 : i32
    %c0_i32_1 = arith.constant 0 : i32
    return %c0_i32, %c0_i32_0 : i32, i32
  }
  func.func @transform_10(%arg0: i32) -> (i32, i32) {
    %c0_i32 = arith.constant 0 : i32
    %c0_i32_0 = arith.constant 0 : i32
    %c0_i32_1 = arith.constant 0 : i32
    return %c0_i32, %c0_i32_0 : i32, i32
  }
  func.func @transform_11(%arg0: i32) -> (i32, i32) {
    %c0_i32 = arith.constant 0 : i32
    %c0_i32_0 = arith.constant 0 : i32
    %c0_i32_1 = arith.constant 0 : i32
    return %c0_i32, %c0_i32_0 : i32, i32
  }
  func.func @transform_12(%arg0: i32) -> (i32, i32) {
    %c0_i32 = arith.constant 0 : i32
    %c0_i32_0 = arith.constant 0 : i32
    %c0_i32_1 = arith.constant 0 : i32
    return %c0_i32, %c0_i32_0 : i32, i32
  }
  func.func @transform_13(%arg0: i32) -> (i32, i32) {
    %c0_i32 = arith.constant 0 : i32
    %c0_i32_0 = arith.constant 0 : i32
    %c0_i32_1 = arith.constant 0 : i32
    return %c0_i32, %c0_i32_0 : i32, i32
  }
  func.func @transform_14(%arg0: i32) -> (i32, i32) {
    %c0_i32 = arith.constant 0 : i32
    %c0_i32_0 = arith.constant 0 : i32
    %c0_i32_1 = arith.constant 0 : i32
    return %c0_i32, %c0_i32_0 : i32, i32
  }
  func.func @transform_15(%arg0: i32) -> (i32, i32) {
    %c0_i32 = arith.constant 0 : i32
    %c0_i32_0 = arith.constant 0 : i32
    %c0_i32_1 = arith.constant 0 : i32
    return %c0_i32, %c0_i32_0 : i32, i32
  }
  func.func @transform_16(%arg0: i32) -> (i32, i32) {
    %c0_i32 = arith.constant 0 : i32
    %c0_i32_0 = arith.constant 0 : i32
    %c0_i32_1 = arith.constant 0 : i32
    return %c0_i32, %c0_i32_0 : i32, i32
  }
  func.func @transform_17(%arg0: i32) -> (i32, i32) {
    %c0_i32 = arith.constant 0 : i32
    %c0_i32_0 = arith.constant 0 : i32
    %c0_i32_1 = arith.constant 0 : i32
    return %c0_i32, %c0_i32_0 : i32, i32
  }
  func.func @transform_18(%arg0: i32) -> (i32, i32) {
    %c0_i32 = arith.constant 0 : i32
    %c0_i32_0 = arith.constant 0 : i32
    %c0_i32_1 = arith.constant 0 : i32
    return %c0_i32, %c0_i32_0 : i32, i32
  }
  func.func @transform_19(%arg0: i32) -> (i32, i32) {
    %c0_i32 = arith.constant 0 : i32
    %c0_i32_0 = arith.constant 0 : i32
    %c0_i32_1 = arith.constant 0 : i32
    return %c0_i32, %c0_i32_0 : i32, i32
  }
  func.func @transform_20(%arg0: i32) -> (i32, i32) {
    %c0_i32 = arith.constant 0 : i32
    %c0_i32_0 = arith.constant 0 : i32
    %c0_i32_1 = arith.constant 0 : i32
    return %c0_i32, %c0_i32_0 : i32, i32
  }
  func.func @transform_21(%arg0: i32) -> (i32, i32) {
    %c0_i32 = arith.constant 0 : i32
    %c0_i32_0 = arith.constant 0 : i32
    %c0_i32_1 = arith.constant 0 : i32
    return %c0_i32, %c0_i32_0 : i32, i32
  }
  func.func @transform_22(%arg0: i32) -> (i32, i32) {
    %c0_i32 = arith.constant 0 : i32
    %c0_i32_0 = arith.constant 0 : i32
    %c0_i32_1 = arith.constant 0 : i32
    return %c0_i32, %c0_i32_0 : i32, i32
  }
  func.func @transform_23(%arg0: i32) -> (i32, i32) {
    %c0_i32 = arith.constant 0 : i32
    %c0_i32_0 = arith.constant 0 : i32
    %c0_i32_1 = arith.constant 0 : i32
    return %c0_i32, %c0_i32_0 : i32, i32
  }
  func.func @transform_24(%arg0: i32) -> (i32, i32) {
    %c0_i32 = arith.constant 0 : i32
    %c0_i32_0 = arith.constant 0 : i32
    %c0_i32_1 = arith.constant 0 : i32
    return %c0_i32, %c0_i32_0 : i32, i32
  }
  func.func @transform_25(%arg0: i32) -> (i32, i32) {
    %c0_i32 = arith.constant 0 : i32
    %c0_i32_0 = arith.constant 0 : i32
    %c0_i32_1 = arith.constant 0 : i32
    return %c0_i32, %c0_i32_0 : i32, i32
  }
  func.func @transform_26(%arg0: i32) -> (i32, i32) {
    %c0_i32 = arith.constant 0 : i32
    %c0_i32_0 = arith.constant 0 : i32
    %c0_i32_1 = arith.constant 0 : i32
    return %c0_i32, %c0_i32_0 : i32, i32
  }
  func.func @transform_27(%arg0: i32) -> (i32, i32) {
    %c0_i32 = arith.constant 0 : i32
    %c0_i32_0 = arith.constant 0 : i32
    %c0_i32_1 = arith.constant 0 : i32
    return %c0_i32, %c0_i32_0 : i32, i32
  }
  func.func @transform_28(%arg0: i32) -> (i32, i32) {
    %c0_i32 = arith.constant 0 : i32
    %c0_i32_0 = arith.constant 0 : i32
    %c0_i32_1 = arith.constant 0 : i32
    return %c0_i32, %c0_i32_0 : i32, i32
  }
  func.func @transform_29(%arg0: i32) -> (i32, i32) {
    %c0_i32 = arith.constant 0 : i32
    %c0_i32_0 = arith.constant 0 : i32
    %c0_i32_1 = arith.constant 0 : i32
    return %c0_i32, %c0_i32_0 : i32, i32
  }
  func.func @transform_30(%arg0: i32) -> (i32, i32) {
    %c0_i32 = arith.constant 0 : i32
    %c0_i32_0 = arith.constant 0 : i32
    %c0_i32_1 = arith.constant 0 : i32
    return %c0_i32, %c0_i32_0 : i32, i32
  }
  func.func @transform_31(%arg0: i32) -> (i32, i32) {
    %c0_i32 = arith.constant 0 : i32
    %c0_i32_0 = arith.constant 0 : i32
    %c0_i32_1 = arith.constant 0 : i32
    return %c0_i32, %c0_i32_0 : i32, i32
  }
  func.func @transform_32(%arg0: i32) -> (i32, i32) {
    %c0_i32 = arith.constant 0 : i32
    %c0_i32_0 = arith.constant 0 : i32
    %c0_i32_1 = arith.constant 0 : i32
    return %c0_i32, %c0_i32_0 : i32, i32
  }
  func.func @transform_33(%arg0: i32) -> (i32, i32) {
    %c0_i32 = arith.constant 0 : i32
    %c0_i32_0 = arith.constant 0 : i32
    %c0_i32_1 = arith.constant 0 : i32
    return %c0_i32, %c0_i32_0 : i32, i32
  }
  func.func @transform_34(%arg0: i32) -> (i32, i32) {
    %c0_i32 = arith.constant 0 : i32
    %c0_i32_0 = arith.constant 0 : i32
    %c0_i32_1 = arith.constant 0 : i32
    return %c0_i32, %c0_i32_0 : i32, i32
  }
  func.func @transform_35(%arg0: i32) -> (i32, i32) {
    %c0_i32 = arith.constant 0 : i32
    %c0_i32_0 = arith.constant 0 : i32
    %c0_i32_1 = arith.constant 0 : i32
    return %c0_i32, %c0_i32_0 : i32, i32
  }
  func.func @transform_36(%arg0: i32) -> (i32, i32) {
    %c0_i32 = arith.constant 0 : i32
    %c0_i32_0 = arith.constant 0 : i32
    %c0_i32_1 = arith.constant 0 : i32
    return %c0_i32, %c0_i32_0 : i32, i32
  }
  func.func @transform_37(%arg0: i32) -> (i32, i32) {
    %c0_i32 = arith.constant 0 : i32
    %c0_i32_0 = arith.constant 0 : i32
    %c0_i32_1 = arith.constant 0 : i32
    return %c0_i32, %c0_i32_0 : i32, i32
  }
  func.func @transform_38(%arg0: i32) -> (i32, i32) {
    %c0_i32 = arith.constant 0 : i32
    %c0_i32_0 = arith.constant 0 : i32
    %c0_i32_1 = arith.constant 0 : i32
    return %c0_i32, %c0_i32_0 : i32, i32
  }
  func.func @transform_39(%arg0: i32) -> (i32, i32) {
    %c0_i32 = arith.constant 0 : i32
    %c0_i32_0 = arith.constant 0 : i32
    %c0_i32_1 = arith.constant 0 : i32
    return %c0_i32, %c0_i32_0 : i32, i32
  }
  func.func @transform_40(%arg0: i32) -> (i32, i32) {
    %c0_i32 = arith.constant 0 : i32
    %c0_i32_0 = arith.constant 0 : i32
    %c0_i32_1 = arith.constant 0 : i32
    return %c0_i32, %c0_i32_0 : i32, i32
  }
  func.func @transform_41(%arg0: i32) -> (i32, i32) {
    %c0_i32 = arith.constant 0 : i32
    %c0_i32_0 = arith.constant 0 : i32
    %c0_i32_1 = arith.constant 0 : i32
    return %c0_i32, %c0_i32_0 : i32, i32
  }
  func.func @transform_42(%arg0: i32) -> (i32, i32) {
    %c0_i32 = arith.constant 0 : i32
    %c0_i32_0 = arith.constant 0 : i32
    %c0_i32_1 = arith.constant 0 : i32
    return %c0_i32, %c0_i32_0 : i32, i32
  }
  func.func @transform_43(%arg0: i32) -> (i32, i32) {
    %c0_i32 = arith.constant 0 : i32
    %c0_i32_0 = arith.constant 0 : i32
    %c0_i32_1 = arith.constant 0 : i32
    return %c0_i32, %c0_i32_0 : i32, i32
  }
  func.func @transform_44(%arg0: i32) -> (i32, i32) {
    %c0_i32 = arith.constant 0 : i32
    %c0_i32_0 = arith.constant 0 : i32
    %c0_i32_1 = arith.constant 0 : i32
    return %c0_i32, %c0_i32_0 : i32, i32
  }
  func.func @transform_45(%arg0: i32) -> (i32, i32) {
    %c0_i32 = arith.constant 0 : i32
    %c0_i32_0 = arith.constant 0 : i32
    %c0_i32_1 = arith.constant 0 : i32
    return %c0_i32, %c0_i32_0 : i32, i32
  }
  func.func @transform_46(%arg0: i32) -> (i32, i32) {
    %c0_i32 = arith.constant 0 : i32
    %c0_i32_0 = arith.constant 0 : i32
    %c0_i32_1 = arith.constant 0 : i32
    return %c0_i32, %c0_i32_0 : i32, i32
  }
  func.func @transform_47(%arg0: i32) -> (i32, i32) {
    %c0_i32 = arith.constant 0 : i32
    %c0_i32_0 = arith.constant 0 : i32
    %c0_i32_1 = arith.constant 0 : i32
    return %c0_i32, %c0_i32_0 : i32, i32
  }
  func.func @transform_48(%arg0: i32) -> (i32, i32) {
    %c0_i32 = arith.constant 0 : i32
    %c0_i32_0 = arith.constant 0 : i32
    %c0_i32_1 = arith.constant 0 : i32
    return %c0_i32, %c0_i32_0 : i32, i32
  }
  func.func @transform_49(%arg0: i32) -> (i32, i32) {
    %c0_i32 = arith.constant 0 : i32
    %c0_i32_0 = arith.constant 0 : i32
    %c0_i32_1 = arith.constant 0 : i32
    return %c0_i32, %c0_i32_0 : i32, i32
  }
  func.func @transform_50(%arg0: i32) -> (i32, i32) {
    %c0_i32 = arith.constant 0 : i32
    %c0_i32_0 = arith.constant 0 : i32
    %c0_i32_1 = arith.constant 0 : i32
    return %c0_i32, %c0_i32_0 : i32, i32
  }
  func.func @transform_51(%arg0: i32) -> (i32, i32) {
    %c0_i32 = arith.constant 0 : i32
    %c0_i32_0 = arith.constant 0 : i32
    %c0_i32_1 = arith.constant 0 : i32
    return %c0_i32, %c0_i32_0 : i32, i32
  }
  func.func @transform_52(%arg0: i32) -> (i32, i32) {
    %c0_i32 = arith.constant 0 : i32
    %c0_i32_0 = arith.constant 0 : i32
    %c0_i32_1 = arith.constant 0 : i32
    return %c0_i32, %c0_i32_0 : i32, i32
  }
  func.func @transform_53(%arg0: i32) -> (i32, i32) {
    %c0_i32 = arith.constant 0 : i32
    %c0_i32_0 = arith.constant 0 : i32
    %c0_i32_1 = arith.constant 0 : i32
    return %c0_i32, %c0_i32_0 : i32, i32
  }
  func.func @transform_54(%arg0: i32) -> (i32, i32, i32) {
    %c0_i32 = arith.constant 0 : i32
    %c0_i32_0 = arith.constant 0 : i32
    %c0_i32_1 = arith.constant 0 : i32
    return %arg0, %c0_i32, %c0_i32_0 : i32, i32, i32
  }
}

</mosaic_0001>

<bundles_post_ra>
// kernel: vision_encoder_decoder_forward.1
= control target key start
LH: loop header
LB: loop body
LE: loop exit
PB: predicated region body
PF: predicated region fallthrough
CT: control target
= control target key end

     0   :  { %s4918_s6 = smov 1   ;;  %s4919_s10 = smov 2   ;;  %s6097_s0 = inlined_call_operand.smem [shape: u32[55], index: -1, kind: input, shape index: {}] }
   0x1   :  { %s4998_s5 = sld [smem:[%s6097_s0]]   ;;  %s4920_s14 = smov 3  }
   0x2   :  { %s5003_s9 = sld [smem:[%s6097_s0 + %s4918_s6]]   ;;  %s4921_s18 = smov 4  }
   0x3   :  { %s5008_s13 = sld [smem:[%s6097_s0 + %s4919_s10]]   ;;  %s4922_s22 = smov 5  }
   0x4   :  { %s5013_s17 = sld [smem:[%s6097_s0 + %s4920_s14]]   ;;  %s4923_s26 = smov 6  }
   0x5   :  { %s5018_s21 = sld [smem:[%s6097_s0 + %s4921_s18]]   ;;  %s4924_s30 = smov 7  }
   0x6   :  { %s5023_s25 = sld [smem:[%s6097_s0 + %s4922_s22]]   ;;  %s4925_s4 = smov 8  }
   0x7   :  { %6149 = sst [smem:[#allocation27_spill]] %s4998_s5  ;;  %s4926_s10 = smov 9  }
   0x8   :  { %6150 = sst [smem:[#allocation28_spill]] %s5003_s9  ;;  %s4927_s15 = smov 10  }
   0x9   :  { %6151 = sst [smem:[#allocation29_spill]] %s5008_s13  ;;  %s4928_s20 = smov 11  }
   0xa   :  { %s5028_s29 = sld [smem:[%s6097_s0 + %s4923_s26]]   ;;  %s4929_s26 = smov 12  }
   0xb   :  { %6152 = sst [smem:[#allocation30_spill]] %s5018_s21  ;;  %s4930_s1 = smov 13  }
   0xc   :  { %s5033_s3 = sld [smem:[%s6097_s0 + %s4924_s30]]   ;;  %s4931_s7 = smov 14  }
   0xd   :  { %s5038_s8 = sld [smem:[%s6097_s0 + %s4925_s4]]   ;;  %s4933_s22 = smov 16  }
   0xe   :  { %s5043_s14 = sld [smem:[%s6097_s0 + %s4926_s10]]   ;;  %s4934_s28 = smov 17  }
   0xf   :  { %s5048_s19 = sld [smem:[%s6097_s0 + %s4927_s15]]   ;;  %s4932_s15 = smov 15  }
  0x10   :  { %6153 = sst [smem:[#allocation31_spill]] %s5028_s29 }
  0x11   :  { %s5053_s24 = sld [smem:[%s6097_s0 + %s4928_s20]]  }
  0x12   :  { %6154 = sst [smem:[#allocation32_spill]] %s5033_s3 }
  0x13   :  { %s5058_s30 = sld [smem:[%s6097_s0 + %s4929_s26]]  }
  0x14   :  { %6155 = sst [smem:[#allocation33_spill]] %s5043_s14 }
  0x15   :  { %s5063_s6 = sld [smem:[%s6097_s0 + %s4930_s1]]  }
  0x16   :  { %s5068_s12 = sld [smem:[%s6097_s0 + %s4931_s7]]   ;;  %s4935_s7 = smov 18  }
  0x17   :  { %6156 = sst [smem:[#allocation34_spill]] %s5053_s24 }
  0x18   :  { %s5073_s20 = sld [smem:[%s6097_s0 + %s4932_s15]]   ;;  %s4936_s15 = smov 19  }
  0x19   :  { %s5078_s27 = sld [smem:[%s6097_s0 + %s4933_s22]]   ;;  %s4937_s22 = smov 20  }
  0x1a   :  { %s5083_s4 = sld [smem:[%s6097_s0 + %s4934_s28]]   ;;  %s4938_s28 = smov 21  }
  0x1b   :  { %6157 = sst [smem:[#allocation35_spill]] %s5063_s6 }
  0x1c   :  { %6158 = sst [smem:[#allocation36_spill]] %s5068_s12 }
  0x1d   :  { %s5088_s13 = sld [smem:[%s6097_s0 + %s4935_s7]]   ;;  %s4939_s7 = smov 22  }
  0x1e   :  { %6159 = sst [smem:[#allocation37_spill]] %s5073_s20 }
  0x1f   :  { %6160 = sst [smem:[#allocation38_spill]] %s5078_s27 }
  0x20   :  { %6161 = sst [smem:[#allocation39_spill]] %s5083_s4 }
  0x21   :  { %s5093_s20 = sld [smem:[%s6097_s0 + %s4936_s15]]   ;;  %s4940_s15 = smov 23  }
  0x22   :  { %s5098_s27 = sld [smem:[%s6097_s0 + %s4937_s22]]   ;;  %s4941_s22 = smov 24  }
  0x23   :  { %6162 = sst [smem:[#allocation40_spill]] %s5088_s13 }
  0x24   :  { %s5103_s4 = sld [smem:[%s6097_s0 + %s4938_s28]]   ;;  %s4942_s28 = smov 25  }
  0x25   :  { %s5108_s13 = sld [smem:[%s6097_s0 + %s4939_s7]]   ;;  %s4943_s7 = smov 26  }
  0x27   :  { %6163 = sst [smem:[#allocation41_spill]] %s5093_s20 }
  0x28   :  { %6164 = sst [smem:[#allocation42_spill]] %s5098_s27 }
  0x29   :  { %s5113_s20 = sld [smem:[%s6097_s0 + %s4940_s15]]   ;;  %s4944_s15 = smov 27  }
  0x2a   :  { %6165 = sst [smem:[#allocation43_spill]] %s5103_s4 }
  0x2b   :  { %6166 = sst [smem:[#allocation44_spill]] %s5108_s13 }
  0x2c   :  { %s5118_s27 = sld [smem:[%s6097_s0 + %s4941_s22]]   ;;  %s4945_s22 = smov 28  }
  0x2d   :  { %s5123_s4 = sld [smem:[%s6097_s0 + %s4942_s28]]   ;;  %s4946_s28 = smov 29  }
  0x2e   :  { %s5128_s13 = sld [smem:[%s6097_s0 + %s4943_s7]]   ;;  %s4947_s7 = smov 30  }
  0x2f   :  { %6167 = sst [smem:[#allocation45_spill]] %s5113_s20 }
  0x30   :  { %s5133_s20 = sld [smem:[%s6097_s0 + %s4944_s15]]   ;;  %s4948_s15 = smov 31  }
  0x32   :  { %6168 = sst [smem:[#allocation46_spill]] %s5118_s27 }
  0x33   :  { %6169 = sst [smem:[#allocation47_spill]] %s5123_s4 }
  0x34   :  { %6170 = sst [smem:[#allocation48_spill]] %s5128_s13 }
  0x35   :  { %s5138_s27 = sld [smem:[%s6097_s0 + %s4945_s22]]   ;;  %s4949_s22 = smov 32  }
  0x36   :  { %6171 = sst [smem:[#allocation49_spill]] %s5133_s20 }
  0x37   :  { %s5143_s4 = sld [smem:[%s6097_s0 + %s4946_s28]]   ;;  %s4950_s28 = smov 33  }
  0x38   :  { %s5148_s13 = sld [smem:[%s6097_s0 + %s4947_s7]]   ;;  %s4951_s7 = smov 34  }
  0x39   :  { %s5153_s20 = sld [smem:[%s6097_s0 + %s4948_s15]]   ;;  %s4952_s15 = smov 35  }
  0x3b   :  { %6172 = sst [smem:[#allocation50_spill]] %s5138_s27 }
  0x3c   :  { %s5158_s27 = sld [smem:[%s6097_s0 + %s4949_s22]]   ;;  %s4953_s22 = smov 36  }
  0x3d   :  { %6173 = sst [smem:[#allocation51_spill]] %s5143_s4 }
  0x3e   :  { %6174 = sst [smem:[#allocation52_spill]] %s5148_s13 }
  0x3f   :  { %6175 = sst [smem:[#allocation53_spill]] %s5153_s20 }
  0x40   :  { %s5163_s4 = sld [smem:[%s6097_s0 + %s4950_s28]]   ;;  %s4954_s28 = smov 37  }
  0x41   :  { %s5168_s13 = sld [smem:[%s6097_s0 + %s4951_s7]]   ;;  %s4955_s7 = smov 38  }
  0x42   :  { %6176 = sst [smem:[#allocation54_spill]] %s5158_s27 }
  0x43   :  { %s5173_s20 = sld [smem:[%s6097_s0 + %s4952_s15]]   ;;  %s4956_s15 = smov 39  }
  0x44   :  { %s5178_s27 = sld [smem:[%s6097_s0 + %s4953_s22]]   ;;  %s4957_s22 = smov 40  }
  0x46   :  { %6177 = sst [smem:[#allocation55_spill]] %s5163_s4 }
  0x47   :  { %6178 = sst [smem:[#allocation56_spill]] %s5168_s13 }
  0x48   :  { %s5183_s4 = sld [smem:[%s6097_s0 + %s4954_s28]]   ;;  %s4958_s28 = smov 41  }
  0x49   :  { %6179 = sst [smem:[#allocation57_spill]] %s5173_s20 }
  0x4a   :  { %6180 = sst [smem:[#allocation58_spill]] %s5178_s27 }
  0x4b   :  { %s5188_s13 = sld [smem:[%s6097_s0 + %s4955_s7]]   ;;  %s4959_s7 = smov 42  }
  0x4c   :  { %s5193_s20 = sld [smem:[%s6097_s0 + %s4956_s15]]   ;;  %s4960_s15 = smov 43  }
  0x4d   :  { %s5198_s27 = sld [smem:[%s6097_s0 + %s4957_s22]]   ;;  %s4961_s22 = smov 44  }
  0x4e   :  { %6181 = sst [smem:[#allocation59_spill]] %s5183_s4 }
  0x4f   :  { %s5203_s4 = sld [smem:[%s6097_s0 + %s4958_s28]]   ;;  %s4962_s28 = smov 45  }
  0x50   :  { %s5213_s12 = sld [smem:[%s6097_s0 + %s4960_s15]]   ;;  %s4964_s15 = smov 47  }
  0x51   :  { %6182 = sst [smem:[#allocation60_spill]] %s5188_s13 }
  0x52   :  { %s5208_s13 = sld [smem:[%s6097_s0 + %s4959_s7]]   ;;  %s4963_s7 = smov 46  }
  0x53   :  { %6183 = sst [smem:[#allocation61_spill]] %s5198_s27 }
  0x54   :  { %s5218_s27 = sld [smem:[%s6097_s0 + %s4961_s22]]   ;;  %s4965_s22 = smov 48  }
  0x55   :  { %6184 = sst [smem:[#allocation62_spill]] %s5203_s4 }
  0x56   :  { %s5223_s9 = sld [smem:[%s6097_s0 + %s4962_s28]]   ;;  %s4966_s28 = smov 49  }
  0x57   :  { %s5233_s21 = sld [smem:[%s6097_s0 + %s4964_s15]]   ;;  %s4968_s15 = smov 51  }
  0x58   :  { %6185 = sst [smem:[#allocation63_spill]] %s5208_s13 }
  0x59   :  { %s5228_s13 = sld [smem:[%s6097_s0 + %s4963_s7]]   ;;  %s4967_s7 = smov 50  }
  0x5a   :  { %s5238_s6 = sld [smem:[%s6097_s0 + %s4965_s22]]   ;;  %s4969_s22 = smov 52  }
  0x5b   :  { %s5243_s24 = sld [smem:[%s6097_s0 + %s4966_s28]]   ;;  %s4970_s28 = smov 53  }
  0x5c   :  { %s5253_s14 = sld [smem:[%s6097_s0 + %s4968_s15]]  }
  0x5d   :  { %s5263_s3 = sld [smem:[%s6097_s0 + %s4970_s28]]  }
  0x5f   :  { %6186 = sst [smem:[#allocation64_spill]] %s5228_s13 }
  0x60   :  { %6187 = sst [smem:[#allocation65_spill]] %s5238_s6 }
  0x61   :  { %s5248_s13 = sld [smem:[%s6097_s0 + %s4967_s7]]   ;;  %s4971_s7 = smov 54  }
  0x62   :  { %s5258_s6 = sld [smem:[%s6097_s0 + %s4969_s22]]  }
  0x63   :  { %6189 = sst [smem:[#allocation67_spill]] %s5263_s3 }
  0x64   :  { %s5268_s29 = sld [smem:[%s6097_s0 + %s4971_s7]]  }
  0x68   :  { %6188 = sst [smem:[#allocation66_spill]] %s5258_s6 }
  0x6a   :  { %6190 = sst [smem:[#allocation68_spill]] %s5268_s29 }
  0x6b   :  { %114 = vsyncpa [#allocation3], 0 }
  0x6c   :  { %115 = vsyncpa [#allocation6], 0 }
  0x6d   :  { %116 = vsyncpa [#allocation9], 0 }
  0x6e   :  { %117 = vsyncpa [#allocation12], 0 }
  0x6f   :  { %118 = vsyncpa [#allocation15], 0 }
  0x70   :  { %119 = vsyncpa [#allocation18], 0 }
  0x71   :  { %120 = vsyncpa [#allocation4], 0 }
  0x72   :  { %122 = vsyncpa [#allocation4 + $0x1], 0  ;;  %s5270_s15 = smov 0   ;;  %s5272_s16 = smov 0  }
  0x73   :  { %s5274_s18 = smov 0   ;;  %s5276_s22 = smov 0  }
  0x74 LB: > { %s6191_s6 = sld [smem:[#allocation66_spill]]  ;;  %s5291_s0 = sadd.s32 4294967295, %s4916_s22   ;;  %s4912_s18 = sphi %s5274_s18, %s6268_s18   ;;  %s4908_s16 = sphi %s5272_s16, %s6267_s16   ;;  %s4904_s15 = sphi %s5270_s15, %s6266_s15   ;;  %s4916_s22 = sphi %s5276_s22, %s6265_s22  }
  0x75   : > { %s6192_s4 = sld [smem:[#allocation62_spill]]  ;;  %s4070_s23 = sadd.s32 4294967294, %s4916_s22  }
  0x76   : > { %s6193_s3 = sld [smem:[#allocation67_spill]]  ;;  %s5295_s26 = sadd.s32 1, %s4916_s22  }
  0x77   : > { %6194 = sst [smem:[#allocation69_spill]] %s4904_s15  ;;  %s1284_s28 = sadd.s32 1, %s4912_s18 }
  0x78   : > { %6195 = sst [smem:[#allocation70_spill]] %s4908_s16  ;;  %s1281_s1 = ssub.s32 %s4916_s22, %s5295_s26 }
  0x79   : > { %6196 = sst [smem:[#allocation71_spill]] %s4912_s18  ;;  %p1294_p0 = scmp.ne.s32.totalorder %s4912_s18, %s4908_s16 }
  0x7a   : > { %6197 = sst [smem:[#allocation72_spill]] %s4916_s22  ;;  %p1282_p1 = scmp.eq.s32.totalorder %s1281_s1, 0 }
  0x7b   : > { %6198 = sst [smem:[#allocation73_spill]] %s5295_s26  ;;  %p1295_p2 = scmp.eq.s32.totalorder %s5291_s0, 1 }
  0x7c   : > { %p1300_p3 = scmp.ne.s32.totalorder %s4908_s16, %s4904_s15  ;;  %p1301_p4 = scmp.eq.s32.totalorder %s4070_s23, 1 }
  0x7d   : > { %s5306_s2 = scalar_select %p1282_p1, %s4912_s18, %s1284_s28  }
  0x7e   : > { %p5308_p5 = por %p1295_p2, %p1294_p0  ;;  %p5312_p6 = por %p1301_p4, %p1300_p3 }
  0x7f   : > { %6199 = sst [smem:[#allocation74_spill]] %s5306_s2  ;;  %p4071_p7 = scmp.ge.s32.totalorder %s4916_s22, 1 }
  0x80   : > { %s6200_s7 = scalar_select %p5308_p5, 1, 0 }
  0x81   : > { %s6202_s10 = scalar_select %p5312_p6, 1, 0 }
  0x82   : > { %6201 = sst [smem:[#allocation75_spill]] %s6200_s7  ;;  %p1308_p8 = scmp.lt.s32.totalorder %s4916_s22, 3 }
  0x83   : > { %6203 = sst [smem:[#allocation76_spill]] %s6202_s10  ;;  %p4239_p9 = scmp.eq.s32.totalorder %s5291_s0, 0 }
  0x84   : > { %p5319_p10 = pnand %p4071_p7, %p1308_p8  ;;  %s1443_s23 = sshll.u32 %s6192_s4, 4  ;;  %s1444_s23 = int_to_ptr.hbm [resolvable:$true] %s1443_s23 }
  0x85   : > { %s4972_s28 = smov [#allocation5]   ;;  %s1470_s2 = sshll.u32 %s5218_s27, 4  ;;  %s5333_s2 = int_to_ptr.hbm [resolvable:$true] %s1470_s2 }
  0x86   : > { %p4204_p11 = pneg %p5319_p10  ;;  %s1445_s1 = sshll.u32 %s4972_s28, 4  ;;  %s1446_s1 = int_to_ptr.vmem [resolvable:$true] %s1445_s1 }
  0x87   : > { %s1497_s26 = sshll.u32 %s5233_s21, 4  ;;  %s4973_s10 = smov [#allocation8]   ;;  %s5351_s26 = int_to_ptr.hbm [resolvable:$true] %s1497_s26 }
  0x88   : > { %p5329_p12 = pnand %p4239_p9, %p4204_p11  ;;  %s5336_s15 = sshll.u32 %s4973_s10, 4  ;;  %s1473_s15 = int_to_ptr.vmem [resolvable:$true] %s5336_s15 }
  0x89   : > { %s4530_s22 = sshra.s32 %s1444_s23, 4  ;;  %s4537_s29 = scalar_lea.hbm %s6192_s4, 1  ;;  %s4531_s22 = int_to_ptr.hbm [resolvable:$true] %s4530_s22 }
  0x8a   : > { %s4532_s7 = scalar_lea.hbm %s4531_s22, 1  ;;  %p5340_p0 = pneg %p5329_p12 }
  0x8b   : > { %p4533_p13 = scmp.ne.s32.totalorder %s4531_s22, %s4532_s7  ;;  %p4538_p3 = scmp.lt.s32.totalorder %s4531_s22, %s6192_s4 }
  0x8c   : > { %p4539_p4 = scmp.lt.s32.totalorder %s4537_s29, %s4532_s7 }
  0x8d   : > { %p4535_p1 = pnand %p5340_p0, %p4533_p13 }
  0x8e   : > { %p4540_p7 = por %p4539_p4, %p4538_p3 }
  0x8f   : > { %p4536_p2 = pneg %p4535_p1 }
  0x91   : > { %p4541_p8 = pnand %p4540_p7, %p4536_p2 }
  0x93   : > { %4544 = shalt.err (!%p4541_p8)
}
  0x94   : > { %4210 = dma.hbm_to_vmem [thread:$0]  (!%p5329_p12), %s1444_s23, 16, %s1446_s1, [#allocation6]  }
  0x95   : > { %s4560_s10 = sshra.s32 %s5333_s2, 4  ;;  %s4567_s29 = scalar_lea.hbm %s5218_s27, 1  ;;  %s4561_s10 = int_to_ptr.hbm [resolvable:$true] %s4560_s10 }
  0x96   : > { %s4562_s16 = scalar_lea.hbm %s4561_s10, 1  ;;  %p4568_p2 = scmp.lt.s32.totalorder %s4561_s10, %s5218_s27 }
  0x97   : > { %p4563_p11 = scmp.ne.s32.totalorder %s4561_s10, %s4562_s16  ;;  %p4569_p3 = scmp.lt.s32.totalorder %s4567_s29, %s4562_s16 }
  0x99   : > { %p4565_p13 = pnand %p4563_p11, %p5340_p0  ;;  %p4570_p4 = por %p4569_p3, %p4568_p2 }
  0x9b   : > { %p4566_p1 = pneg %p4565_p13 }
  0x9d   : > { %p4571_p7 = pnand %p4570_p4, %p4566_p1 }
  0x9f   : > { %4574 = shalt.err (!%p4571_p7)
}
  0xa0   : > { %4216 = dma.hbm_to_vmem [thread:$0]  (!%p5329_p12), %s5333_s2, 16, %s1473_s15, [#allocation9]  }
  0xa1   : > { %s1524_s22 = sshll.u32 %s5248_s13, 4  ;;  %s4974_s7 = smov [#allocation11]   ;;  %s5362_s22 = int_to_ptr.hbm [resolvable:$true] %s1524_s22 }
  0xa2   : > { %s1499_s23 = sshll.u32 %s4974_s7, 4  ;;  %s4590_s1 = sshra.s32 %s5351_s26, 4  ;;  %s1500_s23 = int_to_ptr.vmem [resolvable:$true] %s1499_s23  ;;  %s4591_s1 = int_to_ptr.hbm [resolvable:$true] %s4590_s1 }
  0xa3   : > { %s4592_s16 = scalar_lea.hbm %s4591_s1, 1  ;;  %s4597_s10 = scalar_lea.hbm %s5233_s21, 1 }
  0xa4   : > { %p4593_p8 = scmp.ne.s32.totalorder %s4591_s1, %s4592_s16  ;;  %p4598_p1 = scmp.lt.s32.totalorder %s4591_s1, %s5233_s21 }
  0xa5   : > { %p4599_p2 = scmp.lt.s32.totalorder %s4597_s10, %s4592_s16 }
  0xa6   : > { %p4595_p11 = pnand %p4593_p8, %p5340_p0 }
  0xa7   : > { %p4600_p3 = por %p4599_p2, %p4598_p1 }
  0xa8   : > { %p4596_p13 = pneg %p4595_p11 }
  0xaa   : > { %p4601_p4 = pnand %p4600_p3, %p4596_p13 }
  0xac   : > { %4604 = shalt.err (!%p4601_p4)
}
  0xad   : > { %4222 = dma.hbm_to_vmem [thread:$0]  (!%p5329_p12), %s5351_s26, 16, %s1500_s23, [#allocation12]  }
  0xae   : > { %s4975_s15 = smov [#allocation14]   ;;  %s1428_s29 = sshll.u32 %s5193_s20, 4  ;;  %s5373_s29 = int_to_ptr.hbm [resolvable:$true] %s1428_s29 }
  0xaf   : > { %s1526_s2 = sshll.u32 %s4975_s15, 4  ;;  %s4620_s7 = sshra.s32 %s5362_s22, 4  ;;  %s1527_s2 = int_to_ptr.vmem [resolvable:$true] %s1526_s2  ;;  %s4621_s7 = int_to_ptr.hbm [resolvable:$true] %s4620_s7 }
  0xb0   : > { %s4622_s1 = scalar_lea.hbm %s4621_s7, 1  ;;  %s4627_s16 = scalar_lea.hbm %s5248_s13, 1 }
  0xb1   : > { %p4623_p7 = scmp.ne.s32.totalorder %s4621_s7, %s4622_s1  ;;  %p4628_p13 = scmp.lt.s32.totalorder %s4621_s7, %s5248_s13 }
  0xb2   : > { %p4629_p1 = scmp.lt.s32.totalorder %s4627_s16, %s4622_s1 }
  0xb3   : > { %p4625_p8 = pnand %p4623_p7, %p5340_p0 }
  0xb4   : > { %p4630_p2 = por %p4629_p1, %p4628_p13 }
  0xb5   : > { %p4626_p11 = pneg %p4625_p8 }
  0xb7   : > { %p4631_p3 = pnand %p4630_p2, %p4626_p11 }
  0xb9   : > { %4634 = shalt.err (!%p4631_p3)
}
  0xba   : > { %4228 = dma.hbm_to_vmem [thread:$0]  (!%p5329_p12), %s5362_s22, 16, %s1527_s2, [#allocation15]  }
  0xbb   : > { %s1458_s26 = sshll.u32 %s5213_s12, 4  ;;  %s4976_s23 = smov [#allocation2]   ;;  %s5384_s26 = int_to_ptr.hbm [resolvable:$true] %s1458_s26 }
  0xbc   : > { %s1430_s10 = sshll.u32 %s4976_s23, 4  ;;  %s4650_s15 = sshra.s32 %s5373_s29, 4  ;;  %s1431_s10 = int_to_ptr.vmem [resolvable:$true] %s1430_s10  ;;  %s4651_s15 = int_to_ptr.hbm [resolvable:$true] %s4650_s15 }
  0xbd   : > { %s4652_s7 = scalar_lea.hbm %s4651_s15, 1  ;;  %s4657_s1 = scalar_lea.hbm %s5193_s20, 1 }
  0xbe   : > { %p4653_p4 = scmp.ne.s32.totalorder %s4651_s15, %s4652_s7  ;;  %p4658_p11 = scmp.lt.s32.totalorder %s4651_s15, %s5193_s20 }
  0xbf   : > { %p4659_p13 = scmp.lt.s32.totalorder %s4657_s1, %s4652_s7 }
  0xc0   : > { %p4655_p7 = pnand %p4653_p4, %p5340_p0 }
  0xc1   : > { %p4660_p1 = por %p4659_p13, %p4658_p11 }
  0xc2   : > { %p4656_p8 = pneg %p4655_p7 }
  0xc4   : > { %p4661_p2 = pnand %p4660_p1, %p4656_p8 }
  0xc6   : > { %4664 = shalt.err (!%p4661_p2)
}
  0xc7   : > { %4207 = dma.hbm_to_vmem [thread:$0]  (!%p5329_p12), %s5373_s29, 16, %s1431_s10, [#allocation3]  }
  0xc8   : > { %s4977_s22 = smov [#allocation7]   ;;  %s1482_s16 = sshll.u32 %s5223_s9, 4  ;;  %s5395_s16 = int_to_ptr.hbm [resolvable:$true] %s1482_s16 }
  0xc9   : > { %s1460_s2 = sshll.u32 %s4977_s22, 4  ;;  %s4680_s23 = sshra.s32 %s5384_s26, 4  ;;  %s1461_s2 = int_to_ptr.vmem [resolvable:$true] %s1460_s2  ;;  %s4681_s23 = int_to_ptr.hbm [resolvable:$true] %s4680_s23 }
  0xca   : > { %s4682_s15 = scalar_lea.hbm %s4681_s23, 1  ;;  %s4687_s7 = scalar_lea.hbm %s5213_s12, 1 }
  0xcb   : > { %p4683_p3 = scmp.ne.s32.totalorder %s4681_s23, %s4682_s15  ;;  %p4688_p8 = scmp.lt.s32.totalorder %s4681_s23, %s5213_s12 }
  0xcc   : > { %p4689_p11 = scmp.lt.s32.totalorder %s4687_s7, %s4682_s15 }
  0xcd   : > { %p4685_p4 = pnand %p4683_p3, %p5340_p0 }
  0xce   : > { %p4690_p13 = por %p4689_p11, %p4688_p8 }
  0xcf   : > { %p4686_p7 = pneg %p4685_p4 }
  0xd1   : > { %p4691_p1 = pnand %p4690_p13, %p4686_p7 }
  0xd3   : > { %4694 = shalt.err (!%p4691_p1)
}
  0xd4   : > { %4213 = dma.hbm_to_vmem [thread:$0]  (!%p5329_p12), %s5384_s26, 16, %s1461_s2, [#allocation6]  }
  0xd5   : > { %s1512_s29 = sshll.u32 %s5243_s24, 4  ;;  %s4978_s10 = smov [#allocation10]   ;;  %s5406_s29 = int_to_ptr.hbm [resolvable:$true] %s1512_s29 }
  0xd6   : > { %s1484_s1 = sshll.u32 %s4978_s10, 4  ;;  %s4710_s22 = sshra.s32 %s5395_s16, 4  ;;  %s1485_s1 = int_to_ptr.vmem [resolvable:$true] %s1484_s1  ;;  %s4711_s22 = int_to_ptr.hbm [resolvable:$true] %s4710_s22 }
  0xd7   : > { %s4712_s23 = scalar_lea.hbm %s4711_s22, 1  ;;  %s4717_s15 = scalar_lea.hbm %s5223_s9, 1 }
  0xd8   : > { %p4713_p2 = scmp.ne.s32.totalorder %s4711_s22, %s4712_s23  ;;  %p4718_p7 = scmp.lt.s32.totalorder %s4711_s22, %s5223_s9 }
  0xd9   : > { %p4719_p8 = scmp.lt.s32.totalorder %s4717_s15, %s4712_s23 }
  0xda   : > { %p4715_p3 = pnand %p4713_p2, %p5340_p0 }
  0xdb   : > { %p4720_p11 = por %p4719_p8, %p4718_p7 }
  0xdc   : > { %p4716_p4 = pneg %p4715_p3 }
  0xde   : > { %p4721_p13 = pnand %p4720_p11, %p4716_p4 }
  0xe0   : > { %4724 = shalt.err (!%p4721_p13)
}
  0xe1   : > { %4219 = dma.hbm_to_vmem [thread:$0]  (!%p5329_p12), %s5395_s16, 16, %s1485_s1, [#allocation9]  }
  0xe2   : > { %s4979_s26 = smov [#allocation13]   ;;  %s1536_s7 = sshll.u32 %s5253_s14, 4  ;;  %s5417_s7 = int_to_ptr.hbm [resolvable:$true] %s1536_s7 }
  0xe3   : > { %s1514_s2 = sshll.u32 %s4979_s26, 4  ;;  %s4740_s10 = sshra.s32 %s5406_s29, 4  ;;  %s1515_s2 = int_to_ptr.vmem [resolvable:$true] %s1514_s2  ;;  %s4741_s10 = int_to_ptr.hbm [resolvable:$true] %s4740_s10 }
  0xe4   : > { %s4742_s22 = scalar_lea.hbm %s4741_s10, 1  ;;  %s4747_s23 = scalar_lea.hbm %s5243_s24, 1 }
  0xe5   : > { %p4743_p1 = scmp.ne.s32.totalorder %s4741_s10, %s4742_s22  ;;  %p4748_p4 = scmp.lt.s32.totalorder %s4741_s10, %s5243_s24 }
  0xe6   : > { %p4749_p7 = scmp.lt.s32.totalorder %s4747_s23, %s4742_s22 }
  0xe7   : > { %p4745_p2 = pnand %p4743_p1, %p5340_p0 }
  0xe8   : > { %p4750_p8 = por %p4749_p7, %p4748_p4 }
  0xe9   : > { %p4746_p3 = pneg %p4745_p2 }
  0xeb   : > { %p4751_p11 = pnand %p4750_p8, %p4746_p3 }
  0xed   : > { %4754 = shalt.err (!%p4751_p11)
}
  0xee   : > { %4225 = dma.hbm_to_vmem [thread:$0]  (!%p5329_p12), %s5406_s29, 16, %s1515_s2, [#allocation12]  }
  0xef   : > { %s1551_s16 = sshll.u32 %s6193_s3, 4  ;;  %s4980_s1 = smov [#allocation16]   ;;  %s5428_s16 = int_to_ptr.hbm [resolvable:$true] %s1551_s16 }
  0xf0   : > { %s1538_s15 = sshll.u32 %s4980_s1, 4  ;;  %s4770_s26 = sshra.s32 %s5417_s7, 4  ;;  %s1539_s15 = int_to_ptr.vmem [resolvable:$true] %s1538_s15  ;;  %s4771_s26 = int_to_ptr.hbm [resolvable:$true] %s4770_s26 }
  0xf1   : > { %s4772_s10 = scalar_lea.hbm %s4771_s26, 1  ;;  %s4777_s22 = scalar_lea.hbm %s5253_s14, 1 }
  0xf2   : > { %p4773_p13 = scmp.ne.s32.totalorder %s4771_s26, %s4772_s10  ;;  %p4778_p3 = scmp.lt.s32.totalorder %s4771_s26, %s5253_s14 }
  0xf3   : > { %p4779_p4 = scmp.lt.s32.totalorder %s4777_s22, %s4772_s10 }
  0xf4   : > { %p4775_p1 = pnand %p4773_p13, %p5340_p0 }
  0xf5   : > { %p4780_p7 = por %p4779_p4, %p4778_p3 }
  0xf6   : > { %p4776_p2 = pneg %p4775_p1 }
  0xf8   : > { %p4781_p8 = pnand %p4780_p7, %p4776_p2 }
  0xfa   : > { %4784 = shalt.err (!%p4781_p8)
}
  0xfb   : > { %4231 = dma.hbm_to_vmem [thread:$0]  (!%p5329_p12), %s5417_s7, 16, %s1539_s15, [#allocation15]  }
  0xfc   : > { %s4981_s29 = smov [#allocation17]   ;;  %s4800_s23 = sshra.s32 %s5428_s16, 4  ;;  %s4801_s23 = int_to_ptr.hbm [resolvable:$true] %s4800_s23 }
  0xfd   : > { %s1553_s2 = sshll.u32 %s4981_s29, 4  ;;  %s4802_s1 = scalar_lea.hbm %s4801_s23, 1  ;;  %s1554_s2 = int_to_ptr.vmem [resolvable:$true] %s1553_s2 }
  0xfe   : > { %p4803_p11 = scmp.ne.s32.totalorder %s4801_s23, %s4802_s1  ;;  %s4807_s26 = scalar_lea.hbm %s6193_s3, 1 }
  0xff   : > { %p4808_p2 = scmp.lt.s32.totalorder %s4801_s23, %s6193_s3  ;;  %p4809_p3 = scmp.lt.s32.totalorder %s4807_s26, %s4802_s1 }
 0x100   : > { %p4805_p13 = pnand %p4803_p11, %p5340_p0 }
 0x101   : > { %p4810_p4 = por %p4809_p3, %p4808_p2 }
 0x102   : > { %p4806_p1 = pneg %p4805_p13 }
 0x104   : > { %p4811_p7 = pnand %p4810_p4, %p4806_p1 }
 0x106   : > { %4814 = shalt.err (!%p4811_p7)
}
 0x107   : > { %4234 = dma.hbm_to_vmem [thread:$0]  (!%p5329_p12), %s5428_s16, 16, %s1554_s2, [#allocation18]  }
 0x108   : > { %1587 = sbr.rel (%p5319_p10) target bundleno = 4677 (0x1245), region = 236 }
 0x10d   : > { %4875 = dma.done.wait (%p4239_p9), [#allocation3], 16  }
 0x10e   : > { %4877 = vsyncadd (%p4239_p9), [#allocation3], 4294967280 }
 0x10f   : > { %4879 = dma.done.wait (%p4239_p9), [#allocation6], 32  }
 0x110   : > { %4881 = vsyncadd (%p4239_p9), [#allocation6], 4294967264 }
 0x111   : > { %4883 = dma.done.wait (%p4239_p9), [#allocation9], 32  }
 0x112   : > { %4885 = vsyncadd (%p4239_p9), [#allocation9], 4294967264 }
 0x113   : > { %4887 = dma.done.wait (%p4239_p9), [#allocation12], 32  }
 0x114   : > { %4889 = vsyncadd (%p4239_p9), [#allocation12], 4294967264 }
 0x115   : > { %4891 = dma.done.wait (%p4239_p9), [#allocation15], 32  }
 0x116   : > { %4893 = vsyncadd (%p4239_p9), [#allocation15], 4294967264 }
 0x117   : > { %4895 = dma.done.wait (%p4239_p9), [#allocation18], 16  }
 0x118   : > { %4897 = vsyncadd (%p4239_p9), [#allocation18], 4294967280  ;;  %s6207_s5 = sld [smem:[#allocation27_spill]]  ;;  %p1766_p10 = scmp.lt.s32.totalorder %s5291_s0, 1  ;;  %v1789_v0 = vld [vmem:[%s5023_s25 + $0x30] sm:$0xff]  ;;  %v1790_v1 = vld [vmem:[%s5023_s25 + $0x38] sm:$0xff] }
 0x119   : > { %v1787_v2 = vld [vmem:[%s5023_s25 + $0x20] sm:$0xff]  ;;  %v1796_v3 = vpack.c.bf16 %v1790_v1, %v1789_v0  ;;  %v1788_v4 = vld [vmem:[%s5023_s25 + $0x28] sm:$0xff]  ;;  %v1785_v6 = vld [vmem:[%s5023_s25 + $0x10] sm:$0xff]  ;;  %vm1800_vm0 = vcmask 523264   ;;  %vm1827_vm1 = vcmask 261120   ;;  %v4982_v36 = vmov 32.0  }
 0x11a   : > { %s5474_s18 = scalar_select %p1766_p10, %s5291_s0, 1  ;;  %v1795_v5 = vpack.c.bf16 %v1788_v4, %v1787_v2  ;;  %v1786_v7 = vld [vmem:[%s5023_s25 + $0x18] sm:$0xff]  ;;  %v1783_v8 = vld [vmem:[%s5023_s25] sm:$0xff]  ;;  %v1784_v9 = vld [vmem:[%s5023_s25 + $0x8] sm:$0xff]  ;;  %4412 = vrcp.f32 %v4982_v36  ;;  %vm2099_vm12 = vcmask 1043456   ;;  %vm2017_vm13 = vcmask 64512  }
 0x11b   : > { %1811 = vmatpush.bf16.msra.mxu0 %v1796_v3  ;;  %v1794_v10 = vpack.c.bf16 %v1786_v7, %v1785_v6  ;;  %v1793_v13 = vpack.c.bf16 %v1784_v9, %v1783_v8  ;;  %v1797_v17 = vld [vmem:[%s5013_s17] sm:$0xff]  ;;  %v1798_v23 = vld [vmem:[%s5013_s17 + $0x8] sm:$0xff]  ;;  %v1799_v29 = vld [vmem:[%s5013_s17 + $0x10] sm:$0xff]  ;;  %s6208_s7 = sld [smem:[#allocation31_spill]]  ;;  %s6133_s29 = smov 120   ;;  %vm2057_vm14 = vcmask 195584  }
 0x11c   : > { %s4161_s11 = smul.u32 24, %s5474_s18  ;;  %v1921_v45 = vld [vmem:[%s5038_s8 + $0x10] sm:$0xff]  ;;  %v1922_v46 = vld [vmem:[%s5038_s8 + $0x18] sm:$0xff]  ;;  %v1919_v58 = vld [vmem:[%s5038_s8] sm:$0xff]  ;;  %s6209_s16 = sld [smem:[#allocation32_spill]]  ;;  %vm2499_vm15 = vcmask 130048  }
 0x11d   : > { %v1957_v47 = vld [vmem:[%s5048_s19 + $0x10] sm:$0xff]  ;;  %v1926_v49 = vpack.c.bf16 %v1922_v46, %v1921_v45  ;;  %v1958_v50 = vld [vmem:[%s5048_s19 + $0x18] sm:$0xff]  ;;  %v1920_v59 = vld [vmem:[%s5038_s8 + $0x8] sm:$0xff]  ;;  %s6210_s15 = sld [smem:[#allocation33_spill]]  ;;  %s6131_s2 = smov 104  }
 0x11e   : > { %s1770_s28 = scalar_lea.vmem %s6207_s5, %s4161_s11  ;;  %v1985_v51 = vld [vmem:[%s5058_s30 + $0x10] sm:$0xff]  ;;  %v1986_v52 = vld [vmem:[%s5058_s30 + $0x18] sm:$0xff]  ;;  %v1960_v55 = vpack.c.bf16 %v1958_v50, %v1957_v47  ;;  %v1955_v60 = vld [vmem:[%s5048_s19] sm:$0xff]  ;;  %v1925_v61 = vpack.c.bf16 %v1920_v59, %v1919_v58  ;;  %s6211_s10 = sld [smem:[#allocation34_spill]] }
 0x11f   : > { %1812 = vmatpush.bf16.msra.mxu0 %v1795_v5  ;;  %v1779_v11 = vld [vmem:[%s1770_s28] sm:$0xff]  ;;  %v1780_v12 = vld [vmem:[%s1770_s28 + $0x8] sm:$0xff]  ;;  %v1781_v15 = vld [vmem:[%s1770_s28 + $0x10] sm:$0xff]  ;;  %1943 = vmatpush.bf16.msra.mxu1 %v1926_v49  ;;  %v1988_v56 = vpack.c.bf16 %v1986_v52, %v1985_v51  ;;  %s6212_s22 = sld [smem:[#allocation35_spill]]  ;;  %s6129_s23 = smov 112  }
 0x120   : > { %v1791_v14 = vpack.c.bf16 %v1780_v12, %v1779_v11  ;;  %v1792_v16 = vpack.c.bf16 %v1781_v15, %v1781_v15  ;;  %v4413_v37 = vpop.eup %4412  ;;  %1971 = vmatpush.bf16.msra.mxu2 %v1960_v55  ;;  %v1956_v62 = vld [vmem:[%s5048_s19 + $0x8] sm:$0xff]  ;;  %v1983_v63 = vld [vmem:[%s5058_s30] sm:$0xff]  ;;  %s6213_s1 = sld [smem:[#allocation30_spill]]  ;;  %s6127_s26 = smov 8  }
 0x121   : > { %v1838_v38 = vmul.f32 32.0, %v4413_v37  ;;  %vm1842_vm2 = vweird.f32 %v4413_v37  ;;  %1999 = vmatpush.bf16.msra.mxu3 %v1988_v56  ;;  %v1984_v0 = vld [vmem:[%s5058_s30 + $0x8] sm:$0xff]  ;;  %v1959_v2 = vpack.c.bf16 %v1956_v62, %v1955_v60  ;;  %s6214_s11 = sld [smem:[#allocation28_spill]]  ;;  %s6123_s28 = smov 16  }
 0x122   : > { %v1987_v3 = vpack.c.bf16 %v1984_v0, %v1983_v63  ;;  %s6244_s4 = smov 16   ;;  %s6245_s5 = sld [smem:[#allocation60_spill]] }
 0x123   : > { %1813 = vmatpush.bf16.msra.mxu0 %v1794_v10  ;;  %v1839_v39 = vsub.f32 1.0, %v1838_v38  ;;  %1944 = vmatpush.bf16.msra.mxu1 %v1925_v61  ;;  %v4381_v60 = vld [vmem:[%s6210_s15] ss:$0 sm:$0xff]  ;;  %s4096_s15 = sshll.u32 %s5474_s18, 3 }
 0x124   : > { %1972 = vmatpush.bf16.msra.mxu2 %v1959_v2  ;;  %v4382_v2 = vld [vmem:[%s6211_s10] ss:$0 sm:$0xff] }
 0x125   : > { %v1840_v40 = vmul.f32 %v4413_v37, %v1839_v39  ;;  %2000 = vmatpush.bf16.msra.mxu3 %v1987_v3 }
 0x127   : > { %1814 = vmatpush.bf16.msra.mxu0 %v1793_v13  ;;  %v1841_v41 = vadd.f32 %v4413_v37, %v1840_v40  ;;  %s5730_s10 = scalar_lea.vmem %s6214_s11, %s4096_s15  ;;  %s6218_s15 = sld [smem:[#allocation52_spill]] }
 0x129   : > { %v5512_v42 = vsel %vm1842_vm2, %v4413_v37, %v1841_v41  ;;  %v4380_v41 = vld [vmem:[%s6209_s16] ss:$0 sm:$0xff]  ;;  %s6125_s16 = smov 24  }
 0x12a   : > { %4097 = vmatmul.msk.bf16.vlgmr.msra.gmra.mxu0 %vm1800_vm0, %v1791_v14 }
 0x13a   : > { %4098 = vmatmul.msk.bf16.gmra.mxu0 %vm1800_vm0, %v1792_v16 }
 0x1a7   : > { %v1816_v18 = vpop.f32.mrf.mxu0 }
 0x1a8   : > { %v5489_v19 = vadd.f32 %v1816_v18, %v1797_v17 }
 0x1aa   : > { %v1828_v20 = vsel %vm1827_vm1, %v5489_v19, 0.0  ;;  %v1847_v21 = vmul.f32 %v5489_v19, %v5489_v19 }
 0x1ab   : > { %1829 = vadd.xlane.f32.xlu0 %v1828_v20 }
 0x1ac   : > { %v1850_v22 = vsel %vm1827_vm1, %v1847_v21, 0.0 }
 0x1ad   : > { %1851 = vadd.xlane.f32.xlu1 %v1850_v22 }
 0x1af   : > { %v1818_v24 = vpop.f32.mrf.mxu0 }
 0x1b0   : > { %v5497_v25 = vadd.f32 %v1818_v24, %v1798_v23 }
 0x1b2   : > { %v1831_v26 = vsel %vm1827_vm1, %v5497_v25, 0.0  ;;  %v1848_v27 = vmul.f32 %v5497_v25, %v5497_v25 }
 0x1b3   : > { %1832 = vadd.xlane.f32.xlu0 %v1831_v26 }
 0x1b4   : > { %v1853_v28 = vsel %vm1827_vm1, %v1848_v27, 0.0 }
 0x1b5   : > { %1854 = vadd.xlane.f32.xlu1 %v1853_v28 }
 0x1b7   : > { %v1821_v30 = vpop.f32.mrf.mxu0 }
 0x1b8   : > { %v5505_v31 = vadd.f32 %v1821_v30, %v1799_v29 }
 0x1ba   : > { %v1834_v32 = vsel %vm1827_vm1, %v5505_v31, 0.0  ;;  %v1849_v33 = vmul.f32 %v5505_v31, %v5505_v31 }
 0x1bb   : > { %1835 = vadd.xlane.f32.xlu2 %v1834_v32 }
 0x1bc   : > { %v1856_v35 = vsel %vm1827_vm1, %v1849_v33, 0.0 }
 0x1bf   : > { %v1823_v34 = vpop.f32.mrf.mxu0 }
 0x1c3   : > { %1857 = vadd.xlane.f32.xlu2 %v1856_v35  ;;  %v4379_v35 = vld [vmem:[%s6208_s7] ss:$0 sm:$0xff]  ;;  %s6215_s7 = sld [smem:[#allocation36_spill]] }
 0x21e   : > { %v1830_v43 = vpop.xlane.xlu0 %1829 }
 0x21f   : > { %v5515_v44 = vmul.f32 %v5512_v42, %v1830_v43 }
 0x220   : > { %v1852_v48 = vpop.xlane.xlu1 %1851 }
 0x221   : > { %v1862_v53 = vmul.f32 %v5515_v44, %v5515_v44  ;;  %v1859_v54 = vmul.f32 %v1852_v48, %v5512_v42  ;;  %v1868_v30 = vsub.f32 %v5489_v19, %v5515_v44 }
 0x223   : > { %v1865_v57 = vsub.f32 %v1859_v54, %v1862_v53 }
 0x225   : > { %v1871_v1 = vadd.f32 1e-05, %v1865_v57 }
 0x226   : > { %v1833_v4 = vpop.xlane.xlu0 %1832 }
 0x227   : > { %4414 = vrsqrt.f32 %v1871_v1  ;;  %v1845_v5 = vmul.f32 %v5512_v42, %v1833_v4  ;;  %vm1880_vm4 = vweird.f32 %v1871_v1 }
 0x228   : > { %v1855_v6 = vpop.xlane.xlu1 %1854 }
 0x229   : > { %v1863_v7 = vmul.f32 %v1845_v5, %v1845_v5  ;;  %v1860_v8 = vmul.f32 %v1855_v6, %v5512_v42  ;;  %v1869_v37 = vsub.f32 %v5497_v25, %v1845_v5 }
 0x22b   : > { %v1866_v9 = vsub.f32 %v1860_v8, %v1863_v7 }
 0x22d   : > { %v4415_v10 = vpop.eup %4414  ;;  %v1872_v11 = vadd.f32 1e-05, %v1866_v9 }
 0x22e   : > { %v1875_v12 = vmul.f32 %v4415_v10, %v1871_v1  ;;  %v1836_v13 = vpop.xlane.xlu2 %1835  ;;  %vm1881_vm3 = vweird.f32 %v4415_v10 }
 0x22f   : > { %4416 = vrsqrt.f32 %v1872_v11  ;;  %v1846_v18 = vmul.f32 %v5512_v42, %v1836_v13  ;;  %vm1882_vm5 = vmor %vm1880_vm4, %vm1881_vm3  ;;  %vm1890_vm7 = vweird.f32 %v1872_v11 }
 0x230   : > { %v1876_v14 = vmul.f32 %v4415_v10, %v1875_v12  ;;  %v4383_v12 = vld [vmem:[%s6212_s22] ss:$0 sm:$0xff]  ;;  %s6216_s22 = sld [smem:[#allocation48_spill]] }
 0x231   : > { %v1864_v23 = vmul.f32 %v1846_v18, %v1846_v18  ;;  %v1870_v53 = vsub.f32 %v5505_v31, %v1846_v18 }
 0x232   : > { %v1877_v15 = vmul.f32 0.5, %v1876_v14 }
 0x234   : > { %v1878_v16 = vsub.f32 1.5, %v1877_v15 }
 0x235   : > { %v4417_v17 = vpop.eup %4416 }
 0x236   : > { %v1879_v20 = vmul.f32 %v4415_v10, %v1878_v16  ;;  %v1885_v21 = vmul.f32 %v4417_v17, %v1872_v11  ;;  %v1858_v22 = vpop.xlane.xlu2 %1857  ;;  %vm1891_vm6 = vweird.f32 %v4417_v17  ;;  %s6217_s11 = smov %s6216_s22 }
 0x237   : > { %v1861_v24 = vmul.f32 %v1858_v22, %v5512_v42  ;;  %vm1892_vm8 = vmor %vm1890_vm7, %vm1891_vm6 }
 0x238   : > { %v1886_v26 = vmul.f32 %v4417_v17, %v1885_v21  ;;  %v1883_v28 = vsel %vm1882_vm5, %v4415_v10, %v1879_v20 }
 0x239   : > { %v1867_v27 = vsub.f32 %v1861_v24, %v1864_v23  ;;  %v1904_v34 = vmul.f32 %v1883_v28, %v1868_v30 }
 0x23a   : > { %v1887_v29 = vmul.f32 0.5, %v1886_v26 }
 0x23b   : > { %v1873_v32 = vadd.f32 1e-05, %v1867_v27  ;;  %v1910_v40 = vmul.f32 %v4379_v35, %v1904_v34 }
 0x23c   : > { %v1888_v33 = vsub.f32 1.5, %v1887_v29 }
 0x23d   : > { %4418 = vrsqrt.f32 %v1873_v32  ;;  %v1916_v47 = vadd.f32 %v4380_v41, %v1910_v40  ;;  %vm1900_vm10 = vweird.f32 %v1873_v32 }
 0x23e   : > { %v1889_v36 = vmul.f32 %v4417_v17, %v1888_v33 }
 0x240   : > { %v1893_v38 = vsel %vm1892_vm8, %v4417_v17, %v1889_v36 }
 0x241   : > { %v1905_v39 = vmul.f32 %v1893_v38, %v1869_v37 }
 0x243   : > { %v4419_v43 = vpop.eup %4418  ;;  %v1911_v45 = vmul.f32 %v4379_v35, %v1905_v39 }
 0x244   : > { %v1895_v46 = vmul.f32 %v4419_v43, %v1873_v32  ;;  %vm1901_vm9 = vweird.f32 %v4419_v43 }
 0x245   : > { %v1917_v44 = vadd.f32 %v4380_v41, %v1911_v45  ;;  %vm1902_vm11 = vmor %vm1900_vm10, %vm1901_vm9 }
 0x246   : > { %v1896_v48 = vmul.f32 %v4419_v43, %v1895_v46 }
 0x247   : > { %v1923_v49 = vpack.c.bf16 %v1917_v44, %v1916_v47  ;;  %v5583_v44 = vld [vmem:[%s6213_s1] ss:$0 sm:$0xff] }
 0x248   : > { %v1897_v50 = vmul.f32 0.5, %v1896_v48 }
 0x249   : > { %4099 = vmatmul.msk.bf16.vlgmr.msra.gmra.mxu1 %vm1827_vm1, %v1923_v49  ;;  %4101 = vmatmul.msk.bf16.vlgmr.msra.gmra.mxu2 %vm1827_vm1, %v1923_v49 }
 0x24a   : > { %v1898_v51 = vsub.f32 1.5, %v1897_v50  ;;  %4103 = vmatmul.msk.bf16.vlgmr.msra.gmra.mxu3 %vm1827_vm1, %v1923_v49 }
 0x24c   : > { %v1899_v52 = vmul.f32 %v4419_v43, %v1898_v51 }
 0x24e   : > { %v1903_v54 = vsel %vm1902_vm11, %v4419_v43, %v1899_v52 }
 0x24f   : > { %v1906_v55 = vmul.f32 %v1903_v54, %v1870_v53 }
 0x251   : > { %v1912_v56 = vmul.f32 %v4379_v35, %v1906_v55 }
 0x253   : > { %v1918_v57 = vadd.f32 %v4380_v41, %v1912_v56 }
 0x255   : > { %v1924_v58 = vpack.c.bf16 %v1918_v57, %v1918_v57 }
 0x259   : > { %4100 = vmatmul.msk.bf16.gmra.mxu1 %vm1827_vm1, %v1924_v58  ;;  %4102 = vmatmul.msk.bf16.gmra.mxu2 %vm1827_vm1, %v1924_v58 }
 0x25a   : > { %4104 = vmatmul.msk.bf16.gmra.mxu3 %vm1827_vm1, %v1924_v58 }
 0x2c6   : > { %v1946_v59 = vpop.f32.mrf.mxu1 }
 0x2c7   : > { %v1947_v0 = vadd.f32 %v4381_v60, %v1946_v59 }
 0x2cc   : > { %v1974_v61 = vpop.f32.mrf.mxu2 }
 0x2cd   : > { %v2002_v62 = vpop.f32.mrf.mxu3  ;;  %v1975_v5 = vadd.f32 %v4382_v2, %v1974_v61 }
 0x2ce   : > { %v1948_v63 = vpop.f32.mrf.mxu1  ;;  %v2003_v24 = vadd.f32 %v4383_v12, %v2002_v62 }
 0x2cf   : > { %v1949_v1 = vadd.f32 %v4381_v60, %v1948_v63 }
 0x2d1   : > { %v2011_v3 = vpack.c.bf16 %v1949_v1, %v1947_v0 }
 0x2d3   : > { %2123 = vrot.lane.b32.xlu2 %v2011_v3, %s6133_s29 }
 0x2d4   : > { %v1976_v4 = vpop.f32.mrf.mxu2 }
 0x2d5   : > { %v1977_v6 = vadd.f32 %v4382_v2, %v1976_v4  ;;  %v2004_v7 = vpop.f32.mrf.mxu3 }
 0x2d6   : > { %v1951_v8 = vpop.f32.mrf.mxu1  ;;  %v2005_v21 = vadd.f32 %v4383_v12, %v2004_v7 }
 0x2d7   : > { %v2013_v9 = vpack.c.bf16 %v1977_v6, %v1975_v5  ;;  %v1952_v10 = vadd.f32 %v4381_v60, %v1951_v8 }
 0x2d8   : > { %v5562_v27 = vpack.c.bf16 %v2005_v21, %v2003_v24 }
 0x2d9   : > { %v2012_v11 = vpack.c.bf16 %v1952_v10, %v1952_v10  ;;  %2129 = vrot.lane.b32.xlu1 %v2013_v9, %s6133_s29  ;;  %v2025_v29 = vsel %vm2017_vm13, %v2013_v9, 0 }
 0x2db   : > { %2125 = vrot.lane.b32.xlu2 %v2012_v11, %s6133_s29 }
 0x2dc   : > { %v1979_v13 = vpop.f32.mrf.mxu2 }
 0x2dd   : > { %v1980_v14 = vadd.f32 %v4382_v2, %v1979_v13  ;;  %v2007_v15 = vpop.f32.mrf.mxu3 }
 0x2de   : > { %v2008_v16 = vadd.f32 %v4383_v12, %v2007_v15  ;;  %v1953_v17 = vpop.f32.mrf.mxu1 }
 0x2df   : > { %v2014_v18 = vpack.c.bf16 %v1980_v14, %v1980_v14 }
 0x2e0   : > { %v5554_v20 = vpack.c.bf16 %v2008_v16, %v2008_v16 }
 0x2e1   : > { %2131 = vrot.lane.b32.xlu0 %v2014_v18, %s6133_s29  ;;  %2355 = vrot.lane.b32.xlu1 %v2014_v18, %s6131_s2  ;;  %v2028_v22 = vsel %vm2017_vm13, %v2014_v18, 0 }
 0x2e2   : > { %2036 = vmatpush.bf16.xpose.msrb.mxu1 %v2028_v22  ;;  %v2101_v23 = vsel %vm2099_vm12, %v5554_v20, 0 }
 0x2e3   : > { %2109 = vmatpush.bf16.msrb.mxu2 %v2101_v23  ;;  %2353 = vrot.lane.b32.xlu2 %v2013_v9, %s6131_s2 }
 0x2e4   : > { %v1981_v26 = vpop.f32.mrf.mxu2 }
 0x2e5   : > { %v2009_v28 = vpop.f32.mrf.mxu3 }
 0x2e7   : > { %2110 = vmatpush.bf16.msrb.mxu2 %v5562_v27 }
 0x2e9   : > { %2244 = vrot.lane.b32.xlu0 %v2014_v18, %s6129_s23  ;;  %2238 = vrot.lane.b32.xlu1 %v2011_v3, %s6129_s23 }
 0x2ea   : > { %2037 = vmatpush.bf16.xpose.msrb.mxu1 %v2025_v29 }
 0x2eb   : > { %2240 = vrot.lane.b32.xlu2 %v2012_v11, %s6129_s23 }
 0x2f1   : > { %2242 = vrot.lane.b32.xlu0 %v2013_v9, %s6129_s23  ;;  %2351 = vrot.lane.b32.xlu1 %v2012_v11, %s6131_s2 }
 0x2f2   : > { %4105 = vmatmul.msk.bf16.vlgmr.msrb.gmra.mxu1 %vm2017_vm13, %v2011_v3 }
 0x2f9   : > { %2349 = vrot.lane.b32.xlu0 %v2011_v3, %s6131_s2 }
 0x302   : > { %4106 = vmatmul.msk.bf16.gmra.mxu1 %vm2017_vm13, %v2012_v11 }
 0x32d   : > { %v2124_v30 = vpop.permute.xlu2 %2123 }
 0x335   : > { %v2126_v35 = vpop.permute.xlu2 %2125 }
 0x33d   : > { %v2354_v41 = vpop.permute.xlu2 %2353 }
 0x33e   : > { %v2364_v46 = vsel %vm2017_vm13, %v2354_v41, 0 }
 0x345   : > { %v2241_v55 = vpop.permute.xlu2 %2240 }
 0x34b   : > { %v2130_v32 = vpop.permute.xlu1 %2129 }
 0x34c   : > { %v2140_v39 = vsel %vm2017_vm13, %v2130_v32, 0 }
 0x353   : > { %v2132_v33 = vpop.permute.xlu0 %2131  ;;  %v2356_v36 = vpop.permute.xlu1 %2355 }
 0x354   : > { %v2143_v34 = vsel %vm2017_vm13, %v2132_v33, 0  ;;  %v2367_v40 = vsel %vm2017_vm13, %v2356_v36, 0 }
 0x355   : > { %2151 = vmatpush.bf16.xpose.msrb.mxu3 %v2143_v34 }
 0x35b   : > { %v2245_v37 = vpop.permute.xlu0 %2244  ;;  %v2239_v47 = vpop.permute.xlu1 %2238 }
 0x35c   : > { %v2256_v38 = vsel %vm2017_vm13, %v2245_v37, 0 }
 0x35d   : > { %2152 = vmatpush.bf16.xpose.msrb.mxu3 %v2140_v39  ;;  %2264 = vmatpush.bf16.xpose.msra.mxu1 %v2256_v38 }
 0x363   : > { %v2243_v43 = vpop.permute.xlu0 %2242  ;;  %v2352_v63 = vpop.permute.xlu1 %2351 }
 0x364   : > { %v2253_v45 = vsel %vm2017_vm13, %v2243_v43, 0  ;;  %4109 = vmatmul.msk.bf16.vlgmr.msrb.gmra.mxu3 %vm2017_vm13, %v2124_v30 }
 0x365   : > { %2375 = vmatpush.bf16.xpose.msra.mxu3 %v2367_v40  ;;  %2265 = vmatpush.bf16.xpose.msra.mxu1 %v2253_v45 }
 0x36b   : > { %v2350_v60 = vpop.permute.xlu0 %2349 }
 0x36c   : > { %4113 = vmatmul.msk.bf16.vlgmr.msra.gmra.mxu1 %vm2017_vm13, %v2239_v47 }
 0x36d   : > { %2376 = vmatpush.bf16.xpose.msra.mxu3 %v2364_v46 }
 0x36f   : > { %v2039_v48 = vpop.f32.mrf.mxu1 }
 0x370   : > { %v2048_v49 = vmul.f32 0.35355338, %v2039_v48 }
 0x372   : > { %v2054_v50 = vadd.f32 %v5583_v44, %v2048_v49 }
 0x374   : > { %4110 = vmatmul.msk.bf16.gmra.mxu3 %vm2017_vm13, %v2126_v35  ;;  %v2058_v51 = vsel %vm2057_vm14, %v2054_v50, -inf }
 0x375   : > { %2059 = vmax.xlane.f32.xlu0 %v2058_v51 }
 0x377   : > { %v2041_v52 = vpop.f32.mrf.mxu1 }
 0x378   : > { %v2049_v53 = vmul.f32 0.35355338, %v2041_v52 }
 0x37a   : > { %v2055_v54 = vadd.f32 %v5583_v44, %v2049_v53 }
 0x37c   : > { %4114 = vmatmul.msk.bf16.gmra.mxu1 %vm2017_vm13, %v2241_v55  ;;  %v2061_v56 = vsel %vm2057_vm14, %v2055_v54, -inf }
 0x37d   : > { %2062 = vmax.xlane.f32.xlu2 %v2061_v56 }
 0x37f   : > { %v2044_v57 = vpop.f32.mrf.mxu1 }
 0x380   : > { %v2050_v58 = vmul.f32 0.35355338, %v2044_v57 }
 0x382   : > { %v2056_v59 = vadd.f32 %v5583_v44, %v2050_v58 }
 0x384   : > { %4117 = vmatmul.msk.bf16.vlgmr.msra.gmra.mxu3 %vm2017_vm13, %v2350_v60  ;;  %v2064_v61 = vsel %vm2057_vm14, %v2056_v59, -inf }
 0x385   : > { %2065 = vmax.xlane.f32.xlu2 %v2064_v61 }
 0x387   : > { %v2046_v62 = vpop.f32.mrf.mxu1 }
 0x394   : > { %4118 = vmatmul.msk.bf16.gmra.mxu3 %vm2017_vm13, %v2352_v63 }
 0x3e7   : > { %v2154_v0 = vpop.f32.mrf.mxu3 }
 0x3e8   : > { %v2163_v1 = vmul.f32 0.35355338, %v2154_v0  ;;  %v2060_v2 = vpop.xlane.xlu0 %2059 }
 0x3e9   : > { %v2267_v3 = vpop.f32.mrf.mxu1  ;;  %v2067_v6 = vsub.f32 %v2054_v50, %v2060_v2 }
 0x3ea   : > { %v2276_v4 = vmul.f32 0.35355338, %v2267_v3  ;;  %v5596_v5 = vadd.f32 %v5583_v44, %v2163_v1 }
 0x3eb   : > { %v2070_v11 = vmul.f32 1.442695, %v2067_v6 }
 0x3ec   : > { %v2169_v7 = vsel %vm2057_vm14, %v5596_v5, -inf  ;;  %v5601_v8 = vadd.f32 %v5583_v44, %v2276_v4 }
 0x3ed   : > { %2170 = vmax.xlane.f32.xlu1 %v2169_v7  ;;  %4420 = vpow2.f32 %v2070_v11 }
 0x3ee   : > { %v2282_v9 = vsel %vm2057_vm14, %v5601_v8, -inf }
 0x3ef   : > { %v2156_v10 = vpop.f32.mrf.mxu3  ;;  %2283 = vmax.xlane.f32.xlu0 %v2282_v9 }
 0x3f0   : > { %v2164_v12 = vmul.f32 0.35355338, %v2156_v10  ;;  %v2063_v13 = vpop.xlane.xlu2 %2062 }
 0x3f1   : > { %v2068_v14 = vsub.f32 %v2055_v54, %v2063_v13  ;;  %v2269_v15 = vpop.f32.mrf.mxu1 }
 0x3f2   : > { %v2277_v16 = vmul.f32 0.35355338, %v2269_v15  ;;  %v5606_v17 = vadd.f32 %v5583_v44, %v2164_v12 }
 0x3f3   : > { %v2072_v18 = vmul.f32 1.442695, %v2068_v14  ;;  %v5615_v30 = vpop.eup %4420 }
 0x3f4   : > { %v5609_v21 = vadd.f32 %v5583_v44, %v2277_v16  ;;  %v2172_v22 = vsel %vm2057_vm14, %v5606_v17, -inf  ;;  %v2076_v38 = vsel %vm2057_vm14, %v5615_v30, 0.0 }
 0x3f5   : > { %4422 = vpow2.f32 %v2072_v18 }
 0x3f6   : > { %v2285_v23 = vsel %vm2057_vm14, %v5609_v21, -inf }
 0x3f7   : > { %v2159_v24 = vpop.f32.mrf.mxu3  ;;  %2173 = vmax.xlane.f32.xlu0 %v2172_v22  ;;  %2286 = vmax.xlane.f32.xlu2 %v2285_v23 }
 0x3f8   : > { %v2066_v26 = vpop.xlane.xlu2 %2065  ;;  %v2165_v35 = vmul.f32 0.35355338, %v2159_v24 }
 0x3f9   : > { %v2069_v28 = vsub.f32 %v2056_v59, %v2066_v26  ;;  %v2272_v29 = vpop.f32.mrf.mxu1 }
 0x3fa   : > { %v2278_v32 = vmul.f32 0.35355338, %v2272_v29  ;;  %v2168_v41 = vadd.f32 %v5583_v44, %v2165_v35 }
 0x3fb   : > { %v5617_v33 = vpop.eup %4422  ;;  %v2074_v34 = vmul.f32 1.442695, %v2069_v28 }
 0x3fc   : > { %v2079_v36 = vsel %vm2057_vm14, %v5617_v33, 0.0  ;;  %v5622_v37 = vadd.f32 %v5583_v44, %v2278_v32  ;;  %v2175_v46 = vsel %vm2057_vm14, %v2168_v41, -inf }
 0x3fd   : > { %4424 = vpow2.f32 %v2074_v34  ;;  %2080 = vadd.xlane.f32.xlu1 %v2079_v36 }
 0x3fe   : > { %v2288_v39 = vsel %vm2057_vm14, %v5622_v37, -inf }
 0x3ff   : > { %v2161_v40 = vpop.f32.mrf.mxu3  ;;  %2077 = vadd.xlane.f32.xlu2 %v2076_v38  ;;  %2289 = vmax.xlane.f32.xlu0 %v2288_v39 }
 0x401   : > { %v2274_v43 = vpop.f32.mrf.mxu1 }
 0x403   : > { %v5629_v45 = vpop.eup %4424 }
 0x404   : > { %v2082_v47 = vsel %vm2057_vm14, %v5629_v45, 0.0 }
 0x405   : > { %2176 = vmax.xlane.f32.xlu1 %v2175_v46 }
 0x407   : > { %v2378_v48 = vpop.f32.mrf.mxu3  ;;  %2083 = vadd.xlane.f32.xlu2 %v2082_v47 }
 0x408   : > { %v2387_v49 = vmul.f32 0.35355338, %v2378_v48 }
 0x40a   : > { %v5635_v50 = vadd.f32 %v5583_v44, %v2387_v49 }
 0x40c   : > { %v2393_v51 = vsel %vm2057_vm14, %v5635_v50, -inf }
 0x40d   : > { %2394 = vmax.xlane.f32.xlu1 %v2393_v51 }
 0x40f   : > { %v2380_v52 = vpop.f32.mrf.mxu3 }
 0x410   : > { %v2388_v58 = vmul.f32 0.35355338, %v2380_v52 }
 0x412   : > { %v5649_v59 = vadd.f32 %v5583_v44, %v2388_v58 }
 0x413   : > { %2206 = vrot.lane.b32.xlu0 %v5562_v27, %s6133_s29 }
 0x414   : > { %v2396_v60 = vsel %vm2057_vm14, %v5649_v59, -inf }
 0x417   : > { %v2383_v53 = vpop.f32.mrf.mxu3 }
 0x418   : > { %v2389_v54 = vmul.f32 0.35355338, %v2383_v53 }
 0x41a   : > { %v5642_v55 = vadd.f32 %v5583_v44, %v2389_v54 }
 0x41c   : > { %v2399_v56 = vsel %vm2057_vm14, %v5642_v55, -inf }
 0x41d   : > { %2400 = vmax.xlane.f32.xlu2 %v2399_v56 }
 0x41f   : > { %v2385_v57 = vpop.f32.mrf.mxu3 }
 0x426   : > { %2208 = vrot.lane.b32.xlu1 %v5554_v20, %s6133_s29 }
 0x43d   : > { %2397 = vmax.xlane.f32.xlu0 %v2396_v60 }
 0x460   : > { %v2171_v61 = vpop.xlane.xlu1 %2170 }
 0x461   : > { %v2178_v62 = vsub.f32 %v5596_v5, %v2171_v61 }
 0x462   : > { %v2284_v63 = vpop.xlane.xlu0 %2283 }
 0x463   : > { %v2181_v0 = vmul.f32 1.442695, %v2178_v62  ;;  %v2291_v1 = vsub.f32 %v5601_v8, %v2284_v63 }
 0x465   : > { %4426 = vpow2.f32 %v2181_v0  ;;  %v2294_v2 = vmul.f32 1.442695, %v2291_v1 }
 0x467   : > { %4428 = vpow2.f32 %v2294_v2 }
 0x46a   : > { %v2287_v3 = vpop.xlane.xlu2 %2286  ;;  %v2174_v6 = vpop.xlane.xlu0 %2173 }
 0x46b   : > { %v5655_v4 = vpop.eup %4426  ;;  %v2292_v44 = vsub.f32 %v5609_v21, %v2287_v3  ;;  %v2179_v5 = vsub.f32 %v5606_v17, %v2174_v6 }
 0x46c   : > { %v2187_v7 = vsel %vm2057_vm14, %v5655_v4, 0.0 }
 0x46d   : > { %v5660_v9 = vpop.eup %4428  ;;  %v2296_v10 = vmul.f32 1.442695, %v2292_v44  ;;  %2188 = vadd.xlane.f32.xlu0 %v2187_v7  ;;  %v2183_v12 = vmul.f32 1.442695, %v2179_v5 }
 0x46e   : > { %v2300_v8 = vsel %vm2057_vm14, %v5660_v9, 0.0 }
 0x46f   : > { %2301 = vadd.xlane.f32.xlu1 %v2300_v8  ;;  %4430 = vpow2.f32 %v2296_v10 }
 0x470   : > { %v2081_v11 = vpop.xlane.xlu1 %2080 }
 0x471   : > { %4432 = vrcp.f32 %v2081_v11 }
 0x472   : > { %v2078_v13 = vpop.xlane.xlu2 %2077  ;;  %v2290_v46 = vpop.xlane.xlu0 %2289 }
 0x473   : > { %4434 = vrcp.f32 %v2078_v13  ;;  %v2293_v60 = vsub.f32 %v5622_v37, %v2290_v46 }
 0x474   : > { %4436 = vpow2.f32 %v2183_v12 }
 0x475   : > { %v5665_v14 = vpop.eup %4430 }
 0x476   : > { %v2303_v16 = vsel %vm2057_vm14, %v5665_v14, 0.0 }
 0x477   : > { %v4433_v15 = vpop.eup %4432  ;;  %2304 = vadd.xlane.f32.xlu2 %v2303_v16 }
 0x478   : > { %v2177_v18 = vpop.xlane.xlu1 %2176  ;;  %v2089_v22 = vmul.f32 %v4433_v15, %v5617_v33 }
 0x479   : > { %v4435_v17 = vpop.eup %4434  ;;  %v2180_v21 = vsub.f32 %v2168_v41, %v2177_v18 }
 0x47a   : > { %v2088_v23 = vmul.f32 %v4435_v17, %v5615_v30  ;;  %v5671_v26 = vpop.eup %4436  ;;  %v2084_v28 = vpop.xlane.xlu2 %2083 }
 0x47b   : > { %v2185_v24 = vmul.f32 1.442695, %v2180_v21  ;;  %v2190_v32 = vsel %vm2057_vm14, %v5671_v26, 0.0 }
 0x47c   : > { %v2091_v29 = vpack.c.bf16 %v2089_v22, %v2088_v23 }
 0x47d   : > { %4438 = vpow2.f32 %v2185_v24 }
 0x47e   : > { %4107 = vmatmul.msk.bf16.vlgmr.msrb.gmra.mxu2 %vm2057_vm14, %v2091_v29  ;;  %4440 = vrcp.f32 %v2084_v28 }
 0x47f   : > { %2191 = vadd.xlane.f32.xlu2 %v2190_v32 }
 0x480   : > { %v2395_v34 = vpop.xlane.xlu1 %2394 }
 0x481   : > { %v2402_v35 = vsub.f32 %v5635_v50, %v2395_v34  ;;  %2319 = vrot.lane.b32.xlu0 %v5554_v20, %s6129_s23 }
 0x483   : > { %v2405_v30 = vmul.f32 1.442695, %v2402_v35  ;;  %v5679_v33 = vpop.eup %4438 }
 0x484   : > { %v4441_v36 = vpop.eup %4440  ;;  %v2193_v38 = vsel %vm2057_vm14, %v5679_v33, 0.0 }
 0x485   : > { %4442 = vpow2.f32 %v2405_v30  ;;  %v2090_v39 = vmul.f32 %v4441_v36, %v5629_v45  ;;  %v2207_v49 = vpop.permute.xlu0 %2206 }
 0x487   : > { %2194 = vadd.xlane.f32.xlu2 %v2193_v38  ;;  %v2092_v41 = vpack.c.bf16 %v2090_v39, %v2090_v39 }
 0x488   : > { %2430 = vrot.lane.b32.xlu1 %v5554_v20, %s6131_s2 }
 0x48b   : > { %v5686_v40 = vpop.eup %4442 }
 0x48c   : > { %v2411_v43 = vsel %vm2057_vm14, %v5686_v40, 0.0 }
 0x48e   : > { %4108 = vmatmul.msk.bf16.gmra.mxu2 %vm2057_vm14, %v2092_v41 }
 0x48f   : > { %2412 = vadd.xlane.f32.xlu2 %v2411_v43 }
 0x490   : > { %v2401_v20 = vpop.xlane.xlu2 %2400 }
 0x491   : > { %v2404_v51 = vsub.f32 %v5642_v55, %v2401_v20 }
 0x493   : > { %v2409_v53 = vmul.f32 1.442695, %v2404_v51 }
 0x498   : > { %v2209_v47 = vpop.permute.xlu1 %2208 }
 0x499   : > { %v2218_v48 = vsel %vm2099_vm12, %v2209_v47, 0 }
 0x49a   : > { %2226 = vmatpush.bf16.msrb.mxu0 %v2218_v48 }
 0x49e   : > { %2227 = vmatpush.bf16.msrb.mxu0 %v2207_v49 }
 0x4a7   : > { %2317 = vrot.lane.b32.xlu2 %v5562_v27, %s6129_s23  ;;  %s6224_s23 = sld [smem:[#allocation37_spill]] }
 0x4af   : > { %2428 = vrot.lane.b32.xlu2 %v5562_v27, %s6131_s2  ;;  %v2298_v27 = vmul.f32 1.442695, %v2293_v60 }
 0x4b0   : > { %v2398_v45 = vpop.xlane.xlu0 %2397 }
 0x4b1   : > { %v2403_v50 = vsub.f32 %v5649_v59, %v2398_v45 }
 0x4b3   : > { %v2407_v52 = vmul.f32 1.442695, %v2403_v50 }
 0x4b5   : > { %4444 = vpow2.f32 %v2407_v52 }
 0x4b6   : > { %4446 = vpow2.f32 %v2409_v53 }
 0x4b7   : > { %4448 = vpow2.f32 %v2298_v27  ;;  %v5733_v27 = vld [vmem:[%s5730_s10] sm:$0xff] }
 0x4bb   : > { %v4445_v54 = vpop.eup %4444 }
 0x4bc   : > { %v2414_v56 = vsel %vm2057_vm14, %v4445_v54, 0.0  ;;  %v4447_v57 = vpop.eup %4446 }
 0x4bd   : > { %2415 = vadd.xlane.f32.xlu0 %v2414_v56  ;;  %v2417_v58 = vsel %vm2057_vm14, %v4447_v57, 0.0  ;;  %v4449_v61 = vpop.eup %4448 }
 0x4be   : > { %v2306_v59 = vsel %vm2057_vm14, %v4449_v61, 0.0 }
 0x4c5   : > { %2418 = vadd.xlane.f32.xlu0 %v2417_v58 }
 0x4d8   : > { %2307 = vadd.xlane.f32.xlu2 %v2306_v59  ;;  %v2848_v59 = vmul.f32 %v5733_v27, %v5733_v27 }
 0x4e0   : > { %v2189_v55 = vpop.xlane.xlu0 %2188 }
 0x4e1   : > { %4450 = vrcp.f32 %v2189_v55  ;;  %v2849_v55 = vsel %vm1827_vm1, %v2848_v59, 0.0 }
 0x4e2   : > { %v2302_v63 = vpop.xlane.xlu1 %2301  ;;  %2850 = vadd.xlane.f32.xlu2 %v2849_v55 }
 0x4e7   : > { %v4451_v3 = vpop.eup %4450 }
 0x4e8   : > { %v2199_v37 = vmul.f32 %v4451_v3, %v5655_v4  ;;  %v2507_v3 = vld [vmem:[%s6215_s7 + $0x8] sm:$0xff] }
 0x4ea   : > { %v2305_v62 = vpop.xlane.xlu2 %2304 }
 0x4f2   : > { %v2192_v0 = vpop.xlane.xlu2 %2191 }
 0x4f3   : > { %v2320_v1 = vpop.permute.xlu0 %2319  ;;  %4452 = vrcp.f32 %v2192_v0 }
 0x4f4   : > { %v2329_v2 = vsel %vm2099_vm12, %v2320_v1, 0  ;;  %4454 = vrcp.f32 %v2305_v62  ;;  %v2508_v62 = vld [vmem:[%s6215_s7 + $0x10] sm:$0xff]  ;;  %v2844_v1 = vsel %vm1827_vm1, %v5733_v27, 0.0 }
 0x4f5   : > { %2337 = vmatpush.bf16.msra.mxu2 %v2329_v2  ;;  %v2506_v2 = vld [vmem:[%s6215_s7] sm:$0xff] }
 0x4f9   : > { %v4453_v6 = vpop.eup %4452 }
 0x4fa   : > { %v2431_v44 = vpop.permute.xlu1 %2430  ;;  %v2200_v7 = vmul.f32 %v4453_v6, %v5671_v26  ;;  %v2195_v5 = vpop.xlane.xlu2 %2194  ;;  %v2512_v6 = vpack.c.bf16 %v2507_v3, %v2506_v2 }
 0x4fb   : > { %v2440_v10 = vsel %vm2099_vm12, %v2431_v44, 0  ;;  %4456 = vrcp.f32 %v2195_v5  ;;  %v4455_v13 = vpop.eup %4454 }
 0x4fc   : > { %2448 = vmatpush.bf16.msra.mxu0 %v2440_v10  ;;  %v2202_v8 = vpack.c.bf16 %v2200_v7, %v2199_v37  ;;  %4458 = vrcp.f32 %v2302_v63  ;;  %v2313_v4 = vmul.f32 %v4455_v13, %v5665_v14  ;;  %v2509_v63 = vld [vmem:[%s6215_s7 + $0x18] sm:$0xff]  ;;  %s6246_s7 = sld [smem:[#allocation61_spill]] }
 0x4fd   : > { %v2513_v0 = vpack.c.bf16 %v2509_v63, %v2508_v62 }
 0x4fe   : > { %4111 = vmatmul.msk.bf16.vlgmr.msrb.gmra.mxu0 %vm2057_vm14, %v2202_v8 }
 0x4ff   : > { %2530 = vmatpush.bf16.msrb.mxu1 %v2513_v0 }
 0x501   : > { %v5707_v11 = vpop.f32.mrf.mxu2  ;;  %v4457_v15 = vpop.eup %4456 }
 0x502   : > { %v2413_v12 = vpop.xlane.xlu2 %2412  ;;  %v4459_v16 = vpop.eup %4458  ;;  %v2201_v17 = vmul.f32 %v4457_v15, %v5679_v33 }
 0x503   : > { %v2312_v21 = vmul.f32 %v4459_v16, %v5660_v9  ;;  %4460 = vrcp.f32 %v2413_v12  ;;  %2531 = vmatpush.bf16.msrb.mxu1 %v2512_v6 }
 0x504   : > { %v2203_v24 = vpack.c.bf16 %v2201_v17, %v2201_v17 }
 0x505   : > { %v2315_v23 = vpack.c.bf16 %v2313_v4, %v2312_v21 }
 0x509   : > { %v5710_v18 = vpop.f32.mrf.mxu2  ;;  %v4461_v32 = vpop.eup %4460 }
 0x50a   : > { %v2318_v22 = vpop.permute.xlu2 %2317  ;;  %v2423_v9 = vmul.f32 %v4461_v32, %v5686_v40 }
 0x50b   : > { %2338 = vmatpush.bf16.msra.mxu2 %v2318_v22 }
 0x50e   : > { %4112 = vmatmul.msk.bf16.gmra.mxu0 %vm2057_vm14, %v2203_v24  ;;  %4115 = vmatmul.msk.bf16.vlgmr.msra.gmra.mxu2 %vm2057_vm14, %v2315_v23 }
 0x511   : > { %v5716_v26 = vpop.f32.mrf.mxu2 }
 0x512   : > { %v2429_v28 = vpop.permute.xlu2 %2428 }
 0x513   : > { %2449 = vmatpush.bf16.msra.mxu0 %v2429_v28 }
 0x519   : > { %v2119_v29 = vpop.f32.mrf.mxu2 }
 0x530   : > { %v2416_v14 = vpop.xlane.xlu0 %2415 }
 0x531   : > { %4462 = vrcp.f32 %v2416_v14 }
 0x537   : > { %v4463_v34 = vpop.eup %4462 }
 0x538   : > { %v2424_v35 = vmul.f32 %v4463_v34, %v4445_v54  ;;  %v2419_v33 = vpop.xlane.xlu0 %2418 }
 0x539   : > { %4464 = vrcp.f32 %v2419_v33 }
 0x53a   : > { %v2426_v30 = vpack.c.bf16 %v2424_v35, %v2423_v9  ;;  %v2878_v9 = vld [vmem:[%s6216_s22 + $0x10] sm:$0xff]  ;;  %v2879_v35 = vld [vmem:[%s6217_s11 + $0x18] sm:$0xff]  ;;  %s6222_s22 = sld [smem:[#allocation46_spill]] }
 0x53b   : > { %v2882_v33 = vpack.c.bf16 %v2879_v35, %v2878_v9 }
 0x53c   : > { %4119 = vmatmul.msk.bf16.vlgmr.msra.gmra.mxu0 %vm2057_vm14, %v2426_v30  ;;  %v2928_v30 = vld [vmem:[%s6218_s15 + $0x10] sm:$0xff] }
 0x53d   : > { %2896 = vmatpush.bf16.msrb.mxu0 %v2882_v33 }
 0x53f   : > { %v4465_v36 = vpop.eup %4464 }
 0x540   : > { %v2425_v38 = vmul.f32 %v4465_v36, %v4447_v57 }
 0x542   : > { %v2427_v39 = vpack.c.bf16 %v2425_v38, %v2425_v38 }
 0x54b   : > { %v2308_v41 = vpop.xlane.xlu2 %2307 }
 0x54c   : > { %4120 = vmatmul.msk.bf16.gmra.mxu0 %vm2057_vm14, %v2427_v39  ;;  %4466 = vrcp.f32 %v2308_v41  ;;  %v2877_v39 = vld [vmem:[%s6217_s11 + $0x8] sm:$0xff] }
 0x552   : > { %v4467_v43 = vpop.eup %4466 }
 0x553   : > { %v2314_v46 = vmul.f32 %v4467_v43, %v4449_v61 }
 0x555   : > { %v2316_v47 = vpack.c.bf16 %v2314_v46, %v2314_v46  ;;  %v2851_v43 = vpop.xlane.xlu2 %2850 }
 0x557   : > { %4116 = vmatmul.msk.bf16.gmra.mxu2 %vm2057_vm14, %v2316_v47 }
 0x57b   : > { %v2229_v48 = vpop.f32.mrf.mxu0 }
 0x583   : > { %v2231_v40 = vpop.f32.mrf.mxu0 }
 0x584   : > { %v4364_v49 = vpack.i.bf16 %v2231_v40, %v2229_v48 }
 0x586   : > { %4365 = vrot.lane.b32.xlu0 %v4364_v49, %s6127_s26 }
 0x58b   : > { %v2234_v20 = vpop.f32.mrf.mxu0 }
 0x591   : > { %v2340_v45 = vpop.f32.mrf.mxu2 }
 0x593   : > { %v2236_v50 = vpop.f32.mrf.mxu0 }
 0x599   : > { %v2342_v51 = vpop.f32.mrf.mxu2 }
 0x59a   : > { %v4369_v52 = vpack.i.bf16 %v2342_v51, %v2340_v45 }
 0x59c   : > { %4370 = vrot.lane.b32.xlu1 %v4369_v52, %s6123_s28 }
 0x5b9   : > { %v2451_v53 = vpop.f32.mrf.mxu0 }
 0x5c1   : > { %v2453_v54 = vpop.f32.mrf.mxu0 }
 0x5c2   : > { %v4374_v56 = vpack.i.bf16 %v2453_v54, %v2451_v53 }
 0x5c4   : > { %4375 = vrot.lane.b32.xlu1 %v4374_v56, %s6125_s16 }
 0x5c9   : > { %v2456_v57 = vpop.f32.mrf.mxu0 }
 0x5cc   : > { %2467 = vrot.lane.b32.xlu1 %v2234_v20, %s6127_s26  ;;  %v2852_v20 = vmul.f32 %v2851_v43, %v5512_v42 }
 0x5d1   : > { %v2458_v58 = vpop.f32.mrf.mxu0 }
 0x5d4   : > { %2491 = vrot.lane.b32.xlu1 %v2456_v57, %s6125_s16  ;;  %s6220_s16 = sld [smem:[#allocation50_spill]] }
 0x5da   : > { %v2345_v60 = vpop.f32.mrf.mxu2  ;;  %s6221_s26 = smov %s6220_s16  ;;  %v2905_v50 = vld [vmem:[%s6220_s16 + $0x10] sm:$0xff]  ;;  %s6225_s16 = sld [smem:[#allocation42_spill]] }
 0x5db   : > { %2479 = vrot.lane.b32.xlu0 %v2345_v60, %s6123_s28  ;;  %s6219_s28 = smov %s6218_s15  ;;  %v2906_v51 = vld [vmem:[%s6221_s26 + $0x18] sm:$0xff]  ;;  %v2903_v52 = vld [vmem:[%s6221_s26] sm:$0xff]  ;;  %v2904_v54 = vld [vmem:[%s6221_s26 + $0x8] sm:$0xff]  ;;  %s6223_s15 = sld [smem:[#allocation47_spill]] }
 0x5dc   : > { %v2929_v36 = vld [vmem:[%s6219_s28 + $0x18] sm:$0xff]  ;;  %v2926_v41 = vld [vmem:[%s6219_s28] sm:$0xff]  ;;  %v2927_v47 = vld [vmem:[%s6219_s28 + $0x8] sm:$0xff]  ;;  %v2908_v53 = vpack.c.bf16 %v2906_v51, %v2905_v50  ;;  %v2907_v57 = vpack.c.bf16 %v2904_v54, %v2903_v52 }
 0x5dd   : > { %v2931_v38 = vpack.c.bf16 %v2929_v36, %v2928_v30  ;;  %v2930_v48 = vpack.c.bf16 %v2927_v47, %v2926_v41 }
 0x5df   : > { %2942 = vmatpush.bf16.msra.mxu1 %v2931_v38 }
 0x5e0   : > { %s6226_s2 = smov %s6225_s16 }
 0x5e1   : > { %v4386_v6 = vld [vmem:[%s6223_s15] ss:$0 sm:$0xff]  ;;  %v2696_v33 = vld [vmem:[%s6226_s2 + $0x10] sm:$0xff]  ;;  %v2697_v36 = vld [vmem:[%s6226_s2 + $0x18] sm:$0xff]  ;;  %s6229_s15 = sld [smem:[#allocation53_spill]] }
 0x5e2   : > { %v2347_v61 = vpop.f32.mrf.mxu2  ;;  %v2694_v38 = vld [vmem:[%s6226_s2] sm:$0xff] }
 0x5e3   : > { %2943 = vmatpush.bf16.msra.mxu1 %v2930_v48 }
 0x5f8   : > { %v4366_v37 = vpop.permute.xlu0 %4365 }
 0x5f9   : > { %v4368_v7 = vunpack.i.h.bf16 %v4366_v37  ;;  %v4367_v10 = vunpack.i.l.bf16 %v4366_v37 }
 0x5fb   : > { %v2497_v13 = vsel %vm2017_vm13, %v5710_v18, %v4368_v7  ;;  %v2496_v15 = vsel %vm2017_vm13, %v5707_v11, %v4367_v10  ;;  %v4387_v10 = vld [vmem:[%s6224_s23] ss:$0 sm:$0xff]  ;;  %s6227_s23 = sld [smem:[#allocation40_spill]] }
 0x601   : > { %v2633_v41 = vld [vmem:[%s6227_s23 + $0x10] sm:$0xff]  ;;  %v2634_v43 = vld [vmem:[%s6227_s23 + $0x18] sm:$0xff]  ;;  %v2631_v47 = vld [vmem:[%s6227_s23] sm:$0xff] }
 0x602   : > { %v2632_v48 = vld [vmem:[%s6227_s23 + $0x8] sm:$0xff] }
 0x605   : > { %2845 = vadd.xlane.f32.xlu0 %v2844_v1  ;;  %v4385_v1 = vld [vmem:[%s6222_s22] ss:$0 sm:$0xff]  ;;  %s6228_s22 = sld [smem:[#allocation49_spill]] }
 0x60e   : > { %v4371_v44 = vpop.permute.xlu1 %4370 }
 0x60f   : > { %v4373_v5 = vunpack.i.h.bf16 %v4371_v44  ;;  %v4372_v8 = vunpack.i.l.bf16 %v4371_v44 }
 0x611   : > { %v2500_v17 = vsel %vm2499_vm15, %v2496_v15, %v4372_v8  ;;  %v2501_v21 = vsel %vm2499_vm15, %v2497_v13, %v4373_v5  ;;  %v2700_v8 = vld [vmem:[%s6225_s16 + $0x30] sm:$0xff]  ;;  %s6230_s16 = sld [smem:[#allocation51_spill]] }
 0x636   : > { %v4376_v12 = vpop.permute.xlu1 %4375 }
 0x637   : > { %v4378_v16 = vunpack.i.h.bf16 %v4376_v12  ;;  %v4377_v4 = vunpack.i.l.bf16 %v4376_v12  ;;  %v2698_v12 = vld [vmem:[%s6226_s2 + $0x20] sm:$0xff] }
 0x639   : > { %v2503_v22 = vsel %vm2057_vm14, %v2500_v17, %v4377_v4  ;;  %v2504_v23 = vsel %vm2057_vm14, %v2501_v21, %v4378_v16  ;;  %v2699_v16 = vld [vmem:[%s6226_s2 + $0x28] sm:$0xff] }
 0x63a   : > { %v2510_v24 = vpack.c.bf16 %v2504_v23, %v2503_v22  ;;  %v2706_v17 = vpack.c.bf16 %v2699_v16, %v2698_v12 }
 0x63c   : > { %4121 = vmatmul.msk.bf16.vlgmr.msrb.gmra.mxu1 %vm1827_vm1, %v2510_v24 }
 0x63e   : > { %v2468_v18 = vpop.permute.xlu1 %2467 }
 0x63f   : > { %v2498_v11 = vsel %vm2017_vm13, %v5716_v26, %v2468_v18  ;;  %v2876_v26 = vld [vmem:[%s6217_s11] sm:$0xff] }
 0x640   : > { %v2881_v46 = vpack.c.bf16 %v2877_v39, %v2876_v26  ;;  %v2695_v26 = vld [vmem:[%s6226_s2 + $0x8] sm:$0xff] }
 0x641   : > { %v2704_v39 = vpack.c.bf16 %v2695_v26, %v2694_v38 }
 0x642   : > { %2897 = vmatpush.bf16.msrb.mxu0 %v2881_v46  ;;  %v2638_v46 = vpack.c.bf16 %v2634_v43, %v2633_v41 }
 0x644   : > { %2655 = vmatpush.bf16.msrb.mxu2 %v2638_v46 }
 0x646   : > { %v2492_v29 = vpop.permute.xlu1 %2491  ;;  %2919 = vmatpush.bf16.msra.mxu0 %v2908_v53 }
 0x64a   : > { %2920 = vmatpush.bf16.msra.mxu0 %v2907_v57 }
 0x64d   : > { %v2480_v28 = vpop.permute.xlu0 %2479 }
 0x64e   : > { %v2502_v14 = vsel %vm2499_vm15, %v2498_v11, %v2480_v28 }
 0x64f   : > { %v2505_v32 = vsel %vm2057_vm14, %v2502_v14, %v2492_v29 }
 0x650   : > { %v2511_v34 = vpack.c.bf16 %v2505_v32, %v2505_v32 }
 0x652   : > { %4122 = vmatmul.msk.bf16.gmra.mxu1 %vm1827_vm1, %v2511_v34 }
 0x678   : > { %v2846_v40 = vpop.xlane.xlu0 %2845 }
 0x679   : > { %v2847_v49 = vmul.f32 %v2846_v40, %v5512_v42  ;;  %v2637_v40 = vpack.c.bf16 %v2632_v48, %v2631_v47 }
 0x67b   : > { %v2853_v45 = vmul.f32 %v2847_v49, %v2847_v49  ;;  %v2855_v0 = vsub.f32 %v5733_v27, %v2847_v49  ;;  %v2701_v27 = vld [vmem:[%s6226_s2 + $0x38] sm:$0xff]  ;;  %2656 = vmatpush.bf16.msrb.mxu2 %v2637_v40  ;;  %v4388_v49 = vld [vmem:[%s6228_s22] ss:$0 sm:$0xff]  ;;  %s6231_s22 = smov 104  }
 0x67c   : > { %v2707_v15 = vpack.c.bf16 %v2701_v27, %v2700_v8 }
 0x67d   : > { %v2854_v56 = vsub.f32 %v2852_v20, %v2853_v45  ;;  %v4389_v20 = vld [vmem:[%s6229_s15] ss:$0 sm:$0xff]  ;;  %s6232_s15 = smov 112  }
 0x67e   : > { %2718 = vmatpush.bf16.msrb.mxu3 %v2707_v15 }
 0x67f   : > { %v2856_v58 = vadd.f32 1e-05, %v2854_v56 }
 0x681   : > { %4468 = vrsqrt.f32 %v2856_v58  ;;  %vm2863_vm3 = vweird.f32 %v2856_v58 }
 0x682   : > { %2719 = vmatpush.bf16.msrb.mxu3 %v2706_v17 }
 0x687   : > { %v4469_v60 = vpop.eup %4468 }
 0x688   : > { %v2858_v61 = vmul.f32 %v4469_v60, %v2856_v58  ;;  %vm2864_vm2 = vweird.f32 %v4469_v60 }
 0x689   : > { %vm2865_vm4 = vmor %vm2863_vm3, %vm2864_vm2 }
 0x68a   : > { %v2859_v59 = vmul.f32 %v4469_v60, %v2858_v61 }
 0x68c   : > { %v2860_v55 = vmul.f32 0.5, %v2859_v59 }
 0x68e   : > { %v2861_v62 = vsub.f32 1.5, %v2860_v55 }
 0x690   : > { %v2862_v63 = vmul.f32 %v4469_v60, %v2861_v62 }
 0x692   : > { %v2866_v2 = vsel %vm2865_vm4, %v4469_v60, %v2862_v63  ;;  %v4390_v60 = vld [vmem:[%s6230_s16] ss:$0 sm:$0xff]  ;;  %s6233_s16 = sld [smem:[#allocation38_spill]] }
 0x693   : > { %v2867_v3 = vmul.f32 %v2866_v2, %v2855_v0 }
 0x695   : > { %v2871_v44 = vmul.f32 %v4385_v1, %v2867_v3 }
 0x697   : > { %v2875_v37 = vadd.f32 %v4386_v6, %v2871_v44 }
 0x698   : > { %v4391_v38 = vld [vmem:[%s6233_s16] ss:$0 sm:$0xff]  ;;  %s6235_s16 = sld [smem:[#allocation29_spill]] }
 0x699   : > { %v2880_v7 = vpack.c.bf16 %v2875_v37, %v2875_v37 }
 0x69b   : > { %4128 = vmatmul.msk.bf16.vlgmr.msrb.gmra.mxu0 %vm1827_vm1, %v2880_v7  ;;  %4130 = vmatmul.msk.bf16.vlgmr.msra.gmra.mxu1 %vm1827_vm1, %v2880_v7 }
 0x69e   : > { %s1777_s3 = scalar_lea.vmem %s6235_s16, %s5474_s18  ;;  %s6239_s18 = sld [smem:[#allocation43_spill]] }
 0x69f   : > { %s6240_s16 = smov 8  }
 0x6ab   : > { %4129 = vmatmul.msk.bf16.vlgmr.msra.gmra.mxu0 %vm1827_vm1, %v2880_v7 }
 0x6b9   : > { %v2533_v5 = vpop.f32.mrf.mxu1 }
 0x6ba   : > { %v2534_v13 = vadd.f32 %v4387_v10, %v2533_v5 }
 0x6bc   : > { %v5784_v4 = vadd.f32 %v2534_v13, %v5489_v19 }
 0x6be   : > { %v2547_v21 = vsel %vm1827_vm1, %v5784_v4, 0.0  ;;  %v2559_v22 = vmul.f32 %v5784_v4, %v5784_v4 }
 0x6bf   : > { %2548 = vadd.xlane.f32.xlu1 %v2547_v21 }
 0x6c0   : > { %v2562_v23 = vsel %vm1827_vm1, %v2559_v22, 0.0 }
 0x6c1   : > { %v2535_v24 = vpop.f32.mrf.mxu1  ;;  %2563 = vadd.xlane.f32.xlu2 %v2562_v23 }
 0x6c2   : > { %v2536_v18 = vadd.f32 %v4387_v10, %v2535_v24 }
 0x6c4   : > { %v5792_v11 = vadd.f32 %v2536_v18, %v5497_v25 }
 0x6c6   : > { %v2550_v19 = vsel %vm1827_vm1, %v5792_v11, 0.0  ;;  %v2560_v28 = vmul.f32 %v5792_v11, %v5792_v11 }
 0x6c8   : > { %v2565_v14 = vsel %vm1827_vm1, %v2560_v28, 0.0 }
 0x6c9   : > { %2551 = vadd.xlane.f32.xlu2 %v2550_v19 }
 0x6cf   : > { %v2538_v29 = vpop.f32.mrf.mxu1 }
 0x6d0   : > { %v2539_v32 = vadd.f32 %v4387_v10, %v2538_v29 }
 0x6d1   : > { %2566 = vadd.xlane.f32.xlu2 %v2565_v14 }
 0x6d2   : > { %v5800_v34 = vadd.f32 %v2539_v32, %v5505_v31  ;;  %v2705_v31 = vpack.c.bf16 %v2697_v36, %v2696_v33 }
 0x6d4   : > { %v2561_v25 = vmul.f32 %v5800_v34, %v5800_v34  ;;  %v2553_v30 = vsel %vm1827_vm1, %v5800_v34, 0.0  ;;  %2720 = vmatpush.bf16.msrb.mxu3 %v2705_v31 }
 0x6d6   : > { %v2568_v9 = vsel %vm1827_vm1, %v2561_v25, 0.0 }
 0x6d7   : > { %v2540_v35 = vpop.f32.mrf.mxu1  ;;  %2569 = vadd.xlane.f32.xlu0 %v2568_v9 }
 0x6d8   : > { %2721 = vmatpush.bf16.msrb.mxu3 %v2704_v39 }
 0x6d9   : > { %2554 = vadd.xlane.f32.xlu2 %v2553_v30 }
 0x718   : > { %v2899_v45 = vpop.f32.mrf.mxu0  ;;  %v2945_v50 = vpop.f32.mrf.mxu1 }
 0x719   : > { %v2900_v51 = vadd.f32 %v4388_v49, %v2899_v45  ;;  %v2946_v52 = vadd.f32 %v4389_v20, %v2945_v50 }
 0x71b   : > { %v5817_v53 = vpack.c.bf16 %v2900_v51, %v2900_v51  ;;  %v5819_v54 = vpack.c.bf16 %v2946_v52, %v2946_v52 }
 0x71d   : > { %3005 = vrot.lane.b32.xlu0 %v5817_v53, %s6133_s29  ;;  %v2989_v56 = vsel %vm2099_vm12, %v5819_v54, 0 }
 0x71e   : > { %2998 = vmatpush.bf16.msra.mxu3 %v2989_v56 }
 0x720   : > { %v2901_v57 = vpop.f32.mrf.mxu0  ;;  %v2947_v58 = vpop.f32.mrf.mxu1 }
 0x728   : > { %v2922_v61 = vpop.f32.mrf.mxu0 }
 0x729   : > { %v2923_v59 = vadd.f32 %v4390_v60, %v2922_v61 }
 0x72b   : > { %v2950_v55 = vpack.c.bf16 %v2923_v59, %v2923_v59 }
 0x72d   : > { %3125 = vrot.lane.b32.xlu0 %v2950_v55, %s6231_s22  ;;  %3008 = vrot.lane.b32.xlu2 %v2950_v55, %s6133_s29  ;;  %v2956_v62 = vsel %vm2017_vm13, %v2950_v55, 0  ;;  %s6234_s29 = sld [smem:[#allocation39_spill]] }
 0x72e   : > { %3067 = vrot.lane.b32.xlu1 %v2950_v55, %s6232_s15  ;;  %2965 = vmatpush.bf16.xpose.msra.mxu2 %v2956_v62 }
 0x730   : > { %v2924_v63 = vpop.f32.mrf.mxu0 }
 0x732   : > { %v2549_v0 = vpop.xlane.xlu1 %2548 }
 0x733   : > { %v2556_v1 = vmul.f32 %v2549_v0, %v5512_v42  ;;  %v4392_v49 = vld [vmem:[%s6234_s29] ss:$0 sm:$0xff]  ;;  %s6237_s29 = sld [smem:[#allocation41_spill]] }
 0x734   : > { %v2564_v2 = vpop.xlane.xlu2 %2563 }
 0x735   : > { %v2574_v3 = vmul.f32 %v2556_v1, %v2556_v1  ;;  %v2571_v6 = vmul.f32 %v2564_v2, %v5512_v42  ;;  %3065 = vrot.lane.b32.xlu2 %v5817_v53, %s6232_s15  ;;  %v2580_v36 = vsub.f32 %v5784_v4, %v2556_v1 }
 0x736   : > { %3123 = vrot.lane.b32.xlu1 %v5817_v53, %s6231_s22 }
 0x737   : > { %v2577_v44 = vsub.f32 %v2571_v6, %v2574_v3 }
 0x739   : > { %v2583_v37 = vadd.f32 1e-05, %v2577_v44 }
 0x73b   : > { %4470 = vrsqrt.f32 %v2583_v37  ;;  %vm2592_vm6 = vweird.f32 %v2583_v37 }
 0x73c   : > { %v2552_v7 = vpop.xlane.xlu2 %2551 }
 0x73d   : > { %v2557_v5 = vmul.f32 %v2552_v7, %v5512_v42 }
 0x73f   : > { %v2575_v12 = vmul.f32 %v2557_v5, %v2557_v5  ;;  %v2581_v43 = vsub.f32 %v5792_v11, %v2557_v5 }
 0x741   : > { %v4471_v10 = vpop.eup %4470 }
 0x742   : > { %v2587_v8 = vmul.f32 %v4471_v10, %v2583_v37  ;;  %vm2593_vm5 = vweird.f32 %v4471_v10 }
 0x743   : > { %vm2594_vm7 = vmor %vm2592_vm6, %vm2593_vm5 }
 0x744   : > { %v2567_v27 = vpop.xlane.xlu2 %2566  ;;  %v2588_v15 = vmul.f32 %v4471_v10, %v2587_v8 }
 0x745   : > { %v2572_v13 = vmul.f32 %v2567_v27, %v5512_v42 }
 0x746   : > { %v2589_v21 = vmul.f32 0.5, %v2588_v15 }
 0x747   : > { %v2578_v16 = vsub.f32 %v2572_v13, %v2575_v12 }
 0x748   : > { %v2590_v18 = vsub.f32 1.5, %v2589_v21 }
 0x749   : > { %v2584_v17 = vadd.f32 1e-05, %v2578_v16 }
 0x74a   : > { %v2570_v22 = vpop.xlane.xlu0 %2569  ;;  %v2591_v32 = vmul.f32 %v4471_v10, %v2590_v18 }
 0x74b   : > { %4472 = vrsqrt.f32 %v2584_v17  ;;  %v2573_v19 = vmul.f32 %v2570_v22, %v5512_v42  ;;  %vm2602_vm9 = vweird.f32 %v2584_v17  ;;  %v2829_v22 = vlaneseq }
 0x74c   : > { %v2555_v23 = vpop.xlane.xlu2 %2554  ;;  %v2595_v30 = vsel %vm2594_vm7, %v4471_v10, %v2591_v32 }
 0x74d   : > { %v2558_v24 = vmul.f32 %v2555_v23, %v5512_v42  ;;  %v2616_v26 = vmul.f32 %v2595_v30, %v2580_v36  ;;  %v2832_v32 = vand.u32 127, %v2829_v22 }
 0x74f   : > { %v2576_v28 = vmul.f32 %v2558_v24, %v2558_v24  ;;  %v2622_v48 = vmul.f32 %v4391_v38, %v2616_v26  ;;  %v2582_v60 = vsub.f32 %v5800_v34, %v2558_v24 }
 0x751   : > { %v4473_v29 = vpop.eup %4472  ;;  %v2579_v14 = vsub.f32 %v2573_v19, %v2576_v28  ;;  %v2628_v51 = vadd.f32 %v4392_v49, %v2622_v48  ;;  %v2830_v28 = vshrl.u32 %v2829_v22, 7 }
 0x752   : > { %v2597_v25 = vmul.f32 %v4473_v29, %v2584_v17  ;;  %vm2603_vm8 = vweird.f32 %v4473_v29 }
 0x753   : > { %v2585_v9 = vadd.f32 1e-05, %v2579_v14  ;;  %vm2604_vm10 = vmor %vm2602_vm9, %vm2603_vm8  ;;  %vm2833_vm4 = vcmp.gt.s32.totalorder %v2832_v32, %v2830_v28 }
 0x754   : > { %v2598_v35 = vmul.f32 %v4473_v29, %v2597_v25 }
 0x755   : > { %4474 = vrsqrt.f32 %v2585_v9  ;;  %vm2612_vm2 = vweird.f32 %v2585_v9 }
 0x756   : > { %v2599_v33 = vmul.f32 0.5, %v2598_v35 }
 0x758   : > { %v2600_v31 = vsub.f32 1.5, %v2599_v33 }
 0x75a   : > { %v2601_v39 = vmul.f32 %v4473_v29, %v2600_v31  ;;  %v4989_v31 = vmov 0.0  }
 0x75b   : > { %v4475_v41 = vpop.eup %4474 }
 0x75c   : > { %v2605_v46 = vsel %vm2604_vm10, %v4473_v29, %v2601_v39  ;;  %v2607_v47 = vmul.f32 %v4475_v41, %v2585_v9  ;;  %vm2613_vm11 = vweird.f32 %v4475_v41 }
 0x75d   : > { %v2617_v40 = vmul.f32 %v2605_v46, %v2581_v43  ;;  %vm2614_vm3 = vmor %vm2612_vm2, %vm2613_vm11  ;;  %v4394_v46 = vld [vmem:[%s1777_s3] ss:$0 sm:$0xff]  ;;  %s6238_s3 = smov 120  }
 0x75e   : > { %v2608_v20 = vmul.f32 %v4475_v41, %v2607_v47 }
 0x75f   : > { %v2623_v45 = vmul.f32 %v4391_v38, %v2617_v40 }
 0x760   : > { %v2609_v50 = vmul.f32 0.5, %v2608_v20 }
 0x761   : > { %v2629_v52 = vadd.f32 %v4392_v49, %v2623_v45 }
 0x762   : > { %v2610_v56 = vsub.f32 1.5, %v2609_v50 }
 0x763   : > { %v2635_v57 = vpack.c.bf16 %v2629_v52, %v2628_v51 }
 0x764   : > { %v2611_v58 = vmul.f32 %v4475_v41, %v2610_v56 }
 0x765   : > { %4123 = vmatmul.msk.bf16.vlgmr.msrb.gmra.mxu2 %vm1827_vm1, %v2635_v57 }
 0x766   : > { %v2615_v61 = vsel %vm2614_vm3, %v4475_v41, %v2611_v58 }
 0x767   : > { %v2618_v59 = vmul.f32 %v2615_v61, %v2582_v60 }
 0x769   : > { %v2624_v55 = vmul.f32 %v4391_v38, %v2618_v59  ;;  %v4127_v38 = vsel %vm2833_vm4, 1.0, %v4989_v31 }
 0x76a   : > { %v2836_v43 = vmul.f32 -1e+09, %v4127_v38 }
 0x76b   : > { %v2630_v62 = vadd.f32 %v4392_v49, %v2624_v55 }
 0x76c   : > { %v2841_v50 = vadd.f32 %v4394_v46, %v2836_v43 }
 0x76d   : > { %v2636_v63 = vpack.c.bf16 %v2630_v62, %v2630_v62 }
 0x775   : > { %4124 = vmatmul.msk.bf16.gmra.mxu2 %vm1827_vm1, %v2636_v63 }
 0x785   : > { %4131 = vmatmul.msk.bf16.vlgmr.msra.gmra.mxu2 %vm2017_vm13, %v5817_v53  ;;  %v4393_v53 = vld [vmem:[%s6237_s29] ss:$0 sm:$0xff]  ;;  %s6241_s29 = smov 24  }
 0x787   : > { %v3009_v0 = vpop.permute.xlu2 %3008 }
 0x788   : > { %v3014_v1 = vsel %vm2017_vm13, %v3009_v0, 0 }
 0x789   : > { %3023 = vmatpush.bf16.xpose.msrb.mxu0 %v3014_v1 }
 0x78f   : > { %v3006_v2 = vpop.permute.xlu0 %3005  ;;  %v3066_v7 = vpop.permute.xlu2 %3065 }
 0x790   : > { %4133 = vmatmul.msk.bf16.vlgmr.msrb.gmra.mxu0 %vm2017_vm13, %v3006_v2 }
 0x79f   : > { %v3126_v3 = vpop.permute.xlu0 %3125 }
 0x7a0   : > { %v3131_v6 = vsel %vm2017_vm13, %v3126_v3, 0  ;;  %v3068_v44 = vpop.permute.xlu1 %3067 }
 0x7a1   : > { %v3073_v37 = vsel %vm2017_vm13, %v3068_v44, 0  ;;  %3140 = vmatpush.bf16.xpose.msra.mxu0 %v3131_v6 }
 0x7a2   : > { %3082 = vmatpush.bf16.xpose.msrb.mxu2 %v3073_v37 }
 0x7a8   : > { %v3124_v10 = vpop.permute.xlu1 %3123 }
 0x7a9   : > { %4135 = vmatmul.msk.bf16.vlgmr.msrb.gmra.mxu2 %vm2017_vm13, %v3066_v7  ;;  %4137 = vmatmul.msk.bf16.vlgmr.msra.gmra.mxu0 %vm2017_vm13, %v3124_v10 }
 0x7e8   : > { %v2658_v5 = vpop.f32.mrf.mxu2 }
 0x7e9   : > { %v2659_v8 = vadd.f32 %v4393_v53, %v2658_v5 }
 0x7eb   : > { %v2670_v27 = vmul.f32 0.044715, %v2659_v8  ;;  %v2667_v48 = vmul.f32 0.5, %v2659_v8 }
 0x7ed   : > { %v2673_v12 = vmul.f32 %v2670_v27, %v2659_v8 }
 0x7ef   : > { %v2676_v13 = vmul.f32 %v2673_v12, %v2659_v8 }
 0x7f0   : > { %v2660_v15 = vpop.f32.mrf.mxu2 }
 0x7f1   : > { %v2679_v16 = vadd.f32 %v2676_v13, %v2659_v8  ;;  %v2661_v17 = vadd.f32 %v4393_v53, %v2660_v15 }
 0x7f3   : > { %v2671_v21 = vmul.f32 0.044715, %v2661_v17  ;;  %v2682_v23 = vmul.f32 0.7978846, %v2679_v16  ;;  %v2668_v40 = vmul.f32 0.5, %v2661_v17 }
 0x7f5   : > { %v2674_v24 = vmul.f32 %v2671_v21, %v2661_v17  ;;  %4476 = vtanh.f32 %v2682_v23 }
 0x7f7   : > { %v2677_v18 = vmul.f32 %v2674_v24, %v2661_v17 }
 0x7f8   : > { %v2663_v19 = vpop.f32.mrf.mxu2 }
 0x7f9   : > { %v2680_v29 = vadd.f32 %v2677_v18, %v2661_v17  ;;  %v2664_v14 = vadd.f32 %v4393_v53, %v2663_v19 }
 0x7fb   : > { %v2683_v25 = vmul.f32 0.7978846, %v2680_v29  ;;  %v2672_v9 = vmul.f32 0.044715, %v2664_v14  ;;  %v4477_v30 = vpop.eup %4476  ;;  %v2669_v0 = vmul.f32 0.5, %v2664_v14 }
 0x7fc   : > { %v2688_v39 = vadd.f32 1.0, %v4477_v30 }
 0x7fd   : > { %4478 = vtanh.f32 %v2683_v25  ;;  %v2675_v35 = vmul.f32 %v2672_v9, %v2664_v14  ;;  %v4395_v25 = vld [vmem:[%s6239_s18] ss:$0 sm:$0xff]  ;;  %s6242_s18 = sld [smem:[#allocation54_spill]] }
 0x7fe   : > { %v2691_v20 = vmul.f32 %v2688_v39, %v2667_v48 }
 0x7ff   : > { %v2678_v33 = vmul.f32 %v2675_v35, %v2664_v14 }
 0x800   : > { %v2665_v36 = vpop.f32.mrf.mxu2 }
 0x801   : > { %v2681_v26 = vadd.f32 %v2678_v33, %v2664_v14 }
 0x803   : > { %v4479_v41 = vpop.eup %4478  ;;  %v2684_v47 = vmul.f32 0.7978846, %v2681_v26  ;;  %s6243_s2 = smov %s6242_s18 }
 0x804   : > { %v2689_v49 = vadd.f32 1.0, %v4479_v41 }
 0x805   : > { %4480 = vtanh.f32 %v2684_v47 }
 0x806   : > { %v2692_v45 = vmul.f32 %v2689_v49, %v2668_v40 }
 0x808   : > { %v2967_v51 = vpop.f32.mrf.mxu2  ;;  %v2702_v52 = vpack.c.bf16 %v2692_v45, %v2691_v20 }
 0x809   : > { %v2971_v56 = vmul.f32 0.35355338, %v2967_v51 }
 0x80a   : > { %4125 = vmatmul.msk.bf16.vlgmr.msrb.gmra.mxu3 %vm1800_vm0, %v2702_v52 }
 0x80b   : > { %v2972_v57 = vadd.f32 %v2971_v56, %v2841_v50  ;;  %v4481_v58 = vpop.eup %4480 }
 0x80c   : > { %v2690_v62 = vadd.f32 1.0, %v4481_v58 }
 0x80d   : > { %v2973_v60 = vsel %vm2017_vm13, %v2972_v57, -inf  ;;  %v3025_v61 = vpop.f32.mrf.mxu0 }
 0x80e   : > { %2974 = vmax.xlane.f32.xlu2 %v2973_v60  ;;  %v3029_v59 = vmul.f32 0.35355338, %v3025_v61  ;;  %v2693_v2 = vmul.f32 %v2690_v62, %v2669_v0 }
 0x810   : > { %v2969_v55 = vpop.f32.mrf.mxu2  ;;  %v3030_v63 = vadd.f32 %v3029_v59, %v2841_v50  ;;  %v2703_v6 = vpack.c.bf16 %v2693_v2, %v2693_v2 }
 0x812   : > { %v3031_v1 = vsel %vm2017_vm13, %v3030_v63, -inf }
 0x813   : > { %3032 = vmax.xlane.f32.xlu0 %v3031_v1 }
 0x815   : > { %v3027_v3 = vpop.f32.mrf.mxu0 }
 0x81a   : > { %4126 = vmatmul.msk.bf16.gmra.mxu3 %vm1800_vm0, %v2703_v6 }
 0x826   : > { %v3142_v44 = vpop.f32.mrf.mxu0 }
 0x827   : > { %v3146_v37 = vmul.f32 0.35355338, %v3142_v44 }
 0x829   : > { %v3147_v7 = vadd.f32 %v3146_v37, %v2841_v50 }
 0x82b   : > { %v3148_v10 = vsel %vm2017_vm13, %v3147_v7, -inf }
 0x82c   : > { %v3084_v53 = vpop.f32.mrf.mxu2  ;;  %3149 = vmax.xlane.f32.xlu2 %v3148_v10 }
 0x82d   : > { %v3088_v5 = vmul.f32 0.35355338, %v3084_v53 }
 0x82e   : > { %v3144_v8 = vpop.f32.mrf.mxu0 }
 0x82f   : > { %v3089_v27 = vadd.f32 %v3088_v5, %v2841_v50 }
 0x831   : > { %v3090_v12 = vsel %vm2017_vm13, %v3089_v27, -inf }
 0x832   : > { %3091 = vmax.xlane.f32.xlu1 %v3090_v12 }
 0x834   : > { %v3086_v13 = vpop.f32.mrf.mxu2 }
 0x84b   : > { %3044 = vrot.lane.b32.xlu1 %v5819_v54, %s6238_s3 }
 0x881   : > { %v2975_v15 = vpop.xlane.xlu2 %2974 }
 0x882   : > { %v2976_v16 = vsub.f32 %v2972_v57, %v2975_v15 }
 0x884   : > { %v2977_v17 = vmul.f32 1.442695, %v2976_v16 }
 0x886   : > { %4482 = vpow2.f32 %v2977_v17  ;;  %v3033_v21 = vpop.xlane.xlu0 %3032 }
 0x887   : > { %v3034_v22 = vsub.f32 %v3030_v63, %v3033_v21 }
 0x889   : > { %v3035_v23 = vmul.f32 1.442695, %v3034_v22 }
 0x88b   : > { %4484 = vpow2.f32 %v3035_v23 }
 0x88c   : > { %v4483_v24 = vpop.eup %4482 }
 0x88d   : > { %v2723_v18 = vpop.f32.mrf.mxu3  ;;  %v2979_v19 = vsel %vm2017_vm13, %v4483_v24, 0.0 }
 0x88e   : > { %2980 = vadd.xlane.f32.xlu0 %v2979_v19  ;;  %v2732_v40 = vadd.f32 %v2723_v18, %v5784_v4  ;;  %v3198_v18 = vld [vmem:[%s6242_s18 + $0x10] sm:$0xff]  ;;  %v3199_v19 = vld [vmem:[%s6243_s2 + $0x18] sm:$0xff]  ;;  %s6247_s18 = sld [smem:[#allocation44_spill]] }
 0x890   : > { %v5883_v49 = vadd.f32 %v4395_v25, %v2732_v40  ;;  %v3288_v40 = vld [vmem:[%s6245_s5 + $0x18] sm:$0xff] }
 0x891   : > { %v4485_v28 = vpop.eup %4484 }
 0x892   : > { %v3037_v29 = vsel %vm2017_vm13, %v4485_v28, 0.0  ;;  %v2744_v50 = vsel %vm1827_vm1, %v5883_v49, 0.0  ;;  %v2756_v16 = vmul.f32 %v5883_v49, %v5883_v49 }
 0x893   : > { %3038 = vadd.xlane.f32.xlu2 %v3037_v29  ;;  %v3196_v29 = vld [vmem:[%s6243_s2] sm:$0xff] }
 0x894   : > { %v2759_v17 = vsel %vm1827_vm1, %v2756_v16, 0.0 }
 0x895   : > { %v2725_v14 = vpop.f32.mrf.mxu3 }
 0x896   : > { %v2733_v20 = vadd.f32 %v2725_v14, %v5792_v11  ;;  %v3197_v14 = vld [vmem:[%s6243_s2 + $0x8] sm:$0xff]  ;;  %s6248_s2 = sld [smem:[#allocation45_spill]] }
 0x898   : > { %v5886_v45 = vadd.f32 %v4395_v25, %v2733_v20  ;;  %v3323_v20 = vld [vmem:[%s6246_s7 + $0x10] sm:$0xff] }
 0x89a   : > { %v2757_v51 = vmul.f32 %v5886_v45, %v5886_v45  ;;  %v2747_v23 = vsel %vm1827_vm1, %v5886_v45, 0.0 }
 0x89c   : > { %v2762_v52 = vsel %vm1827_vm1, %v2757_v51, 0.0  ;;  %v3324_v51 = vld [vmem:[%s6246_s7 + $0x18] sm:$0xff] }
 0x89d   : > { %v2728_v32 = vpop.f32.mrf.mxu3 }
 0x89e   : > { %v2734_v9 = vadd.f32 %v2728_v32, %v5800_v34  ;;  %v3201_v32 = vpack.c.bf16 %v3197_v14, %v3196_v29 }
 0x89f   : > { %v3150_v30 = vpop.xlane.xlu2 %3149 }
 0x8a0   : > { %v5873_v35 = vadd.f32 %v4395_v25, %v2734_v9  ;;  %v3151_v33 = vsub.f32 %v3147_v7, %v3150_v30 }
 0x8a2   : > { %v3152_v36 = vmul.f32 1.442695, %v3151_v33  ;;  %v2758_v21 = vmul.f32 %v5873_v35, %v5873_v35 }
 0x8a4   : > { %4486 = vpow2.f32 %v3152_v36  ;;  %v2765_v22 = vsel %vm1827_vm1, %v2758_v21, 0.0 }
 0x8a5   : > { %v2730_v31 = vpop.f32.mrf.mxu3  ;;  %v3092_v38 = vpop.xlane.xlu1 %3091 }
 0x8a6   : > { %v3093_v26 = vsub.f32 %v3089_v27, %v3092_v38 }
 0x8a8   : > { %v3094_v39 = vmul.f32 1.442695, %v3093_v26 }
 0x8aa   : > { %v4487_v41 = vpop.eup %4486  ;;  %4488 = vpow2.f32 %v3094_v39 }
 0x8ab   : > { %v3154_v43 = vsel %vm2017_vm13, %v4487_v41, 0.0 }
 0x8ac   : > { %3155 = vadd.xlane.f32.xlu2 %v3154_v43 }
 0x8b0   : > { %v4489_v46 = vpop.eup %4488 }
 0x8b1   : > { %v3096_v47 = vsel %vm2017_vm13, %v4489_v46, 0.0 }
 0x8b2   : > { %3097 = vadd.xlane.f32.xlu0 %v3096_v47 }
 0x8bd   : > { %v3045_v34 = vpop.permute.xlu1 %3044 }
 0x8be   : > { %v3050_v48 = vsel %vm2099_vm12, %v3045_v34, 0 }
 0x8bf   : > { %3059 = vmatpush.bf16.msrb.mxu1 %v3050_v48  ;;  %v3287_v48 = vld [vmem:[%s6245_s5 + $0x10] sm:$0xff] }
 0x8c4   : > { %3160 = vrot.lane.b32.xlu2 %v5819_v54, %s6231_s22 }
 0x8c6   : > { %3102 = vrot.lane.b32.xlu0 %v5819_v54, %s6232_s15 }
 0x8ed   : > { %2745 = vadd.xlane.f32.xlu2 %v2744_v50  ;;  %v3292_v50 = vpack.c.bf16 %v3288_v40, %v3287_v48 }
 0x8ef   : > { %3309 = vmatpush.bf16.msrb.mxu0 %v3292_v50 }
 0x8f5   : > { %2763 = vadd.xlane.f32.xlu2 %v2762_v52  ;;  %v3326_v52 = vpack.c.bf16 %v3324_v51, %v3323_v20 }
 0x901   : > { %v2981_v56 = vpop.xlane.xlu0 %2980 }
 0x902   : > { %4490 = vrcp.f32 %v2981_v56 }
 0x906   : > { %v3039_v54 = vpop.xlane.xlu2 %3038 }
 0x907   : > { %4492 = vrcp.f32 %v3039_v54  ;;  %v3285_v54 = vld [vmem:[%s6245_s5] sm:$0xff] }
 0x908   : > { %v4491_v4 = vpop.eup %4490 }
 0x909   : > { %v2983_v57 = vmul.f32 %v4491_v4, %v4483_v24  ;;  %v2750_v24 = vsel %vm1827_vm1, %v5873_v35, 0.0  ;;  %v3286_v4 = vld [vmem:[%s6245_s5 + $0x8] sm:$0xff]  ;;  %s6249_s5 = sld [smem:[#allocation55_spill]] }
 0x90b   : > { %v2984_v58 = vpack.c.bf16 %v2983_v57, %v2983_v57  ;;  %v3321_v57 = vld [vmem:[%s6246_s7] sm:$0xff] }
 0x90d   : > { %4132 = vmatmul.msk.bf16.vlgmr.msra.gmra.mxu3 %vm2017_vm13, %v2984_v58  ;;  %v4493_v11 = vpop.eup %4492  ;;  %v3291_v58 = vpack.c.bf16 %v3286_v4, %v3285_v54 }
 0x90e   : > { %v3041_v60 = vmul.f32 %v4493_v11, %v4485_v28  ;;  %v3202_v28 = vpack.c.bf16 %v3199_v19, %v3198_v18  ;;  %v3322_v11 = vld [vmem:[%s6246_s7 + $0x8] sm:$0xff]  ;;  %v4396_v19 = vld [vmem:[%s6247_s18] ss:$0 sm:$0xff]  ;;  %s6253_s18 = sld [smem:[#allocation59_spill]] }
 0x90f   : > { %3310 = vmatpush.bf16.msrb.mxu0 %v3291_v58  ;;  %v4398_v40 = vld [vmem:[%s6249_s5] ss:$0 sm:$0xff]  ;;  %s6251_s5 = sld [smem:[#allocation56_spill]] }
 0x910   : > { %v3042_v61 = vpack.c.bf16 %v3041_v60, %v3041_v60  ;;  %3216 = vmatpush.bf16.msra.mxu2 %v3202_v28  ;;  %v3325_v60 = vpack.c.bf16 %v3322_v11, %v3321_v57 }
 0x912   : > { %4134 = vmatmul.msk.bf16.vlgmr.msrb.gmra.mxu1 %vm2017_vm13, %v3042_v61 }
 0x914   : > { %3217 = vmatpush.bf16.msra.mxu2 %v3201_v32 }
 0x91f   : > { %v3156_v59 = vpop.xlane.xlu2 %3155 }
 0x920   : > { %4494 = vrcp.f32 %v3156_v59 }
 0x925   : > { %v3098_v2 = vpop.xlane.xlu0 %3097 }
 0x926   : > { %v4495_v55 = vpop.eup %4494  ;;  %4496 = vrcp.f32 %v3098_v2 }
 0x927   : > { %v3158_v62 = vmul.f32 %v4495_v55, %v4487_v41  ;;  %v3161_v63 = vpop.permute.xlu2 %3160 }
 0x928   : > { %v3166_v0 = vsel %vm2099_vm12, %v3161_v63, 0 }
 0x929   : > { %v3159_v1 = vpack.c.bf16 %v3158_v62, %v3158_v62  ;;  %3175 = vmatpush.bf16.msra.mxu1 %v3166_v0 }
 0x92c   : > { %4138 = vmatmul.msk.bf16.vlgmr.msra.gmra.mxu1 %vm2017_vm13, %v3159_v1  ;;  %v4497_v3 = vpop.eup %4496 }
 0x92d   : > { %v3100_v6 = vmul.f32 %v4497_v3, %v4489_v46  ;;  %3337 = vmatpush.bf16.msrb.mxu1 %v3326_v52 }
 0x92f   : > { %v3101_v7 = vpack.c.bf16 %v3100_v6, %v3100_v6 }
 0x931   : > { %3338 = vmatpush.bf16.msrb.mxu1 %v3325_v60 }
 0x938   : > { %v3103_v44 = vpop.permute.xlu0 %3102 }
 0x939   : > { %v3108_v37 = vsel %vm2099_vm12, %v3103_v44, 0 }
 0x93a   : > { %3117 = vmatpush.bf16.msrb.mxu3 %v3108_v37 }
 0x93d   : > { %4136 = vmatmul.msk.bf16.vlgmr.msrb.gmra.mxu3 %vm2017_vm13, %v3101_v7 }
 0x960   : > { %v2746_v26 = vpop.xlane.xlu2 %2745 }
 0x961   : > { %v2753_v39 = vmul.f32 %v2746_v26, %v5512_v42 }
 0x963   : > { %v2771_v46 = vmul.f32 %v2753_v39, %v2753_v39 }
 0x968   : > { %v2764_v61 = vpop.xlane.xlu2 %2763 }
 0x969   : > { %v2769_v63 = vmul.f32 %v2764_v61, %v5512_v42 }
 0x98f   : > { %v3061_v10 = vpop.f32.mrf.mxu1 }
 0x990   : > { %v3000_v53 = vpop.f32.mrf.mxu3  ;;  %3182 = vrot.lane.b32.xlu1 %v3061_v10, %s6240_s16 }
 0x997   : > { %v3063_v5 = vpop.f32.mrf.mxu1 }
 0x998   : > { %v3002_v8 = vpop.f32.mrf.mxu3 }
 0x9a9   : > { %v3177_v27 = vpop.f32.mrf.mxu1 }
 0x9aa   : > { %3190 = vrot.lane.b32.xlu1 %v3177_v27, %s6241_s29 }
 0x9b1   : > { %v3179_v12 = vpop.f32.mrf.mxu1 }
 0x9c0   : > { %v3119_v13 = vpop.f32.mrf.mxu3 }
 0x9c1   : > { %3186 = vrot.lane.b32.xlu0 %v3119_v13, %s6244_s4 }
 0x9c8   : > { %v3121_v15 = vpop.f32.mrf.mxu3 }
 0x9d4   : > { %2760 = vadd.xlane.f32.xlu1 %v2759_v17 }
 0x9dc   : > { %2766 = vadd.xlane.f32.xlu1 %v2765_v22  ;;  %v2777_v22 = vsub.f32 %v5883_v49, %v2753_v39 }
 0x9eb   : > { %2748 = vadd.xlane.f32.xlu0 %v2747_v23 }
 0x9f3   : > { %2751 = vadd.xlane.f32.xlu0 %v2750_v24 }
 0xa02   : > { %v3183_v25 = vpop.permute.xlu1 %3182 }
 0xa03   : > { %v3193_v9 = vsel %vm2017_vm13, %v3000_v53, %v3183_v25 }
 0xa1c   : > { %v3191_v33 = vpop.permute.xlu1 %3190 }
 0xa33   : > { %v3187_v30 = vpop.permute.xlu0 %3186 }
 0xa34   : > { %v3194_v36 = vsel %vm2499_vm15, %v3193_v9, %v3187_v30  ;;  %v4397_v9 = vld [vmem:[%s6248_s2] ss:$0 sm:$0xff]  ;;  %s6250_s2 = sld [smem:[#allocation58_spill]] }
 0xa35   : > { %v3195_v31 = vsel %vm2057_vm14, %v3194_v36, %v3191_v33 }
 0xa36   : > { %v3200_v38 = vpack.c.bf16 %v3195_v31, %v3195_v31 }
 0xa38   : > { %4139 = vmatmul.msk.bf16.vlgmr.msra.gmra.mxu2 %vm1827_vm1, %v3200_v38 }
 0xa3a   : > { %v3260_v57 = vld [vmem:[%s6250_s2 + $0x10] sm:$0xff]  ;;  %v3261_v58 = vld [vmem:[%s6250_s2 + $0x18] sm:$0xff]  ;;  %v3258_v60 = vld [vmem:[%s6250_s2] sm:$0xff] }
 0xa3b   : > { %v3264_v11 = vpack.c.bf16 %v3261_v58, %v3260_v57  ;;  %v3259_v61 = vld [vmem:[%s6250_s2 + $0x8] sm:$0xff] }
 0xa3d   : > { %3278 = vmatpush.bf16.msra.mxu3 %v3264_v11 }
 0xa47   : > { %v2761_v41 = vpop.xlane.xlu1 %2760 }
 0xa48   : > { %v2768_v43 = vmul.f32 %v2761_v41, %v5512_v42 }
 0xa4a   : > { %v2774_v47 = vsub.f32 %v2768_v43, %v2771_v46 }
 0xa4c   : > { %v2780_v34 = vadd.f32 1e-05, %v2774_v47 }
 0xa4e   : > { %4498 = vrsqrt.f32 %v2780_v34  ;;  %vm2789_vm6 = vweird.f32 %v2780_v34 }
 0xa4f   : > { %v2767_v44 = vpop.xlane.xlu1 %2766 }
 0xa50   : > { %v2770_v10 = vmul.f32 %v2767_v44, %v5512_v42  ;;  %v4400_v44 = vld [vmem:[#allocation5] ss:$0 sm:$0xff] }
 0xa54   : > { %v4499_v56 = vpop.eup %4498 }
 0xa55   : > { %v2784_v59 = vmul.f32 %v4499_v56, %v2780_v34  ;;  %vm2790_vm5 = vweird.f32 %v4499_v56 }
 0xa56   : > { %vm2791_vm7 = vmor %vm2789_vm6, %vm2790_vm5 }
 0xa57   : > { %v2785_v1 = vmul.f32 %v4499_v56, %v2784_v59  ;;  %v3263_v59 = vpack.c.bf16 %v3259_v61, %v3258_v60 }
 0xa59   : > { %v2786_v6 = vmul.f32 0.5, %v2785_v1  ;;  %3279 = vmatpush.bf16.msra.mxu3 %v3263_v59 }
 0xa5b   : > { %v2787_v5 = vsub.f32 1.5, %v2786_v6 }
 0xa5d   : > { %v2788_v13 = vmul.f32 %v4499_v56, %v2787_v5 }
 0xa5e   : > { %v2749_v55 = vpop.xlane.xlu0 %2748 }
 0xa5f   : > { %v2754_v62 = vmul.f32 %v2749_v55, %v5512_v42  ;;  %v2792_v17 = vsel %vm2791_vm7, %v4499_v56, %v2788_v13 }
 0xa60   : > { %v2813_v18 = vmul.f32 %v2792_v17, %v2777_v22 }
 0xa61   : > { %v2772_v0 = vmul.f32 %v2754_v62, %v2754_v62  ;;  %v2778_v14 = vsub.f32 %v5886_v45, %v2754_v62 }
 0xa62   : > { %v2819_v33 = vmul.f32 %v4396_v19, %v2813_v18 }
 0xa63   : > { %v2775_v2 = vsub.f32 %v2769_v63, %v2772_v0  ;;  %v4399_v63 = vld [vmem:[#allocation2] ss:$0 sm:$0xff] }
 0xa64   : > { %v2825_v49 = vadd.f32 %v4397_v9, %v2819_v33 }
 0xa65   : > { %v2781_v3 = vadd.f32 1e-05, %v2775_v2 }
 0xa66   : > { %v2752_v37 = vpop.xlane.xlu0 %2751 }
 0xa67   : > { %4500 = vrsqrt.f32 %v2781_v3  ;;  %v2755_v7 = vmul.f32 %v2752_v37, %v5512_v42  ;;  %vm2799_vm9 = vweird.f32 %v2781_v3 }
 0xa69   : > { %v2773_v53 = vmul.f32 %v2755_v7, %v2755_v7  ;;  %v2779_v45 = vsub.f32 %v5873_v35, %v2755_v7  ;;  %v4528_v35 = vld [vmem:[%s5730_s10] sm:$0xff]  ;;  %s6252_s10 = sld [smem:[#allocation57_spill]] }
 0xa6b   : > { %v2776_v8 = vsub.f32 %v2770_v10, %v2773_v53 }
 0xa6d   : > { %v4501_v27 = vpop.eup %4500  ;;  %v2782_v12 = vadd.f32 1e-05, %v2776_v8 }
 0xa6e   : > { %v2794_v15 = vmul.f32 %v4501_v27, %v2781_v3  ;;  %vm2800_vm8 = vweird.f32 %v4501_v27 }
 0xa6f   : > { %4502 = vrsqrt.f32 %v2782_v12  ;;  %vm2801_vm10 = vmor %vm2799_vm9, %vm2800_vm8  ;;  %vm2809_vm2 = vweird.f32 %v2782_v12 }
 0xa70   : > { %v2795_v16 = vmul.f32 %v4501_v27, %v2794_v15 }
 0xa72   : > { %v2796_v21 = vmul.f32 0.5, %v2795_v16 }
 0xa74   : > { %v2797_v23 = vsub.f32 1.5, %v2796_v21 }
 0xa75   : > { %v4503_v24 = vpop.eup %4502 }
 0xa76   : > { %v2798_v28 = vmul.f32 %v4501_v27, %v2797_v23  ;;  %v2804_v29 = vmul.f32 %v4503_v24, %v2782_v12  ;;  %vm2810_vm11 = vweird.f32 %v4503_v24 }
 0xa77   : > { %vm2811_vm3 = vmor %vm2809_vm2, %vm2810_vm11 }
 0xa78   : > { %v2802_v32 = vsel %vm2801_vm10, %v4501_v27, %v2798_v28  ;;  %v2805_v25 = vmul.f32 %v4503_v24, %v2804_v29 }
 0xa79   : > { %v2814_v30 = vmul.f32 %v2802_v32, %v2778_v14 }
 0xa7a   : > { %v2806_v36 = vmul.f32 0.5, %v2805_v25 }
 0xa7b   : > { %v2820_v31 = vmul.f32 %v4396_v19, %v2814_v30 }
 0xa7c   : > { %v2807_v38 = vsub.f32 1.5, %v2806_v36 }
 0xa7d   : > { %v2826_v26 = vadd.f32 %v4397_v9, %v2820_v31 }
 0xa7e   : > { %v2808_v39 = vmul.f32 %v4503_v24, %v2807_v38  ;;  %v4401_v38 = vld [vmem:[%s6251_s5] ss:$0 sm:$0xff] }
 0xa7f   : > { %v3289_v41 = vpack.c.bf16 %v2826_v26, %v2825_v49 }
 0xa80   : > { %v2812_v43 = vsel %vm2811_vm3, %v4503_v24, %v2808_v39  ;;  %v4402_v39 = vld [vmem:[%s6252_s10] ss:$0 sm:$0xff] }
 0xa81   : > { %4141 = vmatmul.msk.bf16.vlgmr.msrb.gmra.mxu0 %vm1827_vm1, %v3289_v41  ;;  %4143 = vmatmul.msk.bf16.vlgmr.msrb.gmra.mxu1 %vm1827_vm1, %v3289_v41  ;;  %v2815_v46 = vmul.f32 %v2812_v43, %v2779_v45 }
 0xa83   : > { %v2821_v47 = vmul.f32 %v4396_v19, %v2815_v46 }
 0xa85   : > { %v2827_v34 = vadd.f32 %v4397_v9, %v2821_v47 }
 0xa87   : > { %v3290_v48 = vpack.c.bf16 %v2827_v34, %v2827_v34 }
 0xa91   : > { %4142 = vmatmul.msk.bf16.gmra.mxu0 %vm1827_vm1, %v3290_v48  ;;  %4144 = vmatmul.msk.bf16.gmra.mxu1 %vm1827_vm1, %v3290_v48 }
 0xabb   : > { %v3219_v20 = vpop.f32.mrf.mxu2 }
 0xabc   : > { %v3220_v50 = vadd.f32 %v4398_v40, %v3219_v20 }
 0xabe   : > { %v5945_v51 = vadd.f32 %v4528_v35, %v3220_v50  ;;  %v4403_v50 = vld [vmem:[%s6253_s18] ss:$0 sm:$0xff]  ;;  %s4158_s18 = sshll.u32 %s5291_s0, 3 }
 0xac0   : > { %v3226_v52 = vsel %vm1827_vm1, %v5945_v51, 0.0  ;;  %v3230_v56 = vmul.f32 %v5945_v51, %v5945_v51 }
 0xac1   : > { %3227 = vadd.xlane.f32.xlu2 %v3226_v52 }
 0xac2   : > { %v3231_v54 = vsel %vm1827_vm1, %v3230_v56, 0.0 }
 0xac3   : > { %v3221_v4 = vpop.f32.mrf.mxu2  ;;  %3232 = vadd.xlane.f32.xlu0 %v3231_v54 }
 0xafe   : > { %v3312_v55 = vpop.f32.mrf.mxu0  ;;  %v3340_v62 = vpop.f32.mrf.mxu1 }
 0xaff   : > { %v3313_v2 = vadd.f32 %v4399_v63, %v3312_v55  ;;  %v3341_v15 = vadd.f32 %v4400_v44, %v3340_v62 }
 0xb06   : > { %v3314_v0 = vpop.f32.mrf.mxu0  ;;  %v3342_v1 = vpop.f32.mrf.mxu1 }
 0xb07   : > { %v3315_v3 = vadd.f32 %v4399_v63, %v3314_v0  ;;  %v3343_v27 = vadd.f32 %v4400_v44, %v3342_v1  ;;  %v4529_v0 = vld [vmem:[%s6213_s1] ss:$0 sm:$0xff] }
 0xb09   : > { %v5956_v6 = vpack.c.bf16 %v3315_v3, %v3313_v2  ;;  %v5967_v16 = vpack.c.bf16 %v3343_v27, %v3341_v15 }
 0xb0b   : > { %3414 = vrot.lane.b32.xlu2 %v5956_v6, %s6238_s3  ;;  %v3358_v22 = vsel %vm2017_vm13, %v5956_v6, 0 }
 0xb0e   : > { %v3317_v37 = vpop.f32.mrf.mxu0  ;;  %v3345_v7 = vpop.f32.mrf.mxu1 }
 0xb0f   : > { %v3318_v10 = vadd.f32 %v4399_v63, %v3317_v37  ;;  %v3346_v53 = vadd.f32 %v4400_v44, %v3345_v7 }
 0xb11   : > { %v3351_v5 = vpack.c.bf16 %v3318_v10, %v3318_v10  ;;  %v5960_v8 = vpack.c.bf16 %v3346_v53, %v3346_v53 }
 0xb13   : > { %3484 = vrot.lane.b32.xlu2 %v3351_v5, %s6232_s15  ;;  %3416 = vrot.lane.b32.xlu1 %v3351_v5, %s6238_s3  ;;  %v3361_v12 = vsel %vm2017_vm13, %v3351_v5, 0  ;;  %v3394_v13 = vsel %vm2099_vm12, %v5960_v8, 0 }
 0xb14   : > { %3369 = vmatpush.bf16.xpose.msrb.mxu2 %v3361_v12  ;;  %3402 = vmatpush.bf16.msrb.mxu3 %v3394_v13 }
 0xb16   : > { %v3319_v17 = vpop.f32.mrf.mxu0  ;;  %v3347_v21 = vpop.f32.mrf.mxu1 }
 0xb18   : > { %3403 = vmatpush.bf16.msrb.mxu3 %v5967_v16 }
 0xb1b   : > { %3550 = vrot.lane.b32.xlu1 %v3351_v5, %s6231_s22 }
 0xb1c   : > { %3370 = vmatpush.bf16.xpose.msrb.mxu2 %v3358_v22 }
 0xb34   : > { %v3228_v23 = vpop.xlane.xlu2 %3227 }
 0xb35   : > { %v3229_v24 = vmul.f32 %v3228_v23, %v5512_v42 }
 0xb36   : > { %v3233_v18 = vpop.xlane.xlu0 %3232 }
 0xb37   : > { %v3235_v19 = vmul.f32 %v3229_v24, %v3229_v24  ;;  %v3234_v28 = vmul.f32 %v3233_v18, %v5512_v42  ;;  %v3237_v31 = vsub.f32 %v5945_v51, %v3229_v24 }
 0xb39   : > { %v3236_v29 = vsub.f32 %v3234_v28, %v3235_v19 }
 0xb3b   : > { %v3238_v14 = vadd.f32 1e-05, %v3236_v29 }
 0xb3d   : > { %4504 = vrsqrt.f32 %v3238_v14  ;;  %vm3245_vm5 = vweird.f32 %v3238_v14 }
 0xb43   : > { %v4505_v32 = vpop.eup %4504 }
 0xb44   : > { %v3240_v25 = vmul.f32 %v4505_v32, %v3238_v14  ;;  %vm3246_vm4 = vweird.f32 %v4505_v32 }
 0xb45   : > { %vm3247_vm6 = vmor %vm3245_vm5, %vm3246_vm4 }
 0xb46   : > { %v3241_v9 = vmul.f32 %v4505_v32, %v3240_v25 }
 0xb48   : > { %v3242_v30 = vmul.f32 0.5, %v3241_v9 }
 0xb4a   : > { %v3243_v33 = vsub.f32 1.5, %v3242_v30 }
 0xb4c   : > { %v3244_v36 = vmul.f32 %v4505_v32, %v3243_v33 }
 0xb4e   : > { %v3248_v49 = vsel %vm3247_vm6, %v4505_v32, %v3244_v36 }
 0xb4f   : > { %v3249_v26 = vmul.f32 %v3248_v49, %v3237_v31 }
 0xb51   : > { %v3253_v41 = vmul.f32 %v4401_v38, %v3249_v26 }
 0xb53   : > { %v3257_v43 = vadd.f32 %v4402_v39, %v3253_v41 }
 0xb55   : > { %v3262_v45 = vpack.c.bf16 %v3257_v43, %v3257_v43 }
 0xb57   : > { %4140 = vmatmul.msk.bf16.vlgmr.msra.gmra.mxu3 %vm1827_vm1, %v3262_v45 }
 0xb65   : > { %v3415_v46 = vpop.permute.xlu2 %3414 }
 0xb66   : > { %v3422_v20 = vsel %vm2017_vm13, %v3415_v46, 0 }
 0xb6d   : > { %v3485_v47 = vpop.permute.xlu2 %3484 }
 0xb6e   : > { %v3493_v34 = vsel %vm2017_vm13, %v3485_v47, 0 }
 0xb6f   : > { %3501 = vmatpush.bf16.xpose.msra.mxu0 %v3493_v34 }
 0xb85   : > { %v3417_v48 = vpop.permute.xlu1 %3416 }
 0xb86   : > { %v3425_v40 = vsel %vm2017_vm13, %v3417_v48, 0 }
 0xb87   : > { %3433 = vmatpush.bf16.xpose.msra.mxu2 %v3425_v40 }
 0xb8d   : > { %v3551_v56 = vpop.permute.xlu1 %3550 }
 0xb8e   : > { %v3559_v4 = vsel %vm2017_vm13, %v3551_v56, 0 }
 0xb8f   : > { %3434 = vmatpush.bf16.xpose.msra.mxu2 %v3422_v20 }
 0xbda   : > { %v3281_v35 = vpop.f32.mrf.mxu3 }
 0xbdb   : > { %v3282_v52 = vadd.f32 %v4403_v50, %v3281_v35 }
 0xbdd   : > { %v3349_v54 = vpack.c.bf16 %v3282_v52, %v3282_v52 }
 0xbdf   : > { %3410 = vrot.lane.b32.xlu0 %v3349_v54, %s6238_s3  ;;  %3480 = vrot.lane.b32.xlu2 %v3349_v54, %s6232_s15 }
 0xbe0   : > { %3546 = vrot.lane.b32.xlu1 %v3349_v54, %s6231_s22  ;;  %4145 = vmatmul.msk.bf16.vlgmr.msrb.gmra.mxu2 %vm2017_vm13, %v3349_v54 }
 0xbe1   : > { %3567 = vmatpush.bf16.xpose.msrb.mxu2 %v3559_v4 }
 0xbe2   : > { %v3283_v57 = vpop.f32.mrf.mxu3 }
 0xbe7   : > { %3548 = vrot.lane.b32.xlu0 %v5956_v6, %s6231_s22 }
 0xbef   : > { %3482 = vrot.lane.b32.xlu0 %v5956_v6, %s6232_s15 }
 0xc39   : > { %v3481_v3 = vpop.permute.xlu2 %3480 }
 0xc51   : > { %v3411_v58 = vpop.permute.xlu0 %3410 }
 0xc52   : > { %4147 = vmatmul.msk.bf16.vlgmr.msra.gmra.mxu2 %vm2017_vm13, %v3411_v58  ;;  %v3547_v61 = vpop.permute.xlu1 %3546 }
 0xc59   : > { %v3549_v11 = vpop.permute.xlu0 %3548 }
 0xc5a   : > { %v3556_v60 = vsel %vm2017_vm13, %v3549_v11, 0 }
 0xc5b   : > { %3568 = vmatpush.bf16.xpose.msrb.mxu2 %v3556_v60 }
 0xc61   : > { %v3483_v59 = vpop.permute.xlu0 %3482 }
 0xc62   : > { %v3490_v55 = vsel %vm2017_vm13, %v3483_v59, 0  ;;  %4151 = vmatmul.msk.bf16.vlgmr.msrb.gmra.mxu2 %vm2017_vm13, %v3547_v61 }
 0xc63   : > { %v3372_v62 = vpop.f32.mrf.mxu2  ;;  %3502 = vmatpush.bf16.xpose.msra.mxu0 %v3490_v55 }
 0xc64   : > { %v3376_v63 = vmul.f32 0.35355338, %v3372_v62 }
 0xc66   : > { %v3377_v1 = vadd.f32 %v4529_v0, %v3376_v63 }
 0xc68   : > { %v3378_v2 = vsel %vm2057_vm14, %v3377_v1, -inf }
 0xc69   : > { %3379 = vmax.xlane.f32.xlu1 %v3378_v2 }
 0xc6a   : > { %4149 = vmatmul.msk.bf16.vlgmr.msra.gmra.mxu0 %vm2017_vm13, %v3481_v3 }
 0xc6b   : > { %v3374_v6 = vpop.f32.mrf.mxu2 }
 0xcd5   : > { %v3436_v44 = vpop.f32.mrf.mxu2 }
 0xcd6   : > { %v3440_v37 = vmul.f32 0.35355338, %v3436_v44 }
 0xcd8   : > { %v3441_v7 = vadd.f32 %v4529_v0, %v3440_v37 }
 0xcda   : > { %v3442_v10 = vsel %vm2057_vm14, %v3441_v7, -inf }
 0xcdb   : > { %3443 = vmax.xlane.f32.xlu0 %v3442_v10 }
 0xcdc   : > { %v3380_v53 = vpop.xlane.xlu1 %3379 }
 0xcdd   : > { %v3381_v5 = vsub.f32 %v3377_v1, %v3380_v53  ;;  %v3438_v27 = vpop.f32.mrf.mxu2 }
 0xcdf   : > { %v3382_v12 = vmul.f32 1.442695, %v3381_v5 }
 0xce1   : > { %4506 = vpow2.f32 %v3382_v12 }
 0xce5   : > { %v3570_v13 = vpop.f32.mrf.mxu2 }
 0xce6   : > { %v3574_v15 = vmul.f32 0.35355338, %v3570_v13 }
 0xce7   : > { %v4507_v17 = vpop.eup %4506  ;;  %v3504_v21 = vpop.f32.mrf.mxu0 }
 0xce8   : > { %v3508_v22 = vmul.f32 0.35355338, %v3504_v21  ;;  %v3384_v23 = vsel %vm2057_vm14, %v4507_v17, 0.0  ;;  %v3575_v24 = vadd.f32 %v4529_v0, %v3574_v15 }
 0xce9   : > { %3385 = vadd.xlane.f32.xlu0 %v3384_v23 }
 0xcea   : > { %v3576_v18 = vsel %vm2057_vm14, %v3575_v24, -inf  ;;  %v3509_v19 = vadd.f32 %v4529_v0, %v3508_v22 }
 0xceb   : > { %3577 = vmax.xlane.f32.xlu2 %v3576_v18 }
 0xcec   : > { %v3510_v28 = vsel %vm2057_vm14, %v3509_v19, -inf }
 0xced   : > { %3511 = vmax.xlane.f32.xlu1 %v3510_v28  ;;  %v3572_v29 = vpop.f32.mrf.mxu2 }
 0xcef   : > { %v3506_v14 = vpop.f32.mrf.mxu0 }
 0xcf0   : > { %v4404_v14 = vld [vmem:[#allocation7] ss:$0 sm:$0xff] }
 0xcfd   : > { %3456 = vrot.lane.b32.xlu0 %v5967_v16, %s6238_s3 }
 0xd03   : > { %3590 = vrot.lane.b32.xlu2 %v5960_v8, %s6231_s22 }
 0xd06   : > { %3458 = vrot.lane.b32.xlu1 %v5960_v8, %s6238_s3 }
 0xd0e   : > { %3524 = vrot.lane.b32.xlu1 %v5960_v8, %s6232_s15 }
 0xd16   : > { %3588 = vrot.lane.b32.xlu1 %v5967_v16, %s6231_s22  ;;  %s6254_s22 = sld [smem:[#allocation63_spill]] }
 0xd1c   : > { %s6255_s3 = smov %s6254_s22  ;;  %v3629_v27 = vld [vmem:[%s6254_s22 + $0x10] sm:$0xff] }
 0xd1d   : > { %v3630_v12 = vld [vmem:[%s6255_s3 + $0x18] sm:$0xff]  ;;  %v3627_v15 = vld [vmem:[%s6255_s3] sm:$0xff] }
 0xd1e   : > { %v3633_v13 = vpack.c.bf16 %v3630_v12, %v3629_v27 }
 0xd20   : > { %3647 = vmatpush.bf16.msrb.mxu0 %v3633_v13 }
 0xd4e   : > { %v3444_v32 = vpop.xlane.xlu0 %3443 }
 0xd4f   : > { %v3445_v25 = vsub.f32 %v3441_v7, %v3444_v32 }
 0xd51   : > { %v3446_v9 = vmul.f32 1.442695, %v3445_v25 }
 0xd53   : > { %4508 = vpow2.f32 %v3446_v9 }
 0xd59   : > { %v4509_v30 = vpop.eup %4508 }
 0xd5a   : > { %v3448_v33 = vsel %vm2057_vm14, %v4509_v30, 0.0 }
 0xd5b   : > { %3449 = vadd.xlane.f32.xlu2 %v3448_v33 }
 0xd5c   : > { %v3386_v36 = vpop.xlane.xlu0 %3385 }
 0xd5d   : > { %4510 = vrcp.f32 %v3386_v36 }
 0xd5e   : > { %v3578_v31 = vpop.xlane.xlu2 %3577 }
 0xd5f   : > { %v3579_v38 = vsub.f32 %v3575_v24, %v3578_v31 }
 0xd60   : > { %v3512_v49 = vpop.xlane.xlu1 %3511 }
 0xd61   : > { %v3580_v26 = vmul.f32 1.442695, %v3579_v38  ;;  %v3513_v39 = vsub.f32 %v3509_v19, %v3512_v49 }
 0xd63   : > { %v4511_v41 = vpop.eup %4510  ;;  %4512 = vpow2.f32 %v3580_v26  ;;  %v3514_v8 = vmul.f32 1.442695, %v3513_v39 }
 0xd64   : > { %v3388_v43 = vmul.f32 %v4511_v41, %v4507_v17  ;;  %v3628_v17 = vld [vmem:[%s6255_s3 + $0x8] sm:$0xff] }
 0xd65   : > { %4514 = vpow2.f32 %v3514_v8  ;;  %v3632_v21 = vpack.c.bf16 %v3628_v17, %v3627_v15 }
 0xd66   : > { %v3389_v45 = vpack.c.bf16 %v3388_v43, %v3388_v43  ;;  %v3591_v50 = vpop.permute.xlu2 %3590 }
 0xd67   : > { %v3597_v52 = vsel %vm2099_vm12, %v3591_v50, 0  ;;  %3648 = vmatpush.bf16.msrb.mxu0 %v3632_v21 }
 0xd68   : > { %4146 = vmatmul.msk.bf16.vlgmr.msrb.gmra.mxu3 %vm2057_vm14, %v3389_v45 }
 0xd69   : > { %v4513_v46 = vpop.eup %4512 }
 0xd6a   : > { %v3582_v47 = vsel %vm2057_vm14, %v4513_v46, 0.0 }
 0xd6b   : > { %v4515_v34 = vpop.eup %4514  ;;  %3583 = vadd.xlane.f32.xlu2 %v3582_v47 }
 0xd6c   : > { %v3516_v48 = vsel %vm2057_vm14, %v4515_v34, 0.0 }
 0xd6d   : > { %3517 = vadd.xlane.f32.xlu0 %v3516_v48 }
 0xd6f   : > { %v3457_v35 = vpop.permute.xlu0 %3456 }
 0xd78   : > { %v3459_v40 = vpop.permute.xlu1 %3458 }
 0xd79   : > { %v3465_v20 = vsel %vm2099_vm12, %v3459_v40, 0 }
 0xd7a   : > { %3473 = vmatpush.bf16.msra.mxu3 %v3465_v20 }
 0xd7e   : > { %3474 = vmatpush.bf16.msra.mxu3 %v3457_v35 }
 0xd80   : > { %v3525_v56 = vpop.permute.xlu1 %3524 }
 0xd81   : > { %v3531_v54 = vsel %vm2099_vm12, %v3525_v56, 0 }
 0xd82   : > { %3605 = vmatpush.bf16.msrb.mxu3 %v3597_v52  ;;  %3539 = vmatpush.bf16.msra.mxu1 %v3531_v54 }
 0xd83   : > { %3522 = vrot.lane.b32.xlu2 %v5967_v16, %s6232_s15  ;;  %s6256_s15 = sld [smem:[#allocation64_spill]] }
 0xd88   : > { %v3589_v4 = vpop.permute.xlu1 %3588 }
 0xd89   : > { %3606 = vmatpush.bf16.msrb.mxu3 %v3589_v4  ;;  %s6257_s5 = smov %s6256_s15  ;;  %v3691_v38 = vld [vmem:[%s6256_s15 + $0x10] sm:$0xff]  ;;  %v4405_v4 = vld [vmem:[#allocation8] ss:$0 sm:$0xff] }
 0xd8a   : > { %v3692_v49 = vld [vmem:[%s6257_s5 + $0x18] sm:$0xff]  ;;  %v3689_v39 = vld [vmem:[%s6257_s5] sm:$0xff]  ;;  %v3690_v41 = vld [vmem:[%s6257_s5 + $0x8] sm:$0xff] }
 0xd8b   : > { %v3695_v26 = vpack.c.bf16 %v3692_v49, %v3691_v38  ;;  %v3796_v38 = vld [vmem:[%s6191_s6 + $0x10] sm:$0xff]  ;;  %v3797_v49 = vld [vmem:[%s6191_s6 + $0x18] sm:$0xff] }
 0xdce   : > { %v3450_v57 = vpop.xlane.xlu2 %3449 }
 0xdcf   : > { %4516 = vrcp.f32 %v3450_v57 }
 0xdd5   : > { %v4517_v58 = vpop.eup %4516 }
 0xdd6   : > { %v3452_v11 = vmul.f32 %v4517_v58, %v4509_v30  ;;  %v4406_v58 = vld [vmem:[#allocation10] ss:$0 sm:$0xff] }
 0xdd8   : > { %v3453_v60 = vpack.c.bf16 %v3452_v11, %v3452_v11 }
 0xdda   : > { %4148 = vmatmul.msk.bf16.vlgmr.msra.gmra.mxu3 %vm2057_vm14, %v3453_v60 }
 0xdde   : > { %v3584_v61 = vpop.xlane.xlu2 %3583 }
 0xddf   : > { %4518 = vrcp.f32 %v3584_v61 }
 0xde0   : > { %v3518_v59 = vpop.xlane.xlu0 %3517 }
 0xde1   : > { %4520 = vrcp.f32 %v3518_v59 }
 0xde5   : > { %v4519_v55 = vpop.eup %4518 }
 0xde6   : > { %v3586_v62 = vmul.f32 %v4519_v55, %v4513_v46  ;;  %v3523_v63 = vpop.permute.xlu2 %3522 }
 0xde7   : > { %v4521_v0 = vpop.eup %4520  ;;  %3540 = vmatpush.bf16.msra.mxu1 %v3523_v63 }
 0xde8   : > { %v3587_v1 = vpack.c.bf16 %v3586_v62, %v3586_v62  ;;  %v3520_v16 = vmul.f32 %v4521_v0, %v4515_v34 }
 0xdea   : > { %v3521_v2 = vpack.c.bf16 %v3520_v16, %v3520_v16  ;;  %4152 = vmatmul.msk.bf16.vlgmr.msrb.gmra.mxu3 %vm2057_vm14, %v3587_v1 }
 0xdeb   : > { %v3405_v3 = vpop.f32.mrf.mxu3  ;;  %3709 = vmatpush.bf16.msrb.mxu1 %v3695_v26  ;;  %v3800_v26 = vpack.c.bf16 %v3797_v49, %v3796_v38 }
 0xdec   : > { %4150 = vmatmul.msk.bf16.vlgmr.msra.gmra.mxu1 %vm2057_vm14, %v3521_v2 }
 0xded   : > { %3814 = vmatpush.bf16.msra.mxu3 %v3800_v26 }
 0xdf3   : > { %v3407_v6 = vpop.f32.mrf.mxu3 }
 0xe5d   : > { %v3476_v44 = vpop.f32.mrf.mxu3 }
 0xe5e   : > { %3613 = vrot.lane.b32.xlu1 %v3476_v44, %s6240_s16  ;;  %s6259_s16 = sld [smem:[#allocation70_spill]] }
 0xe64   : > { %s1763_s10 = sand.u32 1, %s6259_s16  }
 0xe65   : > { %v3478_v37 = vpop.f32.mrf.mxu3  ;;  %s4094_s22 = sshll.u32 %s1763_s10, 3  ;;  %s3823_s5 = scalar_lea.sflag [#allocation4], %s1763_s10 }
 0xe66   : > { %s1765_s2 = scalar_lea.vmem [#allocation19], %s4094_s22 }
 0xe67   : > { %s3835_s3 = sshll.u32 %s1765_s2, 4  ;;  %s3836_s3 = int_to_ptr.vmem [resolvable:$true] %s3835_s3 }
 0xe69   : > { %v3542_v7 = vpop.f32.mrf.mxu1 }
 0xe6a   : > { %3617 = vrot.lane.b32.xlu2 %v3542_v7, %s6244_s4  ;;  %s6258_s4 = sld [smem:[#allocation65_spill]] }
 0xe6d   : > { %v3608_v10 = vpop.f32.mrf.mxu3 }
 0xe6e   : > { %3621 = vrot.lane.b32.xlu1 %v3608_v10, %s6241_s29  ;;  %v4407_v10 = vld [vmem:[#allocation11] ss:$0 sm:$0xff]  ;;  %s6260_s29 = sld [smem:[#allocation68_spill]] }
 0xe70   : > { %v3731_v55 = vld [vmem:[%s6258_s4 + $0x30] sm:$0xff]  ;;  %v3732_v62 = vld [vmem:[%s6258_s4 + $0x38] sm:$0xff]  ;;  %v3729_v0 = vld [vmem:[%s6258_s4 + $0x20] sm:$0xff] }
 0xe71   : > { %v3544_v53 = vpop.f32.mrf.mxu1  ;;  %v3737_v63 = vpack.c.bf16 %v3732_v62, %v3731_v55  ;;  %v3730_v1 = vld [vmem:[%s6258_s4 + $0x28] sm:$0xff]  ;;  %v3727_v2 = vld [vmem:[%s6258_s4 + $0x10] sm:$0xff]  ;;  %v3725_v44 = vld [vmem:[%s6258_s4] sm:$0xff] }
 0xe72   : > { %v3736_v16 = vpack.c.bf16 %v3730_v1, %v3729_v0  ;;  %v3726_v37 = vld [vmem:[%s6258_s4 + $0x8] sm:$0xff] }
 0xe73   : > { %3745 = vmatpush.bf16.msra.mxu2 %v3737_v63  ;;  %v3734_v7 = vpack.c.bf16 %v3726_v37, %v3725_v44 }
 0xe74   : > { %s3833_s1 = scalar_lea.hbm %s6260_s29, %s4158_s18  ;;  %s4850_s0 = scalar_lea.hbm %s6260_s29, 16 }
 0xe75   : > { %v3610_v5 = vpop.f32.mrf.mxu3 }
 0xe77   : > { %3746 = vmatpush.bf16.msra.mxu2 %v3736_v16 }
 0xec4   : > { %v3618_v24 = vpop.permute.xlu2 %3617 }
 0xed0   : > { %v3614_v22 = vpop.permute.xlu1 %3613 }
 0xed1   : > { %v3624_v23 = vsel %vm2017_vm13, %v3405_v3, %v3614_v22  ;;  %v3728_v3 = vld [vmem:[%s6258_s4 + $0x18] sm:$0xff]  ;;  %s3837_s4 = sshll.u32 %s3833_s1, 4  ;;  %s3838_s4 = int_to_ptr.hbm [resolvable:$true] %s3837_s4 }
 0xed2   : > { %v3625_v18 = vsel %vm2499_vm15, %v3624_v23, %v3618_v24  ;;  %v3735_v6 = vpack.c.bf16 %v3728_v3, %v3727_v2 }
 0xed4   : > { %3747 = vmatpush.bf16.msra.mxu2 %v3735_v6 }
 0xed8   : > { %3748 = vmatpush.bf16.msra.mxu2 %v3734_v7 }
 0xee0   : > { %v3622_v19 = vpop.permute.xlu1 %3621 }
 0xee1   : > { %v3626_v28 = vsel %vm2057_vm14, %v3625_v18, %v3622_v19 }
 0xee2   : > { %v3631_v29 = vpack.c.bf16 %v3626_v28, %v3626_v28  ;;  %v4408_v28 = vld [vmem:[#allocation13] ss:$0 sm:$0xff] }
 0xee4   : > { %4153 = vmatmul.msk.bf16.vlgmr.msrb.gmra.mxu0 %vm1827_vm1, %v3631_v29 }
 0xf61   : > { %v3650_v32 = vpop.f32.mrf.mxu0 }
 0xf62   : > { %v3651_v25 = vadd.f32 %v4404_v14, %v3650_v32 }
 0xf64   : > { %v6037_v9 = vadd.f32 %v3651_v25, %v5945_v51  ;;  %v3694_v51 = vpack.c.bf16 %v3690_v41, %v3689_v39  ;;  %v3794_v41 = vld [vmem:[%s6191_s6] sm:$0xff] }
 0xf66   : > { %v3657_v30 = vsel %vm1827_vm1, %v6037_v9, 0.0  ;;  %v3661_v33 = vmul.f32 %v6037_v9, %v6037_v9  ;;  %3710 = vmatpush.bf16.msrb.mxu1 %v3694_v51 }
 0xf67   : > { %3658 = vadd.xlane.f32.xlu2 %v3657_v30 }
 0xf68   : > { %v3662_v36 = vsel %vm1827_vm1, %v3661_v33, 0.0 }
 0xf69   : > { %v3652_v31 = vpop.f32.mrf.mxu0  ;;  %3663 = vadd.xlane.f32.xlu1 %v3662_v36 }
 0xfda   : > { %v3659_v8 = vpop.xlane.xlu2 %3658 }
 0xfdb   : > { %v3660_v43 = vmul.f32 %v3659_v8, %v5512_v42  ;;  %v3795_v8 = vld [vmem:[%s6191_s6 + $0x8] sm:$0xff]  ;;  %s4844_s6 = sshra.s32 %s3838_s4, 4  ;;  %s4845_s6 = int_to_ptr.hbm [resolvable:$true] %s4844_s6 }
 0xfdc   : > { %v3664_v45 = vpop.xlane.xlu1 %3663  ;;  %v3799_v51 = vpack.c.bf16 %v3795_v8, %v3794_v41  ;;  %s4846_s7 = scalar_lea.hbm %s4845_s6, 8  ;;  %p4851_p8 = scmp.lt.s32.totalorder %s4845_s6, %s6260_s29 }
 0xfdd   : > { %v3666_v46 = vmul.f32 %v3660_v43, %v3660_v43  ;;  %v3665_v47 = vmul.f32 %v3664_v45, %v5512_v42  ;;  %v3668_v54 = vsub.f32 %v6037_v9, %v3660_v43  ;;  %p4847_p9 = scmp.ne.s32.totalorder %s4845_s6, %s4846_s7  ;;  %p4852_p11 = scmp.lt.s32.totalorder %s4850_s0, %s4846_s7 }
 0xfde   : > { %3815 = vmatpush.bf16.msra.mxu3 %v3799_v51 }
 0xfdf   : > { %v3667_v34 = vsub.f32 %v3665_v47, %v3666_v46  ;;  %p4848_p12 = pnand %p4847_p9, %p5308_p5  ;;  %p4853_p13 = por %p4852_p11, %p4851_p8 }
 0xfe1   : > { %v3669_v48 = vadd.f32 1e-05, %v3667_v34  ;;  %p4849_p0 = pneg %p4848_p12 }
 0xfe3   : > { %4522 = vrsqrt.f32 %v3669_v48  ;;  %vm3676_vm13 = vweird.f32 %v3669_v48  ;;  %p4854_p1 = pnand %p4853_p13, %p4849_p0 }
 0xfe9   : > { %v4523_v40 = vpop.eup %4522 }
 0xfea   : > { %v3671_v20 = vmul.f32 %v4523_v40, %v3669_v48  ;;  %vm3677_vm12 = vweird.f32 %v4523_v40 }
 0xfeb   : > { %vm3678_vm14 = vmor %vm3676_vm13, %vm3677_vm12 }
 0xfec   : > { %v3672_v50 = vmul.f32 %v4523_v40, %v3671_v20 }
 0xfee   : > { %v3673_v35 = vmul.f32 0.5, %v3672_v50 }
 0xff0   : > { %v3674_v52 = vsub.f32 1.5, %v3673_v35 }
 0xff2   : > { %v3675_v56 = vmul.f32 %v4523_v40, %v3674_v52 }
 0xff4   : > { %v3679_v57 = vsel %vm3678_vm14, %v4523_v40, %v3675_v56  ;;  %v4409_v56 = vld [vmem:[#allocation14] ss:$0 sm:$0xff] }
 0xff5   : > { %v3680_v11 = vmul.f32 %v3679_v57, %v3668_v54 }
 0xff7   : > { %v3684_v60 = vmul.f32 %v4405_v4, %v3680_v11  ;;  %v4410_v4 = vld [vmem:[#allocation16] ss:$0 sm:$0xff] }
 0xff9   : > { %v3688_v61 = vadd.f32 %v4406_v58, %v3684_v60  ;;  %v4411_v60 = vld [vmem:[#allocation17] ss:$0 sm:$0xff] }
 0xffb   : > { %v3693_v59 = vpack.c.bf16 %v3688_v61, %v3688_v61 }
 0xffd   : > { %4154 = vmatmul.msk.bf16.vlgmr.msrb.gmra.mxu1 %vm1827_vm1, %v3693_v59 }
0x107a   : > { %v3712_v53 = vpop.f32.mrf.mxu1 }
0x107b   : > { %v3713_v5 = vadd.f32 %v4407_v10, %v3712_v53 }
0x107d   : > { %v3717_v27 = vmul.f32 0.044715, %v3713_v5  ;;  %v3716_v23 = vmul.f32 0.5, %v3713_v5 }
0x107f   : > { %v3718_v12 = vmul.f32 %v3717_v27, %v3713_v5 }
0x1081   : > { %v3719_v13 = vmul.f32 %v3718_v12, %v3713_v5 }
0x1082   : > { %v3714_v15 = vpop.f32.mrf.mxu1 }
0x1083   : > { %v3720_v17 = vadd.f32 %v3719_v13, %v3713_v5 }
0x1085   : > { %v3721_v21 = vmul.f32 0.7978846, %v3720_v17 }
0x1087   : > { %4524 = vtanh.f32 %v3721_v21 }
0x108d   : > { %v4525_v22 = vpop.eup %4524 }
0x108e   : > { %v3723_v24 = vadd.f32 1.0, %v4525_v22 }
0x1090   : > { %v3724_v18 = vmul.f32 %v3723_v24, %v3716_v23 }
0x1092   : > { %v3733_v19 = vpack.c.bf16 %v3724_v18, %v3724_v18 }
0x1094   : > { %4155 = vmatmul.msk.bf16.vlgmr.msra.gmra.mxu2 %vm1800_vm0, %v3733_v19 }
0x1117   : > { %v3750_v29 = vpop.f32.mrf.mxu2 }
0x1118   : > { %v3754_v14 = vadd.f32 %v3750_v29, %v6037_v9 }
0x111a   : > { %v3759_v32 = vadd.f32 %v4408_v28, %v3754_v14 }
0x111c   : > { %v3762_v25 = vsel %vm1827_vm1, %v3759_v32, 0.0  ;;  %v3766_v33 = vmul.f32 %v3759_v32, %v3759_v32 }
0x111d   : > { %3763 = vadd.xlane.f32.xlu0 %v3762_v25 }
0x111e   : > { %v3767_v36 = vsel %vm1827_vm1, %v3766_v33, 0.0 }
0x111f   : > { %v3752_v30 = vpop.f32.mrf.mxu2 }
0x1125   : > { %3768 = vadd.xlane.f32.xlu0 %v3767_v36 }
0x1190   : > { %v3764_v31 = vpop.xlane.xlu0 %3763 }
0x1191   : > { %v3765_v39 = vmul.f32 %v3764_v31, %v5512_v42 }
0x1193   : > { %v3771_v43 = vmul.f32 %v3765_v39, %v3765_v39  ;;  %v3773_v52 = vsub.f32 %v3759_v32, %v3765_v39 }
0x1198   : > { %v3769_v9 = vpop.xlane.xlu0 %3768 }
0x1199   : > { %v3770_v45 = vmul.f32 %v3769_v9, %v5512_v42 }
0x119b   : > { %v3772_v46 = vsub.f32 %v3770_v45, %v3771_v43 }
0x119d   : > { %v3774_v47 = vadd.f32 1e-05, %v3772_v46 }
0x119f   : > { %4526 = vrsqrt.f32 %v3774_v47  ;;  %vm3781_vm15 = vweird.f32 %v3774_v47 }
0x11a5   : > { %v4527_v34 = vpop.eup %4526 }
0x11a6   : > { %v3776_v48 = vmul.f32 %v4527_v34, %v3774_v47  ;;  %vm3782_vm0 = vweird.f32 %v4527_v34 }
0x11a7   : > { %vm3783_vm7 = vmor %vm3781_vm15, %vm3782_vm0 }
0x11a8   : > { %v3777_v40 = vmul.f32 %v4527_v34, %v3776_v48 }
0x11aa   : > { %v3778_v20 = vmul.f32 0.5, %v3777_v40 }
0x11ac   : > { %v3779_v50 = vsub.f32 1.5, %v3778_v20 }
0x11ae   : > { %v3780_v35 = vmul.f32 %v4527_v34, %v3779_v50 }
0x11b0   : > { %v3784_v54 = vsel %vm3783_vm7, %v4527_v34, %v3780_v35 }
0x11b1   : > { %v3785_v42 = vmul.f32 %v3784_v54, %v3773_v52 }
0x11b3   : > { %v3789_v57 = vmul.f32 %v4409_v56, %v3785_v42 }
0x11b5   : > { %v3793_v58 = vadd.f32 %v4410_v4, %v3789_v57 }
0x11b7   : > { %v3798_v11 = vpack.c.bf16 %v3793_v58, %v3793_v58 }
0x11b9   : > { %4156 = vmatmul.msk.bf16.vlgmr.msra.gmra.mxu3 %vm1827_vm1, %v3798_v11 }
0x123c   : > { %v3817_v61 = vpop.f32.mrf.mxu3 }
0x123d   : > { %v3818_v59 = vadd.f32 %v4411_v60, %v3817_v61 }
0x123f   : > { %3821 = vst [vmem:[%s1765_s2] sm:$0xff] %v3818_v59 }
0x1240   : > { %4857 = shalt.err (!%p4854_p1)
}
0x1241   : > { %4202 = dma.vmem_to_hbm [thread:$0]  (%p5308_p5), %s3836_s3, 128, %s3838_s4, %s3823_s5  }
0x1244   : > { %v3819_v55 = vpop.f32.mrf.mxu3 }
0x1245 PF: > { %s6262_s1 = sld [smem:[#allocation72_spill]] }
0x1246   : > { %s6263_s2 = sld [smem:[#allocation69_spill]] }
0x124b   : > { %p4259_p2 = scmp.ge.s32.totalorder %s6262_s1, 2 }
0x124c   : > { %s3849_s10 = sand.u32 1, %s6263_s2  }
0x124d   : > { %p4236_p3 = pnand %p4259_p2, %p5312_p6  ;;  %s3850_s18 = scalar_lea.sflag [#allocation4], %s3849_s10 }
0x124f   : > { %p4237_p4 = pneg %p4236_p3 }
0x1251   : > { %4899 = dma.done.wait (%p4237_p4), %s3850_s18, 128  }
0x1252   : > { %4901 = vsyncadd (%p4237_p4), %s3850_s18, 4294967168  ;;  %s6265_s22 = sld [smem:[#allocation73_spill]] }
0x1253   : > { %s6266_s15 = sld [smem:[#allocation70_spill]] }
0x1254   : > { %s6267_s16 = sld [smem:[#allocation71_spill]] }
0x1255   : > { %s6268_s18 = sld [smem:[#allocation74_spill]] }
0x1258   : > { %p125_p7 = scmp.ge.s32.totalorder %s6265_s22, 4  }
0x125a   :  { %127 = sbr.rel (!%p125_p7) target bundleno = 116 (0x74), region = 372 }
0x125f   :  { %3856 = vsyncpa [#allocation3], 1 }
0x1260   :  { %3858 = vsyncpa [#allocation3 + $0x1], 1 }
0x1261   :  { %3859 = vsyncpa [#allocation6], 1 }
0x1262   :  { %3860 = vsyncpa [#allocation9], 1 }
0x1263   :  { %3861 = vsyncpa [#allocation12], 1 }
0x1264   :  { %3862 = vsyncpa [#allocation15], 1 }
0x1265   :  { %3863 = vsyncpa [#allocation18], 1 }
0x1266   :  { %3864 = vsyncpa [#allocation4], 1 }
0x1267   :  { %3866 = vsyncpa [#allocation4 + $0x1], 1 }

</bundles_post_ra>
